<compile_context>
chip_gen: v6e
topology: v6e:2x2x1
jax: 0.10.0
libtpu: 0.0.40
codegen_flags: <defaults>
</compile_context>

<pallas_src>
import functools

import jax
import jax.numpy as jnp
import numpy as np
from jax.experimental import pallas as pl
from jax.experimental.pallas import tpu as pltpu

BN_EPS = 1e-3          # BatchNorm2d/1d(C, 0.001) -> eps = 0.001
KSIZE = 4              # every conv is 4x4, stride 2, padding 1


# ----------------------------------------------------------------------------
# Kernel 1: both conv stages fused, BN + ReLU, in-kernel stage-2 im2col.
# ----------------------------------------------------------------------------
def _conv_stage_kernel(p1_ref, w1_ref, b1_ref, g1_ref, bt1_ref,
                       w2_ref, b2_ref, g2_ref, bt2_ref,
                       o_ref, pad_ref, *, n, c1, c2, oh2, ow2, bn_eps):
    f32 = jnp.float32
    ct = 2 * c1                       # branch-concatenated stage-1 channels
    s2 = oh2 * ow2                    # stage-2 spatial positions per image

    def bn_relu(y, g, bt):
        # BatchNorm training semantics: per-column batch stats, biased var.
        mu = jnp.mean(y, axis=0, keepdims=True)
        var = jnp.mean(jnp.square(y - mu), axis=0, keepdims=True)
        return jnp.maximum((y - mu) * jax.lax.rsqrt(var + bn_eps) * g + bt, 0.0)

    # ---- stage 1: convl0_1 + convi0_1 as one matmul (shared im2col of x) ----
    y1 = jnp.dot(p1_ref[...], w1_ref[...], preferred_element_type=f32) + b1_ref[...]
    a1 = bn_relu(y1, g1_ref[...], bt1_ref[...])          # (n*4*s2, ct) f32

    # ---- scatter stage-1 output into a zero-padded, parity-factored scratch.
    # p1 rows were ordered (img, qh, qw, hp, wp) with r_h = 2*hp + qh, so each
    # (img, parity) block is a contiguous (oh2*ow2, ct) slab -> static stores.
    pad_ref[...] = jnp.zeros(pad_ref.shape, pad_ref.dtype)
    for img in range(n):
        for q in range(4):
            base = (img * 4 + q) * s2
            pad_ref[img, q, 1:1 + oh2, 1:1 + ow2, :] = (
                a1[base:base + s2, :].reshape(oh2, ow2, ct))

    # ---- in-kernel im2col for stage 2 (static slices only, no strided loads).
    # For tap k of a 4-tap / stride-2 / pad-1 conv, the needed input rows live
    # at parity q and pair offset p0 given by:
    taps = ((0, 1), (1, 0), (1, 1), (2, 0))              # (pair_start, parity)
    cols = []
    for kh in range(KSIZE):
        ph0, qh = taps[kh]
        for kw in range(KSIZE):
            pw0, qw = taps[kw]
            sl = pad_ref[:, qh * 2 + qw, ph0:ph0 + oh2, pw0:pw0 + ow2, :]
            cols.append(sl.reshape(n * s2, ct))
    p2 = jnp.concatenate(cols, axis=1).astype(jnp.bfloat16)   # (n*s2, 16*ct)

    # ---- stage 2: convl0_2 + convi0_2 via block-structured weight ----
    y2 = jnp.dot(p2, w2_ref[...], preferred_element_type=f32) + b2_ref[...]
    a2 = bn_relu(y2, g2_ref[...], bt2_ref[...]).reshape(n, s2, 2 * c2)

    # output layout (n, branch, spatial, channel): branch-separated so the
    # level-0 head weights can be dense.
    o_ref[:, 0, :, :] = a2[:, :, :c2].astype(o_ref.dtype)
    o_ref[:, 1, :, :] = a2[:, :, c2:].astype(o_ref.dtype)


# ----------------------------------------------------------------------------
# Kernel 2: level-0 heads + full FC ladder (levels 1 & 2) + reparameterization.
# ----------------------------------------------------------------------------
def _head_ladder_kernel(h_ref, eps_ref,
                        w_l0h_ref, b_l0h_ref, w_i03_ref, b_i03_ref,
                        w_f1_ref, b_f1_ref, g_f1_ref, bt_f1_ref,
                        w_f2_ref, b_f2_ref, g_f2_ref, bt_f2_ref,
                        w_f3_ref, b_f3_ref,
                        w_l2_ref, b_l2_ref, g_l2_ref, bt_l2_ref,
                        w_h2_ref, b_h2_ref,
                        o_ref, *, c2s, c3, ld0, ld1, ld2, bn_eps):
    f32 = jnp.float32
    bf16 = jnp.bfloat16

    def bn_relu(y, g, bt):
        mu = jnp.mean(y, axis=0, keepdims=True)
        var = jnp.mean(jnp.square(y - mu), axis=0, keepdims=True)
        return jnp.maximum((y - mu) * jax.lax.rsqrt(var + bn_eps) * g + bt, 0.0)

    h = h_ref[...]                                 # (N, 2*c2s) bf16
    eps = eps_ref[...]                             # (N, ld0+ld1+ld2) f32

    # ----- level-0 heads: dense per-branch matmuls ([mean|stddev] packed) ----
    head0 = (jnp.dot(h[:, :c2s], w_l0h_ref[...], preferred_element_type=f32)
             + b_l0h_ref[...])
    m0 = head0[:, :ld0]
    s0 = jax.nn.sigmoid(head0[:, ld0:]) + 0.001
    z0 = m0 + s0 * eps[:, :ld0]

    h1 = (jnp.dot(h[:, c2s:], w_i03_ref[...], preferred_element_type=f32)
          + b_i03_ref[...])                        # affi0_3 output (N, c3), f32

    # ----- level 1: ladder & inference branches fused into block matmuls -----
    u = bn_relu(jnp.dot(h1.astype(bf16), w_f1_ref[...],
                        preferred_element_type=f32) + b_f1_ref[...],
                g_f1_ref[...], bt_f1_ref[...])     # [affl1_1 | affi1_1] + BN
    u = bn_relu(jnp.dot(u.astype(bf16), w_f2_ref[...],
                        preferred_element_type=f32) + b_f2_ref[...],
                g_f2_ref[...], bt_f2_ref[...])     # affl1_2 (+) affi1_2 + BN
    v = (jnp.dot(u.astype(bf16), w_f3_ref[...], preferred_element_type=f32)
         + b_f3_ref[...])                          # [l1 heads | affi1_1 reuse]
    m1 = v[:, :ld1]
    s1 = jax.nn.sigmoid(v[:, ld1:2 * ld1]) + 0.001
    z1 = m1 + s1 * eps[:, ld0:ld0 + ld1]
    h2 = v[:, 2 * ld1:]   # NOTE: reference reuses affi1_1 here (reproduced)

    # ----- level 2 ladder -----
    t = bn_relu(jnp.dot(h2.astype(bf16), w_l2_ref[0],
                        preferred_element_type=f32) + b_l2_ref[0],
                g_l2_ref[0], bt_l2_ref[0])
    t = bn_relu(jnp.dot(t.astype(bf16), w_l2_ref[1],
                        preferred_element_type=f32) + b_l2_ref[1],
                g_l2_ref[1], bt_l2_ref[1])
    head2 = (jnp.dot(t.astype(bf16), w_h2_ref[...], preferred_element_type=f32)
             + b_h2_ref[...])
    m2 = head2[:, :ld2]
    s2 = jax.nn.sigmoid(head2[:, ld2:]) + 0.001
    z2 = m2 + s2 * eps[:, ld0 + ld1:]

    # single lane-packed store (was nine tiny masked stores)
    o_ref[...] = jnp.concatenate([m0, s0, z0, m1, s1, z1, m2, s2, z2], axis=1)


# ----------------------------------------------------------------------------
# pallas_call wrappers — grid-free, whole arrays resident in VMEM
# ----------------------------------------------------------------------------
def _vmem_specs(num):
    return [pl.BlockSpec(memory_space=pltpu.MemorySpace.VMEM) for _ in range(num)]


def pallas_conv_stage(p1, prep, *, n, c1, c2, oh2, ow2):
    args = (p1, prep["w1"], prep["b1"], prep["g1"], prep["bt1"],
            prep["w2"], prep["b2"], prep["g2"], prep["bt2"])
    return pl.pallas_call(
        functools.partial(_conv_stage_kernel, n=n, c1=c1, c2=c2,
                          oh2=oh2, ow2=ow2, bn_eps=BN_EPS),
        out_shape=jax.ShapeDtypeStruct((n, 2, oh2 * ow2, c2), jnp.bfloat16),
        in_specs=_vmem_specs(len(args)),
        out_specs=pl.BlockSpec(memory_space=pltpu.MemorySpace.VMEM),
        scratch_shapes=[pltpu.VMEM((n, 4, oh2 + 2, ow2 + 2, 2 * c1),
                                   jnp.float32)],
    )(*args)


def pallas_head_ladder(h_flat, eps_all, prep, *, c2s, c3, latent_dim):
    ld0, ld1, ld2 = latent_dim
    n = h_flat.shape[0]
    args = (h_flat, eps_all,
            prep["w_l0h"], prep["b_l0h"], prep["w_i03"], prep["b_i03"],
            prep["w_f1"], prep["b_f1"], prep["g_f1"], prep["bt_f1"],
            prep["w_f2"], prep["b_f2"], prep["g_f2"], prep["bt_f2"],
            prep["w_f3"], prep["b_f3"],
            prep["w_l2"], prep["b_l2"], prep["g_l2"], prep["bt_l2"],
            prep["w_h2"], prep["b_h2"])
    return pl.pallas_call(
        functools.partial(_head_ladder_kernel, c2s=c2s, c3=c3,
                          ld0=ld0, ld1=ld1, ld2=ld2, bn_eps=BN_EPS),
        out_shape=jax.ShapeDtypeStruct((n, 3 * (ld0 + ld1 + ld2)), jnp.float32),
        in_specs=_vmem_specs(len(args)),
        out_specs=pl.BlockSpec(memory_space=pltpu.MemorySpace.VMEM),
    )(*args)


# ----------------------------------------------------------------------------
# Stage-1 im2col (on the raw input, in the jitted wrapper).  Rows are ordered
# (n, parity_h, parity_w, h_pair, w_pair) so the kernel can scatter the
# stage-1 output into its parity-factored scratch with contiguous slices.
# ----------------------------------------------------------------------------
def im2col_parity(x_nhwc, k=KSIZE, s=2, p=1):
    N, H, W, C = x_nhwc.shape
    xp = jnp.pad(x_nhwc, ((0, 0), (p, p), (p, p), (0, 0)))
    OH = (H + 2 * p - k) // s + 1
    OW = (W + 2 * p - k) // s + 1
    cols = []
    for kh in range(k):
        for kw in range(k):
            cols.append(xp[:, kh:kh + s * OH:s, kw:kw + s * OW:s, :])
    pt = jnp.concatenate(cols, axis=-1)                   # (N, OH, OW, k*k*C)
    pt = pt.reshape(N, OH // 2, 2, OW // 2, 2, k * k * C)
    pt = jnp.transpose(pt, (0, 2, 4, 1, 3, 5))            # (N, qh, qw, hp, wp, F)
    return pt.reshape(N * OH * OW, k * k * C)


# ----------------------------------------------------------------------------
# Parameter init (deterministic, synthetic; (in, out) Linear convention)
# ----------------------------------------------------------------------------
def init_params(key, n_chan, cs, latent_dim):
    keys = iter(jax.random.split(key, 128))

    def conv_p(cin, cout):
        return {"w": 0.05 * jax.random.normal(next(keys), (cout, cin, KSIZE, KSIZE), jnp.float32),
                "b": 0.05 * jax.random.normal(next(keys), (cout,), jnp.float32)}

    def bn_p(c):
        return {"gamma": 1.0 + 0.1 * jax.random.normal(next(keys), (c,), jnp.float32),
                "beta": 0.05 * jax.random.normal(next(keys), (c,), jnp.float32)}

    def lin_p(din, dout):
        return {"w": (1.0 / jnp.sqrt(din)) * jax.random.normal(next(keys), (din, dout), jnp.float32),
                "b": 0.05 * jax.random.normal(next(keys), (dout,), jnp.float32)}

    feat = cs[2] * (2 * KSIZE) * (2 * KSIZE)     # cs[2] * 8 * 8 (torch NCHW flatten)
    p = {
        "convl0_1": conv_p(n_chan, cs[1]), "bnl0_1": bn_p(cs[1]),
        "convl0_2": conv_p(cs[1], cs[2]),  "bnl0_2": bn_p(cs[2]),
        "affl0_mean": lin_p(feat, latent_dim[0]),
        "affl0_stddev": lin_p(feat, latent_dim[0]),
        "convi0_1": conv_p(n_chan, cs[1]), "bni0_1": bn_p(cs[1]),
        "convi0_2": conv_p(cs[1], cs[2]),  "bni0_2": bn_p(cs[2]),
        "affi0_3": lin_p(feat, cs[3]),
        "affl1_1": lin_p(cs[3], cs[3]), "bnl1_1": bn_p(cs[3]),
        "affl1_2": lin_p(cs[3], cs[3]), "bnl1_2": bn_p(cs[3]),
        "affl1_mean": lin_p(cs[3], latent_dim[1]),
        "affl1_stddev": lin_p(cs[3], latent_dim[1]),
        "affi1_1": lin_p(cs[3], cs[3]), "bni1_1": bn_p(cs[3]),
        "affi1_2": lin_p(cs[3], cs[3]), "bni1_2": bn_p(cs[3]),
        # affi1_3 exists in the module but is never used by forward -> omitted.
        "affl2_1": lin_p(cs[3], cs[3]), "bnl2_1": bn_p(cs[3]),
        "affl2_2": lin_p(cs[3], cs[3]), "bnl2_2": bn_p(cs[3]),
        "affl2_mean": lin_p(cs[3], latent_dim[2]),          # <-- fixed (was missing)
        "affl2_stddev": lin_p(cs[3], latent_dim[2]),        # <-- fixed (was missing)
    }
    return p


# ----------------------------------------------------------------------------
# One-time parameter preparation (packing / permutations / bf16 cast)
# ----------------------------------------------------------------------------
def prepare_params(p, cs, latent_dim, img_size):
    c1, c2, c3 = cs[1], cs[2], cs[3]
    ld0, ld1, ld2 = latent_dim
    S = (img_size[1] // 4) * (img_size[2] // 4)            # 8*8 = 64
    bf16, f32 = jnp.bfloat16, jnp.float32

    def conv_w_mat(w):   # torch (out,in,kh,kw) -> (kh*kw*in, out)
        return jnp.transpose(w, (2, 3, 1, 0)).reshape(-1, w.shape[0])

    def row1(v):
        return v.reshape(1, -1).astype(f32)

    # --- conv stage 1: fuse l0 and i0 branches along output channels ---
    w1 = jnp.concatenate([conv_w_mat(p["convl0_1"]["w"]),
                          conv_w_mat(p["convi0_1"]["w"])], axis=1).astype(bf16)
    b1 = row1(jnp.concatenate([p["convl0_1"]["b"], p["convi0_1"]["b"]]))
    g1 = row1(jnp.concatenate([p["bnl0_1"]["gamma"], p["bni0_1"]["gamma"]]))
    bt1 = row1(jnp.concatenate([p["bnl0_1"]["beta"], p["bni0_1"]["beta"]]))

    # --- conv stage 2: block-structured weight, feature order (kh, kw, chan) ---
    wl2 = jnp.transpose(p["convl0_2"]["w"], (2, 3, 1, 0))
    wi2 = jnp.transpose(p["convi0_2"]["w"], (2, 3, 1, 0))
    w2 = jnp.zeros((KSIZE, KSIZE, 2 * c1, 2 * c2), f32)
    w2 = w2.at[:, :, :c1, :c2].set(wl2).at[:, :, c1:, c2:].set(wi2)
    w2 = w2.reshape(KSIZE * KSIZE * 2 * c1, 2 * c2).astype(bf16)
    b2 = row1(jnp.concatenate([p["convl0_2"]["b"], p["convi0_2"]["b"]]))
    g2 = row1(jnp.concatenate([p["bnl0_2"]["gamma"], p["bni0_2"]["gamma"]]))
    bt2 = row1(jnp.concatenate([p["bnl0_2"]["beta"], p["bni0_2"]["beta"]]))

    # --- level-0 heads: dense, one per branch.  Our per-branch flatten index
    #     is j = s*c2 + c; torch's NCHW flatten index is c*S + s.
    j = np.arange(S * c2)
    perm = jnp.asarray((j % c2) * S + (j // c2))
    w_l0h = jnp.concatenate([p["affl0_mean"]["w"], p["affl0_stddev"]["w"]],
                            axis=1)[perm].astype(bf16)               # (S*c2, 2*ld0)
    b_l0h = row1(jnp.concatenate([p["affl0_mean"]["b"], p["affl0_stddev"]["b"]]))
    w_i03 = p["affi0_3"]["w"][perm].astype(bf16)                     # (S*c2, c3)
    b_i03 = row1(p["affi0_3"]["b"])

    # --- fused level-1 layer 1: [affl1_1 | affi1_1] ---
    w_f1 = jnp.concatenate([p["affl1_1"]["w"], p["affi1_1"]["w"]], axis=1).astype(bf16)
    b_f1 = row1(jnp.concatenate([p["affl1_1"]["b"], p["affi1_1"]["b"]]))
    g_f1 = row1(jnp.concatenate([p["bnl1_1"]["gamma"], p["bni1_1"]["gamma"]]))
    bt_f1 = row1(jnp.concatenate([p["bnl1_1"]["beta"], p["bni1_1"]["beta"]]))

    # --- fused level-1 layer 2: affl1_2 (+) affi1_2 (block-diagonal) ---
    w_f2 = jnp.zeros((2 * c3, 2 * c3), f32)
    w_f2 = w_f2.at[:c3, :c3].set(p["affl1_2"]["w"]).at[c3:, c3:].set(p["affi1_2"]["w"])
    w_f2 = w_f2.astype(bf16)
    b_f2 = row1(jnp.concatenate([p["affl1_2"]["b"], p["affi1_2"]["b"]]))
    g_f2 = row1(jnp.concatenate([p["bnl1_2"]["gamma"], p["bni1_2"]["gamma"]]))
    bt_f2 = row1(jnp.concatenate([p["bnl1_2"]["beta"], p["bni1_2"]["beta"]]))

    # --- fused level-1 heads + inference projection: [affl1_mean | affl1_stddev]
    #     on the ladder branch (+) affi1_1 (reused, as in the reference) ---
    w_f3 = jnp.zeros((2 * c3, 2 * ld1 + c3), f32)
    w_f3 = w_f3.at[:c3, :ld1].set(p["affl1_mean"]["w"])
    w_f3 = w_f3.at[:c3, ld1:2 * ld1].set(p["affl1_stddev"]["w"])
    w_f3 = w_f3.at[c3:, 2 * ld1:].set(p["affi1_1"]["w"])
    w_f3 = w_f3.astype(bf16)
    b_f3 = row1(jnp.concatenate([p["affl1_mean"]["b"], p["affl1_stddev"]["b"],
                                 p["affi1_1"]["b"]]))

    # --- level-2 ladder (stacked) + heads ---
    w_l2 = jnp.stack([p["affl2_1"]["w"], p["affl2_2"]["w"]]).astype(bf16)
    b_l2 = jnp.stack([p["affl2_1"]["b"], p["affl2_2"]["b"]]).reshape(2, 1, c3).astype(f32)
    g_l2 = jnp.stack([p["bnl2_1"]["gamma"], p["bnl2_2"]["gamma"]]).reshape(2, 1, c3).astype(f32)
    bt_l2 = jnp.stack([p["bnl2_1"]["beta"], p["bnl2_2"]["beta"]]).reshape(2, 1, c3).astype(f32)
    w_h2 = jnp.concatenate([p["affl2_mean"]["w"], p["affl2_stddev"]["w"]], axis=1).astype(bf16)
    b_h2 = row1(jnp.concatenate([p["affl2_mean"]["b"], p["affl2_stddev"]["b"]]))

    return {"w1": w1, "b1": b1, "g1": g1, "bt1": bt1,
            "w2": w2, "b2": b2, "g2": g2, "bt2": bt2,
            "w_l0h": w_l0h, "b_l0h": b_l0h, "w_i03": w_i03, "b_i03": b_i03,
            "w_f1": w_f1, "b_f1": b_f1, "g_f1": g_f1, "bt_f1": bt_f1,
            "w_f2": w_f2, "b_f2": b_f2, "g_f2": g_f2, "bt_f2": bt_f2,
            "w_f3": w_f3, "b_f3": b_f3,
            "w_l2": w_l2, "b_l2": b_l2, "g_l2": g_l2, "bt_l2": bt_l2,
            "w_h2": w_h2, "b_h2": b_h2}


# ----------------------------------------------------------------------------
# Forward pass (training-mode semantics) — meant to be jax.jit'ed
# ----------------------------------------------------------------------------
def encoder_forward(prep, x, rng, *, cs, latent_dim):
    N = x.shape[0]
    c1, c2, c3 = cs[1], cs[2], cs[3]
    ld0, ld1, ld2 = latent_dim
    oh2, ow2 = x.shape[2] // 4, x.shape[3] // 4
    c2s = oh2 * ow2 * c2

    x_nhwc = jnp.transpose(x, (0, 2, 3, 1))                # NCHW -> NHWC once
    p1 = im2col_parity(x_nhwc).astype(jnp.bfloat16)        # (N*H/2*W/2, 48)

    # Kernel 1: both conv stages (both branches), BN + ReLU, in-kernel im2col.
    a2 = pallas_conv_stage(p1, prep, n=N, c1=c1, c2=c2, oh2=oh2, ow2=ow2)
    h_flat = a2.reshape(N, 2 * c2s)                        # free reshape (HBM)

    # pre-drawn Gaussian eps for the three reparameterizations
    # TODO(synk): torch's RNG stream cannot be reproduced bit-exactly; use jax.random.
    eps_all = jax.random.normal(rng, (N, ld0 + ld1 + ld2), jnp.float32)

    # Kernel 2: level-0 heads + full FC ladder; one lane-packed output slab.
    packed = pallas_head_ladder(h_flat, eps_all, prep, c2s=c2s, c3=c3,
                                latent_dim=latent_dim)     # (N, 3*(ld0+ld1+ld2))

    outs, off = [], 0
    for ld in (ld0, ld0, ld0, ld1, ld1, ld1, ld2, ld2, ld2):
        outs.append(packed[:, off:off + ld])
        off += ld
    return tuple(outs)


# ----------------------------------------------------------------------------
if __name__ == "__main__":
    # The Linear input dim cs[2]*8*8 hard-codes 32x32 inputs (two /2 convs -> 8x8).
    cs = (3, 8, 16, 32)
    latent_dim = (2, 2, 2)
    img_size = (3, 32, 32)
    batch = 2

    root = jax.random.PRNGKey(0)
    k_params, k_x, k_eps = jax.random.split(root, 3)

    params = init_params(k_params, img_size[0], cs, latent_dim)
    prep = prepare_params(params, cs, latent_dim, img_size)     # one-time prep
    x = jax.random.normal(k_x, (batch,) + img_size, jnp.float32)

    fwd = jax.jit(functools.partial(encoder_forward, cs=cs, latent_dim=latent_dim))
    outs = fwd(prep, x, k_eps)
    jax.block_until_ready(outs)

    expected_shapes = [(batch, latent_dim[0])] * 3 + \
                      [(batch, latent_dim[1])] * 3 + \
                      [(batch, latent_dim[2])] * 3
    assert all(o.shape == s for o, s in zip(outs, expected_shapes))
    assert all(bool(jnp.all(jnp.isfinite(o))) for o in outs)

    print("KERNEL_OK")
</pallas_src>

<mosaic_0001>
module attributes {stable_mosaic.version = 11 : i64} {
  func.func @_conv_stage_kernel(%arg0: memref<512x48xbf16, #tpu.memory_space<vmem>>, %arg1: memref<48x16xbf16, #tpu.memory_space<vmem>>, %arg2: memref<1x16xf32, #tpu.memory_space<vmem>>, %arg3: memref<1x16xf32, #tpu.memory_space<vmem>>, %arg4: memref<1x16xf32, #tpu.memory_space<vmem>>, %arg5: memref<256x32xbf16, #tpu.memory_space<vmem>>, %arg6: memref<1x32xf32, #tpu.memory_space<vmem>>, %arg7: memref<1x32xf32, #tpu.memory_space<vmem>>, %arg8: memref<1x32xf32, #tpu.memory_space<vmem>>, %arg9: memref<2x2x64x16xbf16, #tpu.memory_space<vmem>>, %arg10: memref<2x4x10x10x16xf32, #tpu.memory_space<vmem>>) attributes {dimension_semantics = [], scalar_prefetch = 0 : i64, scratch_operands = 1 : i64, tpu.core_type = #tpu.core_type<tc>} {
    %c0 = arith.constant 0 : index
    %c0_0 = arith.constant 0 : index
    %0 = vector.load %arg0[%c0, %c0_0] : memref<512x48xbf16, #tpu.memory_space<vmem>>, vector<512x48xbf16>
    %c0_1 = arith.constant 0 : index
    %c0_2 = arith.constant 0 : index
    %1 = vector.load %arg1[%c0_1, %c0_2] : memref<48x16xbf16, #tpu.memory_space<vmem>>, vector<48x16xbf16>
    %cst = arith.constant dense<0.000000e+00> : vector<512x16xf32>
    %2 = tpu.matmul %0, %1, %cst {dimension_numbers = #tpu.dot_dimension_numbers<[1], [0], [0], [1], [0, 0, 1, 1], [], []>} : vector<512x48xbf16>, vector<48x16xbf16>, vector<512x16xf32> -> vector<512x16xf32>
    %c0_3 = arith.constant 0 : index
    %c0_4 = arith.constant 0 : index
    %3 = vector.load %arg2[%c0_3, %c0_4] : memref<1x16xf32, #tpu.memory_space<vmem>>, vector<1x16xf32>
    %4 = vector.broadcast %3 : vector<1x16xf32> to vector<512x16xf32>
    %5 = arith.addf %2, %4 : vector<512x16xf32>
    %c0_5 = arith.constant 0 : index
    %c0_6 = arith.constant 0 : index
    %6 = vector.load %arg3[%c0_5, %c0_6] : memref<1x16xf32, #tpu.memory_space<vmem>>, vector<1x16xf32>
    %c0_7 = arith.constant 0 : index
    %c0_8 = arith.constant 0 : index
    %7 = vector.load %arg4[%c0_7, %c0_8] : memref<1x16xf32, #tpu.memory_space<vmem>>, vector<1x16xf32>
    %cst_9 = arith.constant dense<0.000000e+00> : vector<16xf32>
    %8 = vector.multi_reduction <add>, %5, %cst_9 [0] : vector<512x16xf32> to vector<16xf32>
    %9 = vector.shape_cast %8 : vector<16xf32> to vector<1x16xf32>
    %cst_10 = arith.constant 5.120000e+02 : f32
    %10 = vector.broadcast %cst_10 : f32 to vector<1x16xf32>
    %11 = arith.divf %9, %10 : vector<1x16xf32>
    %12 = vector.broadcast %11 : vector<1x16xf32> to vector<512x16xf32>
    %13 = arith.subf %5, %12 : vector<512x16xf32>
    %14 = arith.mulf %13, %13 : vector<512x16xf32>
    %cst_11 = arith.constant dense<0.000000e+00> : vector<16xf32>
    %15 = vector.multi_reduction <add>, %14, %cst_11 [0] : vector<512x16xf32> to vector<16xf32>
    %16 = vector.shape_cast %15 : vector<16xf32> to vector<1x16xf32>
    %cst_12 = arith.constant 5.120000e+02 : f32
    %17 = vector.broadcast %cst_12 : f32 to vector<1x16xf32>
    %18 = arith.divf %16, %17 : vector<1x16xf32>
    %19 = vector.broadcast %11 : vector<1x16xf32> to vector<512x16xf32>
    %20 = arith.subf %5, %19 : vector<512x16xf32>
    %cst_13 = arith.constant 1.000000e-03 : f32
    %21 = vector.broadcast %cst_13 : f32 to vector<1x16xf32>
    %22 = arith.addf %18, %21 : vector<1x16xf32>
    %23 = math.rsqrt %22 : vector<1x16xf32>
    %24 = vector.broadcast %23 : vector<1x16xf32> to vector<512x16xf32>
    %25 = arith.mulf %20, %24 : vector<512x16xf32>
    %26 = vector.broadcast %6 : vector<1x16xf32> to vector<512x16xf32>
    %27 = arith.mulf %25, %26 : vector<512x16xf32>
    %28 = vector.broadcast %7 : vector<1x16xf32> to vector<512x16xf32>
    %29 = arith.addf %27, %28 : vector<512x16xf32>
    %cst_14 = arith.constant 0.000000e+00 : f32
    %30 = vector.broadcast %cst_14 : f32 to vector<512x16xf32>
    %31 = arith.maximumf %29, %30 : vector<512x16xf32>
    %cst_15 = arith.constant 0.000000e+00 : f32
    %32 = vector.broadcast %cst_15 : f32 to vector<2x4x10x10x16xf32>
    %c0_16 = arith.constant 0 : index
    %c0_17 = arith.constant 0 : index
    %c0_18 = arith.constant 0 : index
    %c0_19 = arith.constant 0 : index
    %c0_20 = arith.constant 0 : index
    %33 = vector.load %arg10[%c0_16, %c0_17, %c0_18, %c0_19, %c0_20] : memref<2x4x10x10x16xf32, #tpu.memory_space<vmem>>, vector<2x4x10x10x16xf32>
    tpu.vector_store %arg10[%c0_16, %c0_17, %c0_18, %c0_19, %c0_20], %32 {strides = array<i32>} : memref<2x4x10x10x16xf32, #tpu.memory_space<vmem>>, vector<2x4x10x10x16xf32>,
    %34 = vector.extract_strided_slice %31 {offsets = [0, 0], sizes = [64, 16], strides = [1, 1]} : vector<512x16xf32> to vector<64x16xf32>
    %35 = vector.shape_cast %34 : vector<64x16xf32> to vector<8x8x16xf32>
    %c0_21 = arith.constant 0 : index
    %c0_22 = arith.constant 0 : index
    %c1 = arith.constant 1 : index
    %c1_23 = arith.constant 1 : index
    %c0_24 = arith.constant 0 : index
    %36 = vector.load %arg10[%c0_21, %c0_22, %c1, %c1_23, %c0_24] : memref<2x4x10x10x16xf32, #tpu.memory_space<vmem>>, vector<1x1x8x8x16xf32>
    %37 = vector.shape_cast %36 : vector<1x1x8x8x16xf32> to vector<8x8x16xf32>
    %38 = vector.shape_cast %35 : vector<8x8x16xf32> to vector<1x1x8x8x16xf32>
    tpu.vector_store %arg10[%c0_21, %c0_22, %c1, %c1_23, %c0_24], %38 {strides = array<i32>} : memref<2x4x10x10x16xf32, #tpu.memory_space<vmem>>, vector<1x1x8x8x16xf32>,
    %39 = vector.extract_strided_slice %31 {offsets = [64, 0], sizes = [64, 16], strides = [1, 1]} : vector<512x16xf32> to vector<64x16xf32>
    %40 = vector.shape_cast %39 : vector<64x16xf32> to vector<8x8x16xf32>
    %c0_25 = arith.constant 0 : index
    %c1_26 = arith.constant 1 : index
    %c1_27 = arith.constant 1 : index
    %c1_28 = arith.constant 1 : index
    %c0_29 = arith.constant 0 : index
    %41 = vector.load %arg10[%c0_25, %c1_26, %c1_27, %c1_28, %c0_29] : memref<2x4x10x10x16xf32, #tpu.memory_space<vmem>>, vector<1x1x8x8x16xf32>
    %42 = vector.shape_cast %41 : vector<1x1x8x8x16xf32> to vector<8x8x16xf32>
    %43 = vector.shape_cast %40 : vector<8x8x16xf32> to vector<1x1x8x8x16xf32>
    tpu.vector_store %arg10[%c0_25, %c1_26, %c1_27, %c1_28, %c0_29], %43 {strides = array<i32>} : memref<2x4x10x10x16xf32, #tpu.memory_space<vmem>>, vector<1x1x8x8x16xf32>,
    %44 = vector.extract_strided_slice %31 {offsets = [128, 0], sizes = [64, 16], strides = [1, 1]} : vector<512x16xf32> to vector<64x16xf32>
    %45 = vector.shape_cast %44 : vector<64x16xf32> to vector<8x8x16xf32>
    %c0_30 = arith.constant 0 : index
    %c2 = arith.constant 2 : index
    %c1_31 = arith.constant 1 : index
    %c1_32 = arith.constant 1 : index
    %c0_33 = arith.constant 0 : index
    %46 = vector.load %arg10[%c0_30, %c2, %c1_31, %c1_32, %c0_33] : memref<2x4x10x10x16xf32, #tpu.memory_space<vmem>>, vector<1x1x8x8x16xf32>
    %47 = vector.shape_cast %46 : vector<1x1x8x8x16xf32> to vector<8x8x16xf32>
    %48 = vector.shape_cast %45 : vector<8x8x16xf32> to vector<1x1x8x8x16xf32>
    tpu.vector_store %arg10[%c0_30, %c2, %c1_31, %c1_32, %c0_33], %48 {strides = array<i32>} : memref<2x4x10x10x16xf32, #tpu.memory_space<vmem>>, vector<1x1x8x8x16xf32>,
    %49 = vector.extract_strided_slice %31 {offsets = [192, 0], sizes = [64, 16], strides = [1, 1]} : vector<512x16xf32> to vector<64x16xf32>
    %50 = vector.shape_cast %49 : vector<64x16xf32> to vector<8x8x16xf32>
    %c0_34 = arith.constant 0 : index
    %c3 = arith.constant 3 : index
    %c1_35 = arith.constant 1 : index
    %c1_36 = arith.constant 1 : index
    %c0_37 = arith.constant 0 : index
    %51 = vector.load %arg10[%c0_34, %c3, %c1_35, %c1_36, %c0_37] : memref<2x4x10x10x16xf32, #tpu.memory_space<vmem>>, vector<1x1x8x8x16xf32>
    %52 = vector.shape_cast %51 : vector<1x1x8x8x16xf32> to vector<8x8x16xf32>
    %53 = vector.shape_cast %50 : vector<8x8x16xf32> to vector<1x1x8x8x16xf32>
    tpu.vector_store %arg10[%c0_34, %c3, %c1_35, %c1_36, %c0_37], %53 {strides = array<i32>} : memref<2x4x10x10x16xf32, #tpu.memory_space<vmem>>, vector<1x1x8x8x16xf32>,
    %54 = vector.extract_strided_slice %31 {offsets = [256, 0], sizes = [64, 16], strides = [1, 1]} : vector<512x16xf32> to vector<64x16xf32>
    %55 = vector.shape_cast %54 : vector<64x16xf32> to vector<8x8x16xf32>
    %c1_38 = arith.constant 1 : index
    %c0_39 = arith.constant 0 : index
    %c1_40 = arith.constant 1 : index
    %c1_41 = arith.constant 1 : index
    %c0_42 = arith.constant 0 : index
    %56 = vector.load %arg10[%c1_38, %c0_39, %c1_40, %c1_41, %c0_42] : memref<2x4x10x10x16xf32, #tpu.memory_space<vmem>>, vector<1x1x8x8x16xf32>
    %57 = vector.shape_cast %56 : vector<1x1x8x8x16xf32> to vector<8x8x16xf32>
    %58 = vector.shape_cast %55 : vector<8x8x16xf32> to vector<1x1x8x8x16xf32>
    tpu.vector_store %arg10[%c1_38, %c0_39, %c1_40, %c1_41, %c0_42], %58 {strides = array<i32>} : memref<2x4x10x10x16xf32, #tpu.memory_space<vmem>>, vector<1x1x8x8x16xf32>,
    %59 = vector.extract_strided_slice %31 {offsets = [320, 0], sizes = [64, 16], strides = [1, 1]} : vector<512x16xf32> to vector<64x16xf32>
    %60 = vector.shape_cast %59 : vector<64x16xf32> to vector<8x8x16xf32>
    %c1_43 = arith.constant 1 : index
    %c1_44 = arith.constant 1 : index
    %c1_45 = arith.constant 1 : index
    %c1_46 = arith.constant 1 : index
    %c0_47 = arith.constant 0 : index
    %61 = vector.load %arg10[%c1_43, %c1_44, %c1_45, %c1_46, %c0_47] : memref<2x4x10x10x16xf32, #tpu.memory_space<vmem>>, vector<1x1x8x8x16xf32>
    %62 = vector.shape_cast %61 : vector<1x1x8x8x16xf32> to vector<8x8x16xf32>
    %63 = vector.shape_cast %60 : vector<8x8x16xf32> to vector<1x1x8x8x16xf32>
    tpu.vector_store %arg10[%c1_43, %c1_44, %c1_45, %c1_46, %c0_47], %63 {strides = array<i32>} : memref<2x4x10x10x16xf32, #tpu.memory_space<vmem>>, vector<1x1x8x8x16xf32>,
    %64 = vector.extract_strided_slice %31 {offsets = [384, 0], sizes = [64, 16], strides = [1, 1]} : vector<512x16xf32> to vector<64x16xf32>
    %65 = vector.shape_cast %64 : vector<64x16xf32> to vector<8x8x16xf32>
    %c1_48 = arith.constant 1 : index
    %c2_49 = arith.constant 2 : index
    %c1_50 = arith.constant 1 : index
    %c1_51 = arith.constant 1 : index
    %c0_52 = arith.constant 0 : index
    %66 = vector.load %arg10[%c1_48, %c2_49, %c1_50, %c1_51, %c0_52] : memref<2x4x10x10x16xf32, #tpu.memory_space<vmem>>, vector<1x1x8x8x16xf32>
    %67 = vector.shape_cast %66 : vector<1x1x8x8x16xf32> to vector<8x8x16xf32>
    %68 = vector.shape_cast %65 : vector<8x8x16xf32> to vector<1x1x8x8x16xf32>
    tpu.vector_store %arg10[%c1_48, %c2_49, %c1_50, %c1_51, %c0_52], %68 {strides = array<i32>} : memref<2x4x10x10x16xf32, #tpu.memory_space<vmem>>, vector<1x1x8x8x16xf32>,
    %69 = vector.extract_strided_slice %31 {offsets = [448, 0], sizes = [64, 16], strides = [1, 1]} : vector<512x16xf32> to vector<64x16xf32>
    %70 = vector.shape_cast %69 : vector<64x16xf32> to vector<8x8x16xf32>
    %c1_53 = arith.constant 1 : index
    %c3_54 = arith.constant 3 : index
    %c1_55 = arith.constant 1 : index
    %c1_56 = arith.constant 1 : index
    %c0_57 = arith.constant 0 : index
    %71 = vector.load %arg10[%c1_53, %c3_54, %c1_55, %c1_56, %c0_57] : memref<2x4x10x10x16xf32, #tpu.memory_space<vmem>>, vector<1x1x8x8x16xf32>
    %72 = vector.shape_cast %71 : vector<1x1x8x8x16xf32> to vector<8x8x16xf32>
    %73 = vector.shape_cast %70 : vector<8x8x16xf32> to vector<1x1x8x8x16xf32>
    tpu.vector_store %arg10[%c1_53, %c3_54, %c1_55, %c1_56, %c0_57], %73 {strides = array<i32>} : memref<2x4x10x10x16xf32, #tpu.memory_space<vmem>>, vector<1x1x8x8x16xf32>,
    %c0_58 = arith.constant 0 : index
    %c3_59 = arith.constant 3 : index
    %c0_60 = arith.constant 0 : index
    %c0_61 = arith.constant 0 : index
    %c0_62 = arith.constant 0 : index
    %74 = vector.load %arg10[%c0_58, %c3_59, %c0_60, %c0_61, %c0_62] : memref<2x4x10x10x16xf32, #tpu.memory_space<vmem>>, vector<2x1x8x8x16xf32>
    %75 = vector.shape_cast %74 : vector<2x1x8x8x16xf32> to vector<2x8x8x16xf32>
    %76 = vector.shape_cast %75 : vector<2x8x8x16xf32> to vector<128x16xf32>
    %c0_63 = arith.constant 0 : index
    %c2_64 = arith.constant 2 : index
    %c0_65 = arith.constant 0 : index
    %c1_66 = arith.constant 1 : index
    %c0_67 = arith.constant 0 : index
    %77 = vector.load %arg10[%c0_63, %c2_64, %c0_65, %c1_66, %c0_67] : memref<2x4x10x10x16xf32, #tpu.memory_space<vmem>>, vector<2x1x8x8x16xf32>
    %78 = vector.shape_cast %77 : vector<2x1x8x8x16xf32> to vector<2x8x8x16xf32>
    %79 = vector.shape_cast %78 : vector<2x8x8x16xf32> to vector<128x16xf32>
    %c0_68 = arith.constant 0 : index
    %c3_69 = arith.constant 3 : index
    %c0_70 = arith.constant 0 : index
    %c1_71 = arith.constant 1 : index
    %c0_72 = arith.constant 0 : index
    %80 = vector.load %arg10[%c0_68, %c3_69, %c0_70, %c1_71, %c0_72] : memref<2x4x10x10x16xf32, #tpu.memory_space<vmem>>, vector<2x1x8x8x16xf32>
    %81 = vector.shape_cast %80 : vector<2x1x8x8x16xf32> to vector<2x8x8x16xf32>
    %82 = vector.shape_cast %81 : vector<2x8x8x16xf32> to vector<128x16xf32>
    %c0_73 = arith.constant 0 : index
    %c2_74 = arith.constant 2 : index
    %c0_75 = arith.constant 0 : index
    %c2_76 = arith.constant 2 : index
    %c0_77 = arith.constant 0 : index
    %83 = vector.load %arg10[%c0_73, %c2_74, %c0_75, %c2_76, %c0_77] : memref<2x4x10x10x16xf32, #tpu.memory_space<vmem>>, vector<2x1x8x8x16xf32>
    %84 = vector.shape_cast %83 : vector<2x1x8x8x16xf32> to vector<2x8x8x16xf32>
    %85 = vector.shape_cast %84 : vector<2x8x8x16xf32> to vector<128x16xf32>
    %c0_78 = arith.constant 0 : index
    %c1_79 = arith.constant 1 : index
    %c1_80 = arith.constant 1 : index
    %c0_81 = arith.constant 0 : index
    %c0_82 = arith.constant 0 : index
    %86 = vector.load %arg10[%c0_78, %c1_79, %c1_80, %c0_81, %c0_82] : memref<2x4x10x10x16xf32, #tpu.memory_space<vmem>>, vector<2x1x8x8x16xf32>
    %87 = vector.shape_cast %86 : vector<2x1x8x8x16xf32> to vector<2x8x8x16xf32>
    %88 = vector.shape_cast %87 : vector<2x8x8x16xf32> to vector<128x16xf32>
    %c0_83 = arith.constant 0 : index
    %c0_84 = arith.constant 0 : index
    %c1_85 = arith.constant 1 : index
    %c1_86 = arith.constant 1 : index
    %c0_87 = arith.constant 0 : index
    %89 = vector.load %arg10[%c0_83, %c0_84, %c1_85, %c1_86, %c0_87] : memref<2x4x10x10x16xf32, #tpu.memory_space<vmem>>, vector<2x1x8x8x16xf32>
    %90 = vector.shape_cast %89 : vector<2x1x8x8x16xf32> to vector<2x8x8x16xf32>
    %91 = vector.shape_cast %90 : vector<2x8x8x16xf32> to vector<128x16xf32>
    %c0_88 = arith.constant 0 : index
    %c1_89 = arith.constant 1 : index
    %c1_90 = arith.constant 1 : index
    %c1_91 = arith.constant 1 : index
    %c0_92 = arith.constant 0 : index
    %92 = vector.load %arg10[%c0_88, %c1_89, %c1_90, %c1_91, %c0_92] : memref<2x4x10x10x16xf32, #tpu.memory_space<vmem>>, vector<2x1x8x8x16xf32>
    %93 = vector.shape_cast %92 : vector<2x1x8x8x16xf32> to vector<2x8x8x16xf32>
    %94 = vector.shape_cast %93 : vector<2x8x8x16xf32> to vector<128x16xf32>
    %c0_93 = arith.constant 0 : index
    %c0_94 = arith.constant 0 : index
    %c1_95 = arith.constant 1 : index
    %c2_96 = arith.constant 2 : index
    %c0_97 = arith.constant 0 : index
    %95 = vector.load %arg10[%c0_93, %c0_94, %c1_95, %c2_96, %c0_97] : memref<2x4x10x10x16xf32, #tpu.memory_space<vmem>>, vector<2x1x8x8x16xf32>
    %96 = vector.shape_cast %95 : vector<2x1x8x8x16xf32> to vector<2x8x8x16xf32>
    %97 = vector.shape_cast %96 : vector<2x8x8x16xf32> to vector<128x16xf32>
    %c0_98 = arith.constant 0 : index
    %c3_99 = arith.constant 3 : index
    %c1_100 = arith.constant 1 : index
    %c0_101 = arith.constant 0 : index
    %c0_102 = arith.constant 0 : index
    %98 = vector.load %arg10[%c0_98, %c3_99, %c1_100, %c0_101, %c0_102] : memref<2x4x10x10x16xf32, #tpu.memory_space<vmem>>, vector<2x1x8x8x16xf32>
    %99 = vector.shape_cast %98 : vector<2x1x8x8x16xf32> to vector<2x8x8x16xf32>
    %100 = vector.shape_cast %99 : vector<2x8x8x16xf32> to vector<128x16xf32>
    %c0_103 = arith.constant 0 : index
    %c2_104 = arith.constant 2 : index
    %c1_105 = arith.constant 1 : index
    %c1_106 = arith.constant 1 : index
    %c0_107 = arith.constant 0 : index
    %101 = vector.load %arg10[%c0_103, %c2_104, %c1_105, %c1_106, %c0_107] : memref<2x4x10x10x16xf32, #tpu.memory_space<vmem>>, vector<2x1x8x8x16xf32>
    %102 = vector.shape_cast %101 : vector<2x1x8x8x16xf32> to vector<2x8x8x16xf32>
    %103 = vector.shape_cast %102 : vector<2x8x8x16xf32> to vector<128x16xf32>
    %c0_108 = arith.constant 0 : index
    %c3_109 = arith.constant 3 : index
    %c1_110 = arith.constant 1 : index
    %c1_111 = arith.constant 1 : index
    %c0_112 = arith.constant 0 : index
    %104 = vector.load %arg10[%c0_108, %c3_109, %c1_110, %c1_111, %c0_112] : memref<2x4x10x10x16xf32, #tpu.memory_space<vmem>>, vector<2x1x8x8x16xf32>
    %105 = vector.shape_cast %104 : vector<2x1x8x8x16xf32> to vector<2x8x8x16xf32>
    %106 = vector.shape_cast %105 : vector<2x8x8x16xf32> to vector<128x16xf32>
    %c0_113 = arith.constant 0 : index
    %c2_114 = arith.constant 2 : index
    %c1_115 = arith.constant 1 : index
    %c2_116 = arith.constant 2 : index
    %c0_117 = arith.constant 0 : index
    %107 = vector.load %arg10[%c0_113, %c2_114, %c1_115, %c2_116, %c0_117] : memref<2x4x10x10x16xf32, #tpu.memory_space<vmem>>, vector<2x1x8x8x16xf32>
    %108 = vector.shape_cast %107 : vector<2x1x8x8x16xf32> to vector<2x8x8x16xf32>
    %109 = vector.shape_cast %108 : vector<2x8x8x16xf32> to vector<128x16xf32>
    %c0_118 = arith.constant 0 : index
    %c1_119 = arith.constant 1 : index
    %c2_120 = arith.constant 2 : index
    %c0_121 = arith.constant 0 : index
    %c0_122 = arith.constant 0 : index
    %110 = vector.load %arg10[%c0_118, %c1_119, %c2_120, %c0_121, %c0_122] : memref<2x4x10x10x16xf32, #tpu.memory_space<vmem>>, vector<2x1x8x8x16xf32>
    %111 = vector.shape_cast %110 : vector<2x1x8x8x16xf32> to vector<2x8x8x16xf32>
    %112 = vector.shape_cast %111 : vector<2x8x8x16xf32> to vector<128x16xf32>
    %c0_123 = arith.constant 0 : index
    %c0_124 = arith.constant 0 : index
    %c2_125 = arith.constant 2 : index
    %c1_126 = arith.constant 1 : index
    %c0_127 = arith.constant 0 : index
    %113 = vector.load %arg10[%c0_123, %c0_124, %c2_125, %c1_126, %c0_127] : memref<2x4x10x10x16xf32, #tpu.memory_space<vmem>>, vector<2x1x8x8x16xf32>
    %114 = vector.shape_cast %113 : vector<2x1x8x8x16xf32> to vector<2x8x8x16xf32>
    %115 = vector.shape_cast %114 : vector<2x8x8x16xf32> to vector<128x16xf32>
    %c0_128 = arith.constant 0 : index
    %c1_129 = arith.constant 1 : index
    %c2_130 = arith.constant 2 : index
    %c1_131 = arith.constant 1 : index
    %c0_132 = arith.constant 0 : index
    %116 = vector.load %arg10[%c0_128, %c1_129, %c2_130, %c1_131, %c0_132] : memref<2x4x10x10x16xf32, #tpu.memory_space<vmem>>, vector<2x1x8x8x16xf32>
    %117 = vector.shape_cast %116 : vector<2x1x8x8x16xf32> to vector<2x8x8x16xf32>
    %118 = vector.shape_cast %117 : vector<2x8x8x16xf32> to vector<128x16xf32>
    %c0_133 = arith.constant 0 : index
    %c0_134 = arith.constant 0 : index
    %c2_135 = arith.constant 2 : index
    %c2_136 = arith.constant 2 : index
    %c0_137 = arith.constant 0 : index
    %119 = vector.load %arg10[%c0_133, %c0_134, %c2_135, %c2_136, %c0_137] : memref<2x4x10x10x16xf32, #tpu.memory_space<vmem>>, vector<2x1x8x8x16xf32>
    %120 = vector.shape_cast %119 : vector<2x1x8x8x16xf32> to vector<2x8x8x16xf32>
    %121 = vector.shape_cast %120 : vector<2x8x8x16xf32> to vector<128x16xf32>
    %122 = tpu.concatenate %76, %79, %82, %85, %88, %91, %94, %97, %100, %103, %106, %109, %112, %115, %118, %121 in 1 : vector<128x16xf32>, vector<128x16xf32>, vector<128x16xf32>, vector<128x16xf32>, vector<128x16xf32>, vector<128x16xf32>, vector<128x16xf32>, vector<128x16xf32>, vector<128x16xf32>, vector<128x16xf32>, vector<128x16xf32>, vector<128x16xf32>, vector<128x16xf32>, vector<128x16xf32>, vector<128x16xf32>, vector<128x16xf32> -> vector<128x256xf32>
    %123 = arith.truncf %122 : vector<128x256xf32> to vector<128x256xbf16>
    %c0_138 = arith.constant 0 : index
    %c0_139 = arith.constant 0 : index
    %124 = vector.load %arg5[%c0_138, %c0_139] : memref<256x32xbf16, #tpu.memory_space<vmem>>, vector<256x32xbf16>
    %cst_140 = arith.constant dense<0.000000e+00> : vector<128x32xf32>
    %125 = tpu.matmul %123, %124, %cst_140 {dimension_numbers = #tpu.dot_dimension_numbers<[1], [0], [0], [1], [0, 0, 1, 1], [], []>} : vector<128x256xbf16>, vector<256x32xbf16>, vector<128x32xf32> -> vector<128x32xf32>
    %c0_141 = arith.constant 0 : index
    %c0_142 = arith.constant 0 : index
    %126 = vector.load %arg6[%c0_141, %c0_142] : memref<1x32xf32, #tpu.memory_space<vmem>>, vector<1x32xf32>
    %127 = vector.broadcast %126 : vector<1x32xf32> to vector<128x32xf32>
    %128 = arith.addf %125, %127 : vector<128x32xf32>
    %c0_143 = arith.constant 0 : index
    %c0_144 = arith.constant 0 : index
    %129 = vector.load %arg7[%c0_143, %c0_144] : memref<1x32xf32, #tpu.memory_space<vmem>>, vector<1x32xf32>
    %c0_145 = arith.constant 0 : index
    %c0_146 = arith.constant 0 : index
    %130 = vector.load %arg8[%c0_145, %c0_146] : memref<1x32xf32, #tpu.memory_space<vmem>>, vector<1x32xf32>
    %cst_147 = arith.constant dense<0.000000e+00> : vector<32xf32>
    %131 = vector.multi_reduction <add>, %128, %cst_147 [0] : vector<128x32xf32> to vector<32xf32>
    %132 = vector.shape_cast %131 : vector<32xf32> to vector<1x32xf32>
    %cst_148 = arith.constant 1.280000e+02 : f32
    %133 = vector.broadcast %cst_148 : f32 to vector<1x32xf32>
    %134 = arith.divf %132, %133 : vector<1x32xf32>
    %135 = vector.broadcast %134 : vector<1x32xf32> to vector<128x32xf32>
    %136 = arith.subf %128, %135 : vector<128x32xf32>
    %137 = arith.mulf %136, %136 : vector<128x32xf32>
    %cst_149 = arith.constant dense<0.000000e+00> : vector<32xf32>
    %138 = vector.multi_reduction <add>, %137, %cst_149 [0] : vector<128x32xf32> to vector<32xf32>
    %139 = vector.shape_cast %138 : vector<32xf32> to vector<1x32xf32>
    %cst_150 = arith.constant 1.280000e+02 : f32
    %140 = vector.broadcast %cst_150 : f32 to vector<1x32xf32>
    %141 = arith.divf %139, %140 : vector<1x32xf32>
    %142 = vector.broadcast %134 : vector<1x32xf32> to vector<128x32xf32>
    %143 = arith.subf %128, %142 : vector<128x32xf32>
    %cst_151 = arith.constant 1.000000e-03 : f32
    %144 = vector.broadcast %cst_151 : f32 to vector<1x32xf32>
    %145 = arith.addf %141, %144 : vector<1x32xf32>
    %146 = math.rsqrt %145 : vector<1x32xf32>
    %147 = vector.broadcast %146 : vector<1x32xf32> to vector<128x32xf32>
    %148 = arith.mulf %143, %147 : vector<128x32xf32>
    %149 = vector.broadcast %129 : vector<1x32xf32> to vector<128x32xf32>
    %150 = arith.mulf %148, %149 : vector<128x32xf32>
    %151 = vector.broadcast %130 : vector<1x32xf32> to vector<128x32xf32>
    %152 = arith.addf %150, %151 : vector<128x32xf32>
    %cst_152 = arith.constant 0.000000e+00 : f32
    %153 = vector.broadcast %cst_152 : f32 to vector<128x32xf32>
    %154 = arith.maximumf %152, %153 : vector<128x32xf32>
    %155 = vector.shape_cast %154 : vector<128x32xf32> to vector<2x64x32xf32>
    %156 = vector.extract_strided_slice %155 {offsets = [0, 0, 0], sizes = [2, 64, 16], strides = [1, 1, 1]} : vector<2x64x32xf32> to vector<2x64x16xf32>
    %157 = arith.truncf %156 : vector<2x64x16xf32> to vector<2x64x16xbf16>
    %c0_153 = arith.constant 0 : index
    %c0_154 = arith.constant 0 : index
    %c0_155 = arith.constant 0 : index
    %c0_156 = arith.constant 0 : index
    %158 = vector.load %arg9[%c0_153, %c0_154, %c0_155, %c0_156] : memref<2x2x64x16xbf16, #tpu.memory_space<vmem>>, vector<2x1x64x16xbf16>
    %159 = vector.shape_cast %158 : vector<2x1x64x16xbf16> to vector<2x64x16xbf16>
    %160 = vector.shape_cast %157 : vector<2x64x16xbf16> to vector<2x1x64x16xbf16>
    tpu.vector_store %arg9[%c0_153, %c0_154, %c0_155, %c0_156], %160 {strides = array<i32>} : memref<2x2x64x16xbf16, #tpu.memory_space<vmem>>, vector<2x1x64x16xbf16>,
    %161 = vector.extract_strided_slice %155 {offsets = [0, 0, 16], sizes = [2, 64, 16], strides = [1, 1, 1]} : vector<2x64x32xf32> to vector<2x64x16xf32>
    %162 = arith.truncf %161 : vector<2x64x16xf32> to vector<2x64x16xbf16>
    %c0_157 = arith.constant 0 : index
    %c1_158 = arith.constant 1 : index
    %c0_159 = arith.constant 0 : index
    %c0_160 = arith.constant 0 : index
    %163 = vector.load %arg9[%c0_157, %c1_158, %c0_159, %c0_160] : memref<2x2x64x16xbf16, #tpu.memory_space<vmem>>, vector<2x1x64x16xbf16>
    %164 = vector.shape_cast %163 : vector<2x1x64x16xbf16> to vector<2x64x16xbf16>
    %165 = vector.shape_cast %162 : vector<2x64x16xbf16> to vector<2x1x64x16xbf16>
    tpu.vector_store %arg9[%c0_157, %c1_158, %c0_159, %c0_160], %165 {strides = array<i32>} : memref<2x2x64x16xbf16, #tpu.memory_space<vmem>>, vector<2x1x64x16xbf16>,
    return
  }
}

module attributes {stable_mosaic.version = 11 : i64} {
  func.func @_head_ladder_kernel(%arg0: memref<2x2048xbf16, #tpu.memory_space<vmem>>, %arg1: memref<2x6xf32, #tpu.memory_space<vmem>>, %arg2: memref<1024x4xbf16, #tpu.memory_space<vmem>>, %arg3: memref<1x4xf32, #tpu.memory_space<vmem>>, %arg4: memref<1024x32xbf16, #tpu.memory_space<vmem>>, %arg5: memref<1x32xf32, #tpu.memory_space<vmem>>, %arg6: memref<32x64xbf16, #tpu.memory_space<vmem>>, %arg7: memref<1x64xf32, #tpu.memory_space<vmem>>, %arg8: memref<1x64xf32, #tpu.memory_space<vmem>>, %arg9: memref<1x64xf32, #tpu.memory_space<vmem>>, %arg10: memref<64x64xbf16, #tpu.memory_space<vmem>>, %arg11: memref<1x64xf32, #tpu.memory_space<vmem>>, %arg12: memref<1x64xf32, #tpu.memory_space<vmem>>, %arg13: memref<1x64xf32, #tpu.memory_space<vmem>>, %arg14: memref<64x36xbf16, #tpu.memory_space<vmem>>, %arg15: memref<1x36xf32, #tpu.memory_space<vmem>>, %arg16: memref<2x32x32xbf16, #tpu.memory_space<vmem>>, %arg17: memref<2x1x32xf32, #tpu.memory_space<vmem>>, %arg18: memref<2x1x32xf32, #tpu.memory_space<vmem>>, %arg19: memref<2x1x32xf32, #tpu.memory_space<vmem>>, %arg20: memref<32x4xbf16, #tpu.memory_space<vmem>>, %arg21: memref<1x4xf32, #tpu.memory_space<vmem>>, %arg22: memref<2x18xf32, #tpu.memory_space<vmem>>) attributes {dimension_semantics = [], scalar_prefetch = 0 : i64, scratch_operands = 0 : i64, tpu.core_type = #tpu.core_type<tc>} {
    %c0 = arith.constant 0 : index
    %c0_0 = arith.constant 0 : index
    %0 = vector.load %arg0[%c0, %c0_0] : memref<2x2048xbf16, #tpu.memory_space<vmem>>, vector<2x2048xbf16>
    %c0_1 = arith.constant 0 : index
    %c0_2 = arith.constant 0 : index
    %1 = vector.load %arg1[%c0_1, %c0_2] : memref<2x6xf32, #tpu.memory_space<vmem>>, vector<2x6xf32>
    %2 = vector.extract_strided_slice %0 {offsets = [0, 0], sizes = [2, 1024], strides = [1, 1]} : vector<2x2048xbf16> to vector<2x1024xbf16>
    %c0_3 = arith.constant 0 : index
    %c0_4 = arith.constant 0 : index
    %3 = vector.load %arg2[%c0_3, %c0_4] : memref<1024x4xbf16, #tpu.memory_space<vmem>>, vector<1024x4xbf16>
    %cst = arith.constant dense<0.000000e+00> : vector<2x4xf32>
    %4 = tpu.matmul %2, %3, %cst {dimension_numbers = #tpu.dot_dimension_numbers<[1], [0], [0], [1], [0, 0, 1, 1], [], []>} : vector<2x1024xbf16>, vector<1024x4xbf16>, vector<2x4xf32> -> vector<2x4xf32>
    %c0_5 = arith.constant 0 : index
    %c0_6 = arith.constant 0 : index
    %5 = vector.load %arg3[%c0_5, %c0_6] : memref<1x4xf32, #tpu.memory_space<vmem>>, vector<1x4xf32>
    %6 = vector.broadcast %5 : vector<1x4xf32> to vector<2x4xf32>
    %7 = arith.addf %4, %6 : vector<2x4xf32>
    %8 = vector.extract_strided_slice %7 {offsets = [0, 0], sizes = [2, 2], strides = [1, 1]} : vector<2x4xf32> to vector<2x2xf32>
    %9 = vector.extract_strided_slice %7 {offsets = [0, 2], sizes = [2, 2], strides = [1, 1]} : vector<2x4xf32> to vector<2x2xf32>
    %10 = arith.negf %9 : vector<2x2xf32>
    %11 = math.exp %10 : vector<2x2xf32>
    %cst_7 = arith.constant 1.000000e+00 : f32
    %12 = vector.broadcast %cst_7 : f32 to vector<2x2xf32>
    %13 = arith.addf %12, %11 : vector<2x2xf32>
    %14 = arith.divf %12, %13 : vector<2x2xf32>
    %cst_8 = arith.constant 1.000000e-03 : f32
    %15 = vector.broadcast %cst_8 : f32 to vector<2x2xf32>
    %16 = arith.addf %14, %15 : vector<2x2xf32>
    %17 = vector.extract_strided_slice %1 {offsets = [0, 0], sizes = [2, 2], strides = [1, 1]} : vector<2x6xf32> to vector<2x2xf32>
    %18 = arith.mulf %16, %17 : vector<2x2xf32>
    %19 = arith.addf %8, %18 : vector<2x2xf32>
    %20 = vector.extract_strided_slice %0 {offsets = [0, 1024], sizes = [2, 1024], strides = [1, 1]} : vector<2x2048xbf16> to vector<2x1024xbf16>
    %c0_9 = arith.constant 0 : index
    %c0_10 = arith.constant 0 : index
    %21 = vector.load %arg4[%c0_9, %c0_10] : memref<1024x32xbf16, #tpu.memory_space<vmem>>, vector<1024x32xbf16>
    %cst_11 = arith.constant dense<0.000000e+00> : vector<2x32xf32>
    %22 = tpu.matmul %20, %21, %cst_11 {dimension_numbers = #tpu.dot_dimension_numbers<[1], [0], [0], [1], [0, 0, 1, 1], [], []>} : vector<2x1024xbf16>, vector<1024x32xbf16>, vector<2x32xf32> -> vector<2x32xf32>
    %c0_12 = arith.constant 0 : index
    %c0_13 = arith.constant 0 : index
    %23 = vector.load %arg5[%c0_12, %c0_13] : memref<1x32xf32, #tpu.memory_space<vmem>>, vector<1x32xf32>
    %24 = vector.broadcast %23 : vector<1x32xf32> to vector<2x32xf32>
    %25 = arith.addf %22, %24 : vector<2x32xf32>
    %26 = arith.truncf %25 : vector<2x32xf32> to vector<2x32xbf16>
    %c0_14 = arith.constant 0 : index
    %c0_15 = arith.constant 0 : index
    %27 = vector.load %arg6[%c0_14, %c0_15] : memref<32x64xbf16, #tpu.memory_space<vmem>>, vector<32x64xbf16>
    %cst_16 = arith.constant dense<0.000000e+00> : vector<2x64xf32>
    %28 = tpu.matmul %26, %27, %cst_16 {dimension_numbers = #tpu.dot_dimension_numbers<[1], [0], [0], [1], [0, 0, 1, 1], [], []>} : vector<2x32xbf16>, vector<32x64xbf16>, vector<2x64xf32> -> vector<2x64xf32>
    %c0_17 = arith.constant 0 : index
    %c0_18 = arith.constant 0 : index
    %29 = vector.load %arg7[%c0_17, %c0_18] : memref<1x64xf32, #tpu.memory_space<vmem>>, vector<1x64xf32>
    %30 = vector.broadcast %29 : vector<1x64xf32> to vector<2x64xf32>
    %31 = arith.addf %28, %30 : vector<2x64xf32>
    %c0_19 = arith.constant 0 : index
    %c0_20 = arith.constant 0 : index
    %32 = vector.load %arg8[%c0_19, %c0_20] : memref<1x64xf32, #tpu.memory_space<vmem>>, vector<1x64xf32>
    %c0_21 = arith.constant 0 : index
    %c0_22 = arith.constant 0 : index
    %33 = vector.load %arg9[%c0_21, %c0_22] : memref<1x64xf32, #tpu.memory_space<vmem>>, vector<1x64xf32>
    %cst_23 = arith.constant dense<0.000000e+00> : vector<64xf32>
    %34 = vector.multi_reduction <add>, %31, %cst_23 [0] : vector<2x64xf32> to vector<64xf32>
    %35 = vector.shape_cast %34 : vector<64xf32> to vector<1x64xf32>
    %cst_24 = arith.constant 2.000000e+00 : f32
    %36 = vector.broadcast %cst_24 : f32 to vector<1x64xf32>
    %37 = arith.divf %35, %36 : vector<1x64xf32>
    %38 = vector.broadcast %37 : vector<1x64xf32> to vector<2x64xf32>
    %39 = arith.subf %31, %38 : vector<2x64xf32>
    %40 = arith.mulf %39, %39 : vector<2x64xf32>
    %cst_25 = arith.constant dense<0.000000e+00> : vector<64xf32>
    %41 = vector.multi_reduction <add>, %40, %cst_25 [0] : vector<2x64xf32> to vector<64xf32>
    %42 = vector.shape_cast %41 : vector<64xf32> to vector<1x64xf32>
    %cst_26 = arith.constant 2.000000e+00 : f32
    %43 = vector.broadcast %cst_26 : f32 to vector<1x64xf32>
    %44 = arith.divf %42, %43 : vector<1x64xf32>
    %45 = vector.broadcast %37 : vector<1x64xf32> to vector<2x64xf32>
    %46 = arith.subf %31, %45 : vector<2x64xf32>
    %cst_27 = arith.constant 1.000000e-03 : f32
    %47 = vector.broadcast %cst_27 : f32 to vector<1x64xf32>
    %48 = arith.addf %44, %47 : vector<1x64xf32>
    %49 = math.rsqrt %48 : vector<1x64xf32>
    %50 = vector.broadcast %49 : vector<1x64xf32> to vector<2x64xf32>
    %51 = arith.mulf %46, %50 : vector<2x64xf32>
    %52 = vector.broadcast %32 : vector<1x64xf32> to vector<2x64xf32>
    %53 = arith.mulf %51, %52 : vector<2x64xf32>
    %54 = vector.broadcast %33 : vector<1x64xf32> to vector<2x64xf32>
    %55 = arith.addf %53, %54 : vector<2x64xf32>
    %cst_28 = arith.constant 0.000000e+00 : f32
    %56 = vector.broadcast %cst_28 : f32 to vector<2x64xf32>
    %57 = arith.maximumf %55, %56 : vector<2x64xf32>
    %58 = arith.truncf %57 : vector<2x64xf32> to vector<2x64xbf16>
    %c0_29 = arith.constant 0 : index
    %c0_30 = arith.constant 0 : index
    %59 = vector.load %arg10[%c0_29, %c0_30] : memref<64x64xbf16, #tpu.memory_space<vmem>>, vector<64x64xbf16>
    %cst_31 = arith.constant dense<0.000000e+00> : vector<2x64xf32>
    %60 = tpu.matmul %58, %59, %cst_31 {dimension_numbers = #tpu.dot_dimension_numbers<[1], [0], [0], [1], [0, 0, 1, 1], [], []>} : vector<2x64xbf16>, vector<64x64xbf16>, vector<2x64xf32> -> vector<2x64xf32>
    %c0_32 = arith.constant 0 : index
    %c0_33 = arith.constant 0 : index
    %61 = vector.load %arg11[%c0_32, %c0_33] : memref<1x64xf32, #tpu.memory_space<vmem>>, vector<1x64xf32>
    %62 = vector.broadcast %61 : vector<1x64xf32> to vector<2x64xf32>
    %63 = arith.addf %60, %62 : vector<2x64xf32>
    %c0_34 = arith.constant 0 : index
    %c0_35 = arith.constant 0 : index
    %64 = vector.load %arg12[%c0_34, %c0_35] : memref<1x64xf32, #tpu.memory_space<vmem>>, vector<1x64xf32>
    %c0_36 = arith.constant 0 : index
    %c0_37 = arith.constant 0 : index
    %65 = vector.load %arg13[%c0_36, %c0_37] : memref<1x64xf32, #tpu.memory_space<vmem>>, vector<1x64xf32>
    %cst_38 = arith.constant dense<0.000000e+00> : vector<64xf32>
    %66 = vector.multi_reduction <add>, %63, %cst_38 [0] : vector<2x64xf32> to vector<64xf32>
    %67 = vector.shape_cast %66 : vector<64xf32> to vector<1x64xf32>
    %cst_39 = arith.constant 2.000000e+00 : f32
    %68 = vector.broadcast %cst_39 : f32 to vector<1x64xf32>
    %69 = arith.divf %67, %68 : vector<1x64xf32>
    %70 = vector.broadcast %69 : vector<1x64xf32> to vector<2x64xf32>
    %71 = arith.subf %63, %70 : vector<2x64xf32>
    %72 = arith.mulf %71, %71 : vector<2x64xf32>
    %cst_40 = arith.constant dense<0.000000e+00> : vector<64xf32>
    %73 = vector.multi_reduction <add>, %72, %cst_40 [0] : vector<2x64xf32> to vector<64xf32>
    %74 = vector.shape_cast %73 : vector<64xf32> to vector<1x64xf32>
    %cst_41 = arith.constant 2.000000e+00 : f32
    %75 = vector.broadcast %cst_41 : f32 to vector<1x64xf32>
    %76 = arith.divf %74, %75 : vector<1x64xf32>
    %77 = vector.broadcast %69 : vector<1x64xf32> to vector<2x64xf32>
    %78 = arith.subf %63, %77 : vector<2x64xf32>
    %cst_42 = arith.constant 1.000000e-03 : f32
    %79 = vector.broadcast %cst_42 : f32 to vector<1x64xf32>
    %80 = arith.addf %76, %79 : vector<1x64xf32>
    %81 = math.rsqrt %80 : vector<1x64xf32>
    %82 = vector.broadcast %81 : vector<1x64xf32> to vector<2x64xf32>
    %83 = arith.mulf %78, %82 : vector<2x64xf32>
    %84 = vector.broadcast %64 : vector<1x64xf32> to vector<2x64xf32>
    %85 = arith.mulf %83, %84 : vector<2x64xf32>
    %86 = vector.broadcast %65 : vector<1x64xf32> to vector<2x64xf32>
    %87 = arith.addf %85, %86 : vector<2x64xf32>
    %cst_43 = arith.constant 0.000000e+00 : f32
    %88 = vector.broadcast %cst_43 : f32 to vector<2x64xf32>
    %89 = arith.maximumf %87, %88 : vector<2x64xf32>
    %90 = arith.truncf %89 : vector<2x64xf32> to vector<2x64xbf16>
    %c0_44 = arith.constant 0 : index
    %c0_45 = arith.constant 0 : index
    %91 = vector.load %arg14[%c0_44, %c0_45] : memref<64x36xbf16, #tpu.memory_space<vmem>>, vector<64x36xbf16>
    %cst_46 = arith.constant dense<0.000000e+00> : vector<2x36xf32>
    %92 = tpu.matmul %90, %91, %cst_46 {dimension_numbers = #tpu.dot_dimension_numbers<[1], [0], [0], [1], [0, 0, 1, 1], [], []>} : vector<2x64xbf16>, vector<64x36xbf16>, vector<2x36xf32> -> vector<2x36xf32>
    %c0_47 = arith.constant 0 : index
    %c0_48 = arith.constant 0 : index
    %93 = vector.load %arg15[%c0_47, %c0_48] : memref<1x36xf32, #tpu.memory_space<vmem>>, vector<1x36xf32>
    %94 = vector.broadcast %93 : vector<1x36xf32> to vector<2x36xf32>
    %95 = arith.addf %92, %94 : vector<2x36xf32>
    %96 = vector.extract_strided_slice %95 {offsets = [0, 0], sizes = [2, 2], strides = [1, 1]} : vector<2x36xf32> to vector<2x2xf32>
    %97 = vector.extract_strided_slice %95 {offsets = [0, 2], sizes = [2, 2], strides = [1, 1]} : vector<2x36xf32> to vector<2x2xf32>
    %98 = arith.negf %97 : vector<2x2xf32>
    %99 = math.exp %98 : vector<2x2xf32>
    %cst_49 = arith.constant 1.000000e+00 : f32
    %100 = vector.broadcast %cst_49 : f32 to vector<2x2xf32>
    %101 = arith.addf %100, %99 : vector<2x2xf32>
    %102 = arith.divf %100, %101 : vector<2x2xf32>
    %cst_50 = arith.constant 1.000000e-03 : f32
    %103 = vector.broadcast %cst_50 : f32 to vector<2x2xf32>
    %104 = arith.addf %102, %103 : vector<2x2xf32>
    %105 = vector.extract_strided_slice %1 {offsets = [0, 2], sizes = [2, 2], strides = [1, 1]} : vector<2x6xf32> to vector<2x2xf32>
    %106 = arith.mulf %104, %105 : vector<2x2xf32>
    %107 = arith.addf %96, %106 : vector<2x2xf32>
    %108 = vector.extract_strided_slice %95 {offsets = [0, 4], sizes = [2, 32], strides = [1, 1]} : vector<2x36xf32> to vector<2x32xf32>
    %109 = arith.truncf %108 : vector<2x32xf32> to vector<2x32xbf16>
    %c0_51 = arith.constant 0 : index
    %c0_52 = arith.constant 0 : index
    %c0_53 = arith.constant 0 : index
    %110 = vector.load %arg16[%c0_51, %c0_52, %c0_53] : memref<2x32x32xbf16, #tpu.memory_space<vmem>>, vector<1x32x32xbf16>
    %111 = vector.shape_cast %110 : vector<1x32x32xbf16> to vector<32x32xbf16>
    %cst_54 = arith.constant dense<0.000000e+00> : vector<2x32xf32>
    %112 = tpu.matmul %109, %111, %cst_54 {dimension_numbers = #tpu.dot_dimension_numbers<[1], [0], [0], [1], [0, 0, 1, 1], [], []>} : vector<2x32xbf16>, vector<32x32xbf16>, vector<2x32xf32> -> vector<2x32xf32>
    %c0_55 = arith.constant 0 : index
    %c0_56 = arith.constant 0 : index
    %c0_57 = arith.constant 0 : index
    %113 = vector.load %arg17[%c0_55, %c0_56, %c0_57] : memref<2x1x32xf32, #tpu.memory_space<vmem>>, vector<1x1x32xf32>
    %114 = vector.shape_cast %113 : vector<1x1x32xf32> to vector<1x32xf32>
    %115 = vector.broadcast %114 : vector<1x32xf32> to vector<2x32xf32>
    %116 = arith.addf %112, %115 : vector<2x32xf32>
    %c0_58 = arith.constant 0 : index
    %c0_59 = arith.constant 0 : index
    %c0_60 = arith.constant 0 : index
    %117 = vector.load %arg18[%c0_58, %c0_59, %c0_60] : memref<2x1x32xf32, #tpu.memory_space<vmem>>, vector<1x1x32xf32>
    %118 = vector.shape_cast %117 : vector<1x1x32xf32> to vector<1x32xf32>
    %c0_61 = arith.constant 0 : index
    %c0_62 = arith.constant 0 : index
    %c0_63 = arith.constant 0 : index
    %119 = vector.load %arg19[%c0_61, %c0_62, %c0_63] : memref<2x1x32xf32, #tpu.memory_space<vmem>>, vector<1x1x32xf32>
    %120 = vector.shape_cast %119 : vector<1x1x32xf32> to vector<1x32xf32>
    %cst_64 = arith.constant dense<0.000000e+00> : vector<32xf32>
    %121 = vector.multi_reduction <add>, %116, %cst_64 [0] : vector<2x32xf32> to vector<32xf32>
    %122 = vector.shape_cast %121 : vector<32xf32> to vector<1x32xf32>
    %cst_65 = arith.constant 2.000000e+00 : f32
    %123 = vector.broadcast %cst_65 : f32 to vector<1x32xf32>
    %124 = arith.divf %122, %123 : vector<1x32xf32>
    %125 = vector.broadcast %124 : vector<1x32xf32> to vector<2x32xf32>
    %126 = arith.subf %116, %125 : vector<2x32xf32>
    %127 = arith.mulf %126, %126 : vector<2x32xf32>
    %cst_66 = arith.constant dense<0.000000e+00> : vector<32xf32>
    %128 = vector.multi_reduction <add>, %127, %cst_66 [0] : vector<2x32xf32> to vector<32xf32>
    %129 = vector.shape_cast %128 : vector<32xf32> to vector<1x32xf32>
    %cst_67 = arith.constant 2.000000e+00 : f32
    %130 = vector.broadcast %cst_67 : f32 to vector<1x32xf32>
    %131 = arith.divf %129, %130 : vector<1x32xf32>
    %132 = vector.broadcast %124 : vector<1x32xf32> to vector<2x32xf32>
    %133 = arith.subf %116, %132 : vector<2x32xf32>
    %cst_68 = arith.constant 1.000000e-03 : f32
    %134 = vector.broadcast %cst_68 : f32 to vector<1x32xf32>
    %135 = arith.addf %131, %134 : vector<1x32xf32>
    %136 = math.rsqrt %135 : vector<1x32xf32>
    %137 = vector.broadcast %136 : vector<1x32xf32> to vector<2x32xf32>
    %138 = arith.mulf %133, %137 : vector<2x32xf32>
    %139 = vector.broadcast %118 : vector<1x32xf32> to vector<2x32xf32>
    %140 = arith.mulf %138, %139 : vector<2x32xf32>
    %141 = vector.broadcast %120 : vector<1x32xf32> to vector<2x32xf32>
    %142 = arith.addf %140, %141 : vector<2x32xf32>
    %cst_69 = arith.constant 0.000000e+00 : f32
    %143 = vector.broadcast %cst_69 : f32 to vector<2x32xf32>
    %144 = arith.maximumf %142, %143 : vector<2x32xf32>
    %145 = arith.truncf %144 : vector<2x32xf32> to vector<2x32xbf16>
    %c1 = arith.constant 1 : index
    %c0_70 = arith.constant 0 : index
    %c0_71 = arith.constant 0 : index
    %146 = vector.load %arg16[%c1, %c0_70, %c0_71] : memref<2x32x32xbf16, #tpu.memory_space<vmem>>, vector<1x32x32xbf16>
    %147 = vector.shape_cast %146 : vector<1x32x32xbf16> to vector<32x32xbf16>
    %cst_72 = arith.constant dense<0.000000e+00> : vector<2x32xf32>
    %148 = tpu.matmul %145, %147, %cst_72 {dimension_numbers = #tpu.dot_dimension_numbers<[1], [0], [0], [1], [0, 0, 1, 1], [], []>} : vector<2x32xbf16>, vector<32x32xbf16>, vector<2x32xf32> -> vector<2x32xf32>
    %c1_73 = arith.constant 1 : index
    %c0_74 = arith.constant 0 : index
    %c0_75 = arith.constant 0 : index
    %149 = vector.load %arg17[%c1_73, %c0_74, %c0_75] : memref<2x1x32xf32, #tpu.memory_space<vmem>>, vector<1x1x32xf32>
    %150 = vector.shape_cast %149 : vector<1x1x32xf32> to vector<1x32xf32>
    %151 = vector.broadcast %150 : vector<1x32xf32> to vector<2x32xf32>
    %152 = arith.addf %148, %151 : vector<2x32xf32>
    %c1_76 = arith.constant 1 : index
    %c0_77 = arith.constant 0 : index
    %c0_78 = arith.constant 0 : index
    %153 = vector.load %arg18[%c1_76, %c0_77, %c0_78] : memref<2x1x32xf32, #tpu.memory_space<vmem>>, vector<1x1x32xf32>
    %154 = vector.shape_cast %153 : vector<1x1x32xf32> to vector<1x32xf32>
    %c1_79 = arith.constant 1 : index
    %c0_80 = arith.constant 0 : index
    %c0_81 = arith.constant 0 : index
    %155 = vector.load %arg19[%c1_79, %c0_80, %c0_81] : memref<2x1x32xf32, #tpu.memory_space<vmem>>, vector<1x1x32xf32>
    %156 = vector.shape_cast %155 : vector<1x1x32xf32> to vector<1x32xf32>
    %cst_82 = arith.constant dense<0.000000e+00> : vector<32xf32>
    %157 = vector.multi_reduction <add>, %152, %cst_82 [0] : vector<2x32xf32> to vector<32xf32>
    %158 = vector.shape_cast %157 : vector<32xf32> to vector<1x32xf32>
    %cst_83 = arith.constant 2.000000e+00 : f32
    %159 = vector.broadcast %cst_83 : f32 to vector<1x32xf32>
    %160 = arith.divf %158, %159 : vector<1x32xf32>
    %161 = vector.broadcast %160 : vector<1x32xf32> to vector<2x32xf32>
    %162 = arith.subf %152, %161 : vector<2x32xf32>
    %163 = arith.mulf %162, %162 : vector<2x32xf32>
    %cst_84 = arith.constant dense<0.000000e+00> : vector<32xf32>
    %164 = vector.multi_reduction <add>, %163, %cst_84 [0] : vector<2x32xf32> to vector<32xf32>
    %165 = vector.shape_cast %164 : vector<32xf32> to vector<1x32xf32>
    %cst_85 = arith.constant 2.000000e+00 : f32
    %166 = vector.broadcast %cst_85 : f32 to vector<1x32xf32>
    %167 = arith.divf %165, %166 : vector<1x32xf32>
    %168 = vector.broadcast %160 : vector<1x32xf32> to vector<2x32xf32>
    %169 = arith.subf %152, %168 : vector<2x32xf32>
    %cst_86 = arith.constant 1.000000e-03 : f32
    %170 = vector.broadcast %cst_86 : f32 to vector<1x32xf32>
    %171 = arith.addf %167, %170 : vector<1x32xf32>
    %172 = math.rsqrt %171 : vector<1x32xf32>
    %173 = vector.broadcast %172 : vector<1x32xf32> to vector<2x32xf32>
    %174 = arith.mulf %169, %173 : vector<2x32xf32>
    %175 = vector.broadcast %154 : vector<1x32xf32> to vector<2x32xf32>
    %176 = arith.mulf %174, %175 : vector<2x32xf32>
    %177 = vector.broadcast %156 : vector<1x32xf32> to vector<2x32xf32>
    %178 = arith.addf %176, %177 : vector<2x32xf32>
    %cst_87 = arith.constant 0.000000e+00 : f32
    %179 = vector.broadcast %cst_87 : f32 to vector<2x32xf32>
    %180 = arith.maximumf %178, %179 : vector<2x32xf32>
    %181 = arith.truncf %180 : vector<2x32xf32> to vector<2x32xbf16>
    %c0_88 = arith.constant 0 : index
    %c0_89 = arith.constant 0 : index
    %182 = vector.load %arg20[%c0_88, %c0_89] : memref<32x4xbf16, #tpu.memory_space<vmem>>, vector<32x4xbf16>
    %cst_90 = arith.constant dense<0.000000e+00> : vector<2x4xf32>
    %183 = tpu.matmul %181, %182, %cst_90 {dimension_numbers = #tpu.dot_dimension_numbers<[1], [0], [0], [1], [0, 0, 1, 1], [], []>} : vector<2x32xbf16>, vector<32x4xbf16>, vector<2x4xf32> -> vector<2x4xf32>
    %c0_91 = arith.constant 0 : index
    %c0_92 = arith.constant 0 : index
    %184 = vector.load %arg21[%c0_91, %c0_92] : memref<1x4xf32, #tpu.memory_space<vmem>>, vector<1x4xf32>
    %185 = vector.broadcast %184 : vector<1x4xf32> to vector<2x4xf32>
    %186 = arith.addf %183, %185 : vector<2x4xf32>
    %187 = vector.extract_strided_slice %186 {offsets = [0, 0], sizes = [2, 2], strides = [1, 1]} : vector<2x4xf32> to vector<2x2xf32>
    %188 = vector.extract_strided_slice %186 {offsets = [0, 2], sizes = [2, 2], strides = [1, 1]} : vector<2x4xf32> to vector<2x2xf32>
    %189 = arith.negf %188 : vector<2x2xf32>
    %190 = math.exp %189 : vector<2x2xf32>
    %cst_93 = arith.constant 1.000000e+00 : f32
    %191 = vector.broadcast %cst_93 : f32 to vector<2x2xf32>
    %192 = arith.addf %191, %190 : vector<2x2xf32>
    %193 = arith.divf %191, %192 : vector<2x2xf32>
    %cst_94 = arith.constant 1.000000e-03 : f32
    %194 = vector.broadcast %cst_94 : f32 to vector<2x2xf32>
    %195 = arith.addf %193, %194 : vector<2x2xf32>
    %196 = vector.extract_strided_slice %1 {offsets = [0, 4], sizes = [2, 2], strides = [1, 1]} : vector<2x6xf32> to vector<2x2xf32>
    %197 = arith.mulf %195, %196 : vector<2x2xf32>
    %198 = arith.addf %187, %197 : vector<2x2xf32>
    %199 = tpu.concatenate %8, %16, %19, %96, %104, %107, %187, %195, %198 in 1 : vector<2x2xf32>, vector<2x2xf32>, vector<2x2xf32>, vector<2x2xf32>, vector<2x2xf32>, vector<2x2xf32>, vector<2x2xf32>, vector<2x2xf32>, vector<2x2xf32> -> vector<2x18xf32>
    %c0_95 = arith.constant 0 : index
    %c0_96 = arith.constant 0 : index
    %200 = vector.load %arg22[%c0_95, %c0_96] : memref<2x18xf32, #tpu.memory_space<vmem>>, vector<2x18xf32>
    tpu.vector_store %arg22[%c0_95, %c0_96], %199 {strides = array<i32>} : memref<2x18xf32, #tpu.memory_space<vmem>>, vector<2x18xf32>,
    return
  }
}

</mosaic_0001>

<bundles_post_ra>
// kernel: encoder_forward.3
= control target key start
LH: loop header
LB: loop body
LE: loop exit
PB: predicated region body
PF: predicated region fallthrough
CT: control target
= control target key end

     0   :  { %v2850_v22 = vmov 1966171168   ;;  %v215_v24 = vlaneseq  ;;  %vm2852_vm0 = vmmov 0   ;;  %vm1590_vm1 = vcmask 261120   ;;  %s2856_s24 = smov 4   ;;  %s3569_s2 = inlined_call_operand.vmem [shape: bf16[1024,4], index: 2, kind: input, shape index: {}]   ;;  %s3570_s0 = inlined_call_operand.vmem [shape: bf16[2,2048], index: 0, kind: input, shape index: {}]   ;;  %s3571_s4 = inlined_call_operand.vmem [shape: bf16[1024,32], index: 4, kind: input, shape index: {}]   ;;  %s3572_s6 = inlined_call_operand.vmem [shape: bf16[32,64], index: 6, kind: input, shape index: {}]   ;;  %s3573_s3 = inlined_call_operand.vmem [shape: f32[1,4], index: 3, kind: input, shape index: {}]   ;;  %s3574_s5 = inlined_call_operand.vmem [shape: f32[1,32], index: 5, kind: input, shape index: {}]   ;;  %s3575_s10 = inlined_call_operand.vmem [shape: bf16[64,64], index: 10, kind: input, shape index: {}]   ;;  %s3576_s7 = inlined_call_operand.vmem [shape: f32[1,64], index: 7, kind: input, shape index: {}]   ;;  %s3577_s8 = inlined_call_operand.vmem [shape: f32[1,64], index: 8, kind: input, shape index: {}]   ;;  %s3578_s9 = inlined_call_operand.vmem [shape: f32[1,64], index: 9, kind: input, shape index: {}]   ;;  %s3579_s14 = inlined_call_operand.vmem [shape: bf16[64,36], index: 14, kind: input, shape index: {}]   ;;  %s3580_s11 = inlined_call_operand.vmem [shape: f32[1,64], index: 11, kind: input, shape index: {}]   ;;  %s3581_s12 = inlined_call_operand.vmem [shape: f32[1,64], index: 12, kind: input, shape index: {}]   ;;  %s3582_s13 = inlined_call_operand.vmem [shape: f32[1,64], index: 13, kind: input, shape index: {}]   ;;  %s3583_s1 = inlined_call_operand.vmem [shape: f32[2,6], index: 1, kind: input, shape index: {}]   ;;  %s3584_s16 = inlined_call_operand.vmem [shape: bf16[2,32,32], index: 16, kind: input, shape index: {}]   ;;  %s3585_s15 = inlined_call_operand.vmem [shape: f32[1,36], index: 15, kind: input, shape index: {}]   ;;  %s3586_s17 = inlined_call_operand.vmem [shape: f32[2,1,32], index: 17, kind: input, shape index: {}]   ;;  %s3587_s18 = inlined_call_operand.vmem [shape: f32[2,1,32], index: 18, kind: input, shape index: {}]   ;;  %s3588_s19 = inlined_call_operand.vmem [shape: f32[2,1,32], index: 19, kind: input, shape index: {}]   ;;  %s3589_s20 = inlined_call_operand.vmem [shape: bf16[32,4], index: 20, kind: input, shape index: {}]   ;;  %s3590_s21 = inlined_call_operand.vmem [shape: f32[1,4], index: 21, kind: input, shape index: {}]   ;;  %s3591_s22 = inlined_call_operand.vmem [shape: f32[2,18], index: 22, kind: output, shape index: {}]  }
   0x1   :  { %3597 = sst [smem:[#allocation2_spill]] %s3569_s2  ;;  %v213_v23 = vunpack.c.l.s4 %v2850_v22  ;;  %vm1636_vm2 = vcmask 517120   ;;  %vm1714_vm3 = vcmask 523264   ;;  %vm1964_vm4 = vcmask 254976  }
   0x2   :  { %3598 = sst [smem:[#allocation3_spill]] %s3570_s0  ;;  %v216_v30 = vshrl.u32 %v215_v24, 7  ;;  %vm2221_vm5 = vcmask 15360   ;;  %vm2223_vm6 = vcmask 31744   ;;  %vm2225_vm7 = vcmask 48128  }
   0x3   :  { %3599 = sst [smem:[#allocation4_spill]] %s3571_s4  ;;  %v214_v29 = vunpack.c.0.s8 %v213_v23  ;;  %s2857_s4 = smov 6   ;;  %vm2227_vm8 = vcmask 64512   ;;  %vm2229_vm9 = vcmask 80896   ;;  %vm2231_vm10 = vcmask 97280  }
   0x4   :  { %3600 = sst [smem:[#allocation5_spill]] %s3572_s6  ;;  %vm2233_vm11 = vcmask 113664   ;;  %vm2235_vm12 = vcmask 130048   ;;  %vm2237_vm13 = vcmask 140288  }
   0x5   :  { %3601 = sst [smem:[#allocation6_spill]] %s3573_s3  ;;  %v3066_v35 = vsub.s32 %v214_v29, %v216_v30 }
   0x6   :  { %3602 = sst [smem:[#allocation7_spill]] %s3574_s5  ;;  %s2855_s5 = smov 2  }
   0x7   :  { %3603 = sst [smem:[#allocation8_spill]] %s3575_s10 }
   0x8   :  { %s3604_s29 = sld [smem:[#allocation2_spill]] }
   0x9   :  { %s3605_s25 = sld [smem:[#allocation3_spill]] }
   0xa   :  { %s3606_s10 = sld [smem:[#allocation4_spill]] }
   0xb   :  { %s3607_s28 = sld [smem:[#allocation5_spill]] }
   0xc   :  { %s3609_s0 = sld [smem:[#allocation7_spill]] }
   0xd   :  { %s3610_s26 = sld [smem:[#allocation8_spill]] }
   0xe   :  { %v2684_v0 = vld [vmem:[%s3604_s29 + $0x78] sm:$0xff]   ;;  %v2688_v4 = vld [vmem:[%s3604_s29 + $0x70] sm:$0xff]   ;;  %v2692_v8 = vld [vmem:[%s3604_s29 + $0x68] sm:$0xff]  }
   0xf   :  { %v2685_v1 = vld [vmem:[%s3604_s29 + $0xf8] sm:$0xff]   ;;  %2419 = vmatprep.subr.bf16.mxu0 %v2684_v0  ;;  %v2689_v5 = vld [vmem:[%s3604_s29 + $0xf0] sm:$0xff]   ;;  %v2693_v9 = vld [vmem:[%s3604_s29 + $0xe8] sm:$0xff]  }
  0x10   :  { %v2686_v2 = vld [vmem:[%s3604_s29 + $0x38] sm:$0xff]   ;;  %2441 = vmatprep.subr.bf16.mxu1 %v2685_v1  ;;  %v2690_v6 = vld [vmem:[%s3604_s29 + $0x30] sm:$0xff]   ;;  %v2694_v10 = vld [vmem:[%s3604_s29 + $0x28] sm:$0xff]  }
  0x11   :  { %v2687_v3 = vld [vmem:[%s3604_s29 + $0xb8] sm:$0xff]   ;;  %2420 = vmatpush3.bf16.msra.mxu0 %v2686_v2  ;;  %v2691_v7 = vld [vmem:[%s3604_s29 + $0xb0] sm:$0xff]   ;;  %v2695_v11 = vld [vmem:[%s3604_s29 + $0xa8] sm:$0xff]  }
  0x12   :  { %2442 = vmatpush3.bf16.msra.mxu1 %v2687_v3  ;;  %2421 = vmatprep.subr.bf16.mxu0 %v2688_v4  ;;  %v2696_v12 = vld [vmem:[%s3604_s29 + $0x60] sm:$0xff]   ;;  %v2700_v16 = vld [vmem:[%s3604_s29 + $0x58] sm:$0xff]   ;;  %v2704_v20 = vld [vmem:[%s3604_s29 + $0x50] sm:$0xff]  }
  0x13   :  { %2443 = vmatprep.subr.bf16.mxu1 %v2689_v5  ;;  %v2697_v13 = vld [vmem:[%s3604_s29 + $0xe0] sm:$0xff]   ;;  %v2701_v17 = vld [vmem:[%s3604_s29 + $0xd8] sm:$0xff]   ;;  %v2705_v21 = vld [vmem:[%s3604_s29 + $0xd0] sm:$0xff]  }
  0x14   :  { %v2698_v14 = vld [vmem:[%s3604_s29 + $0x20] sm:$0xff]   ;;  %v2702_v18 = vld [vmem:[%s3604_s29 + $0x18] sm:$0xff]   ;;  %v2706_v25 = vld [vmem:[%s3604_s29 + $0x10] sm:$0xff]  }
  0x15   :  { %2422 = vmatpush3.bf16.msra.mxu0 %v2690_v6  ;;  %v2699_v15 = vld [vmem:[%s3604_s29 + $0xa0] sm:$0xff]   ;;  %v2703_v19 = vld [vmem:[%s3604_s29 + $0x98] sm:$0xff]   ;;  %v2707_v26 = vld [vmem:[%s3604_s29 + $0x90] sm:$0xff]  }
  0x16   :  { %2444 = vmatpush3.bf16.msra.mxu1 %v2691_v7  ;;  %2423 = vmatprep.subr.bf16.mxu0 %v2692_v8  ;;  %v2708_v27 = vld [vmem:[%s3604_s29 + $0x48] sm:$0xff]   ;;  %v2712_v33 = vld [vmem:[%s3604_s29 + $0x40] sm:$0xff]   ;;  %v2718_v41 = vld [vmem:[%s3604_s29 + $0x178] sm:$0xff]  }
  0x17   :  { %2445 = vmatprep.subr.bf16.mxu1 %v2693_v9  ;;  %v2709_v28 = vld [vmem:[%s3604_s29 + $0xc8] sm:$0xff]   ;;  %v2713_v34 = vld [vmem:[%s3604_s29 + $0xc0] sm:$0xff]   ;;  %v2719_v42 = vld [vmem:[%s3604_s29 + $0x1f8] sm:$0xff]  }
  0x18   :  { %v2710_v31 = vld [vmem:[%s3604_s29 + $0x8] sm:$0xff]   ;;  %v2714_v36 = vld [vmem:[%s3604_s29] sm:$0xff]   ;;  %v2720_v47 = vld [vmem:[%s3604_s29 + $0x138] sm:$0xff]  }
  0x19   :  { %2424 = vmatpush3.bf16.msra.mxu0 %v2694_v10  ;;  %v2711_v32 = vld [vmem:[%s3604_s29 + $0x88] sm:$0xff]   ;;  %v2715_v37 = vld [vmem:[%s3604_s29 + $0x80] sm:$0xff]   ;;  %v2722_v50 = vld [vmem:[%s3604_s29 + $0x170] sm:$0xff]  }
  0x1a   :  { %2446 = vmatpush3.bf16.msra.mxu1 %v2695_v11  ;;  %2425 = vmatprep.subr.bf16.mxu0 %v2696_v12  ;;  %v72_v38 = vld [vmem:[%s3605_s25] sm:$0xff]  ;;  %v2721_v52 = vld [vmem:[%s3604_s29 + $0x1b8] sm:$0xff]   ;;  %v2723_v54 = vld [vmem:[%s3604_s29 + $0x1f0] sm:$0xff]  }
  0x1b   :  { %2447 = vmatprep.subr.bf16.mxu1 %v2697_v13  ;;  %v211_v39 = vcombine.high %v72_v38, %v72_v38  ;;  %v218_v40 = vrot.slane %v72_v38, %v3066_v35  ;;  %v2724_v55 = vld [vmem:[%s3604_s29 + $0x130] sm:$0xff]   ;;  %v2726_v57 = vld [vmem:[%s3604_s29 + $0x168] sm:$0xff]   ;;  %v2730_v61 = vld [vmem:[%s3604_s29 + $0x160] sm:$0xff]  }
  0x1c   :  { %v2725_v58 = vld [vmem:[%s3604_s29 + $0x1b0] sm:$0xff]   ;;  %v2727_v59 = vld [vmem:[%s3604_s29 + $0x1e8] sm:$0xff]   ;;  %v2731_v63 = vld [vmem:[%s3604_s29 + $0x1e0] sm:$0xff]  }
  0x1d   :  { %2426 = vmatpush3.bf16.msra.mxu0 %v2698_v14  ;;  %v226_v43 = vcombine.high %v218_v40, %v218_v40  ;;  %v234_v44 = vrot.slane %v218_v40, %v3066_v35  ;;  %v3086_v45 = vrot.slane %v211_v39, %v3066_v35  ;;  %v2728_v60 = vld [vmem:[%s3604_s29 + $0x128] sm:$0xff]   ;;  %v2732_v0 = vld [vmem:[%s3604_s29 + $0x120] sm:$0xff]   ;;  %v2734_v1 = vld [vmem:[%s3604_s29 + $0x158] sm:$0xff]  }
  0x1e   :  { %2448 = vmatpush3.bf16.msra.mxu1 %v2699_v15  ;;  %2427 = vmatprep.subr.bf16.mxu0 %v2700_v16  ;;  %v2729_v62 = vld [vmem:[%s3604_s29 + $0x1a8] sm:$0xff]   ;;  %v2733_v2 = vld [vmem:[%s3604_s29 + $0x1a0] sm:$0xff]   ;;  %v2735_v3 = vld [vmem:[%s3604_s29 + $0x1d8] sm:$0xff]  }
  0x1f   :  { %2449 = vmatprep.subr.bf16.mxu1 %v2701_v17  ;;  %v248_v46 = vrot.slane %v226_v43, %v3066_v35  ;;  %v227_v48 = vcombine.high %v3086_v45, %v3086_v45  ;;  %v256_v49 = vcombine.high %v234_v44, %v234_v44  ;;  %v2736_v4 = vld [vmem:[%s3604_s29 + $0x118] sm:$0xff]   ;;  %v3146_v5 = vld [vmem:[%s3605_s25 + $0x8] sm:$0xff]  ;;  %v2738_v6 = vld [vmem:[%s3604_s29 + $0x150] sm:$0xff]  }
  0x20   :  { %v2737_v7 = vld [vmem:[%s3604_s29 + $0x198] sm:$0xff]   ;;  %v2739_v8 = vld [vmem:[%s3604_s29 + $0x1d0] sm:$0xff]   ;;  %v2742_v10 = vld [vmem:[%s3604_s29 + $0x148] sm:$0xff]   ;;  %v3168_v12 = vrot.slane %v3146_v5, %v3066_v35 }
  0x21   :  { %2428 = vmatpush3.bf16.msra.mxu0 %v2702_v18  ;;  %684 = vmatprep.mubr.bf16.mxu0 %v248_v46  ;;  %v258_v51 = vcombine.high %v248_v46, %v248_v46  ;;  %v255_v53 = vrot.slane %v227_v48, %v3066_v35  ;;  %v2740_v9 = vld [vmem:[%s3604_s29 + $0x110] sm:$0xff]   ;;  %v2743_v13 = vld [vmem:[%s3604_s29 + $0x1c8] sm:$0xff]   ;;  %v2746_v15 = vld [vmem:[%s3604_s29 + $0x140] sm:$0xff]   ;;  %v965_v46 = vcombine.high %v3146_v5, %v3146_v5 }
  0x22   :  { %2450 = vmatpush3.bf16.msra.mxu1 %v2703_v19  ;;  %2429 = vmatprep.subr.bf16.mxu0 %v2704_v20  ;;  %v2741_v11 = vld [vmem:[%s3604_s29 + $0x190] sm:$0xff]   ;;  %v2744_v14 = vld [vmem:[%s3604_s29 + $0x108] sm:$0xff]   ;;  %v980_v17 = vcombine.high %v3168_v12, %v3168_v12  ;;  %v2747_v18 = vld [vmem:[%s3604_s29 + $0x1c0] sm:$0xff]   ;;  %v241_v20 = vrot.slane %v3086_v45, %v3066_v35 }
  0x23   :  { %2451 = vmatprep.subr.bf16.mxu1 %v2705_v21  ;;  %724 = vmatprep.mubr.bf16.mxu1 %v258_v51  ;;  %v259_v56 = vcombine.high %v255_v53, %v255_v53  ;;  %v2745_v16 = vld [vmem:[%s3604_s29 + $0x188] sm:$0xff]   ;;  %v2748_v19 = vld [vmem:[%s3604_s29 + $0x100] sm:$0xff]   ;;  %v2750_v21 = vld [vmem:[%s3606_s10 + $0x78] sm:$0xff]  }
  0x24   :  { %v2749_v22 = vld [vmem:[%s3604_s29 + $0x180] sm:$0xff]   ;;  %v1002_v23 = vrot.slane %v980_v17, %v3066_v35  ;;  %v2751_v24 = vld [vmem:[%s3606_s10 + $0xf8] sm:$0xff]   ;;  %v2755_v30 = vld [vmem:[%s3606_s10 + $0xf0] sm:$0xff]   ;;  %s3608_s29 = sld [smem:[#allocation6_spill]] }
  0x25   :  { %2430 = vmatpush3.bf16.msra.mxu0 %v2706_v25  ;;  %v2752_v25 = vld [vmem:[%s3606_s10 + $0x38] sm:$0xff]   ;;  %v2761_v38 = vld [vmem:[%s3606_s10 + $0xa8] sm:$0xff]   ;;  %v2763_v39 = vld [vmem:[%s3606_s10 + $0xe0] sm:$0xff]  }
  0x26   :  { %2452 = vmatpush3.bf16.msra.mxu1 %v2707_v26  ;;  %2431 = vmatprep.subr.bf16.mxu0 %v2708_v27  ;;  %v257_v26 = vcombine.high %v241_v20, %v241_v20  ;;  %v2754_v27 = vld [vmem:[%s3606_s10 + $0x70] sm:$0xff]   ;;  %v1012_v29 = vcombine.high %v1002_v23, %v1002_v23  ;;  %v2764_v40 = vld [vmem:[%s3606_s10 + $0x20] sm:$0xff]   ;;  %v2767_v43 = vld [vmem:[%s3606_s10 + $0xd8] sm:$0xff]  }
  0x27   :  { %2453 = vmatprep.subr.bf16.mxu1 %v2709_v28  ;;  %v2753_v28 = vld [vmem:[%s3606_s10 + $0xb8] sm:$0xff]   ;;  %v2770_v45 = vld [vmem:[%s3606_s10 + $0x50] sm:$0xff]   ;;  %v2797_v17 = vld [vmem:[%s3606_s10 + $0x1a0] sm:$0xff]  }
  0x28   :  { %v2771_v48 = vld [vmem:[%s3606_s10 + $0xd0] sm:$0xff]  }
  0x29   :  { %2432 = vmatpush3.bf16.msra.mxu0 %v2710_v31  ;;  %v2756_v31 = vld [vmem:[%s3606_s10 + $0x30] sm:$0xff]  }
  0x2a   :  { %2454 = vmatpush3.bf16.msra.mxu1 %v2711_v32  ;;  %2433 = vmatprep.subr.bf16.mxu0 %v2712_v33  ;;  %v2758_v32 = vld [vmem:[%s3606_s10 + $0x68] sm:$0xff]   ;;  %v2757_v33 = vld [vmem:[%s3606_s10 + $0xb0] sm:$0xff]  }
  0x2b   :  { %2455 = vmatprep.subr.bf16.mxu1 %v2713_v34  ;;  %v2759_v34 = vld [vmem:[%s3606_s10 + $0xe8] sm:$0xff]   ;;  %v2773_v51 = vld [vmem:[%s3606_s10 + $0x90] sm:$0xff]  }
  0x2d   :  { %2434 = vmatpush3.bf16.msra.mxu0 %v2714_v36  ;;  %v2760_v36 = vld [vmem:[%s3606_s10 + $0x28] sm:$0xff]  }
  0x2e   :  { %2456 = vmatpush3.bf16.msra.mxu1 %v2715_v37  ;;  %2463 = vmatprep.subr.bf16.mxu0 %v2718_v41  ;;  %v2762_v37 = vld [vmem:[%s3606_s10 + $0x60] sm:$0xff]   ;;  %v2766_v41 = vld [vmem:[%s3606_s10 + $0x58] sm:$0xff]  }
  0x2f   :  { %2485 = vmatprep.subr.bf16.mxu1 %v2719_v42  ;;  %v2765_v42 = vld [vmem:[%s3606_s10 + $0xa0] sm:$0xff]  }
  0x30   :  { %685 = vmatmul.mubr.bf16.vlgmr.msra.gmra.mxu0 %v234_v44  ;;  %v2768_v44 = vld [vmem:[%s3606_s10 + $0x18] sm:$0xff]  }
  0x31   :  { %2464 = vmatpush3.bf16.msra.mxu0 %v2720_v47  ;;  %725 = vmatmul.mubr.bf16.vlgmr.msra.gmra.mxu1 %v256_v49  ;;  %v2769_v47 = vld [vmem:[%s3606_s10 + $0x98] sm:$0xff]   ;;  %v2772_v49 = vld [vmem:[%s3606_s10 + $0x10] sm:$0xff]  }
  0x32   :  { %2465 = vmatprep.subr.bf16.mxu0 %v2722_v50  ;;  %2486 = vmatpush3.bf16.msra.mxu1 %v2721_v52  ;;  %v2774_v50 = vld [vmem:[%s3606_s10 + $0x48] sm:$0xff]   ;;  %v3274_v52 = vrot.slane %v965_v46, %v3066_v35 }
  0x33   :  { %764 = vmatprep.mubr.bf16.mxu0 %v255_v53  ;;  %2487 = vmatprep.subr.bf16.mxu1 %v2723_v54  ;;  %v2775_v53 = vld [vmem:[%s3606_s10 + $0xc8] sm:$0xff]  }
  0x34   :  { %804 = vmatprep.mubr.bf16.mxu1 %v259_v56  ;;  %v2776_v54 = vld [vmem:[%s3606_s10 + $0x8] sm:$0xff]  }
  0x35   :  { %2466 = vmatpush3.bf16.msra.mxu0 %v2724_v55  ;;  %v2778_v55 = vld [vmem:[%s3606_s10 + $0x40] sm:$0xff]   ;;  %v2777_v56 = vld [vmem:[%s3606_s10 + $0x88] sm:$0xff]  }
  0x36   :  { %2467 = vmatprep.subr.bf16.mxu0 %v2726_v57  ;;  %2488 = vmatpush3.bf16.msra.mxu1 %v2725_v58  ;;  %v981_v57 = vcombine.high %v3274_v52, %v3274_v52  ;;  %v2779_v58 = vld [vmem:[%s3606_s10 + $0xc0] sm:$0xff]  }
  0x37   :  { %2489 = vmatprep.subr.bf16.mxu1 %v2727_v59  ;;  %v2780_v59 = vld [vmem:[%s3606_s10] sm:$0xff]  }
  0x39   :  { %2468 = vmatpush3.bf16.msra.mxu0 %v2728_v60  ;;  %v988_v60 = vrot.slane %v3168_v12, %v3066_v35  ;;  %v2794_v12 = vld [vmem:[%s3606_s10 + $0x160] sm:$0xff]  }
  0x3a   :  { %2469 = vmatprep.subr.bf16.mxu0 %v2730_v61  ;;  %2490 = vmatpush3.bf16.msra.mxu1 %v2729_v62  ;;  %v2782_v61 = vld [vmem:[%s3606_s10 + $0x178] sm:$0xff]   ;;  %v2781_v62 = vld [vmem:[%s3606_s10 + $0x80] sm:$0xff]  }
  0x3b   :  { %2491 = vmatprep.subr.bf16.mxu1 %v2731_v63  ;;  %v1009_v63 = vrot.slane %v981_v57, %v3066_v35 }
  0x3d   :  { %2470 = vmatpush3.bf16.msra.mxu0 %v2732_v0  ;;  %v2783_v0 = vld [vmem:[%s3606_s10 + $0x1f8] sm:$0xff]   ;;  %v1013_v5 = vcombine.high %v1009_v63, %v1009_v63 }
  0x3e   :  { %2471 = vmatprep.subr.bf16.mxu0 %v2734_v1  ;;  %2492 = vmatpush3.bf16.msra.mxu1 %v2733_v2  ;;  %v2784_v1 = vld [vmem:[%s3606_s10 + $0x138] sm:$0xff]   ;;  %v1010_v2 = vcombine.high %v988_v60, %v988_v60 }
  0x3f   :  { %2493 = vmatprep.subr.bf16.mxu1 %v2735_v3  ;;  %v2786_v3 = vld [vmem:[%s3606_s10 + $0x170] sm:$0xff]  }
  0x41   :  { %2472 = vmatpush3.bf16.msra.mxu0 %v2736_v4  ;;  %v2785_v4 = vld [vmem:[%s3606_s10 + $0x1b8] sm:$0xff]  }
  0x42   :  { %2473 = vmatprep.subr.bf16.mxu0 %v2738_v6  ;;  %2494 = vmatpush3.bf16.msra.mxu1 %v2737_v7  ;;  %v2787_v6 = vld [vmem:[%s3606_s10 + $0x1f0] sm:$0xff]  }
  0x43   :  { %2495 = vmatprep.subr.bf16.mxu1 %v2739_v8  ;;  %v2788_v7 = vld [vmem:[%s3606_s10 + $0x130] sm:$0xff]   ;;  %v2790_v8 = vld [vmem:[%s3606_s10 + $0x168] sm:$0xff]  }
  0x45   :  { %2474 = vmatpush3.bf16.msra.mxu0 %v2740_v9  ;;  %v2789_v9 = vld [vmem:[%s3606_s10 + $0x1b0] sm:$0xff]  }
  0x46   :  { %2475 = vmatprep.subr.bf16.mxu0 %v2742_v10  ;;  %2496 = vmatpush3.bf16.msra.mxu1 %v2741_v11  ;;  %v2791_v10 = vld [vmem:[%s3606_s10 + $0x1e8] sm:$0xff]  }
  0x47   :  { %2497 = vmatprep.subr.bf16.mxu1 %v2743_v13  ;;  %v2792_v11 = vld [vmem:[%s3606_s10 + $0x128] sm:$0xff]  }
  0x48   :  { %v2793_v13 = vld [vmem:[%s3606_s10 + $0x1a8] sm:$0xff]  }
  0x49   :  { %2476 = vmatpush3.bf16.msra.mxu0 %v2744_v14  ;;  %v2795_v14 = vld [vmem:[%s3606_s10 + $0x1e0] sm:$0xff]  }
  0x4a   :  { %2477 = vmatprep.subr.bf16.mxu0 %v2746_v15  ;;  %2498 = vmatpush3.bf16.msra.mxu1 %v2745_v16  ;;  %v2796_v15 = vld [vmem:[%s3606_s10 + $0x120] sm:$0xff]   ;;  %v2798_v16 = vld [vmem:[%s3606_s10 + $0x158] sm:$0xff]  }
  0x4b   :  { %2499 = vmatprep.subr.bf16.mxu1 %v2747_v18  ;;  %v2799_v18 = vld [vmem:[%s3606_s10 + $0x1d8] sm:$0xff]  }
  0x4d   :  { %2478 = vmatpush3.bf16.msra.mxu0 %v2748_v19  ;;  %v2800_v19 = vld [vmem:[%s3606_s10 + $0x118] sm:$0xff]  }
  0x4e   :  { %2507 = vmatprep.subr.bf16.mxu0 %v2750_v21  ;;  %2500 = vmatpush3.bf16.msra.mxu1 %v2749_v22  ;;  %v2801_v21 = vld [vmem:[%s3606_s10 + $0x198] sm:$0xff]   ;;  %v2803_v22 = vld [vmem:[%s3606_s10 + $0x1d0] sm:$0xff]  }
  0x4f   :  { %2529 = vmatprep.subr.bf16.mxu1 %v2751_v24  ;;  %v2806_v24 = vld [vmem:[%s3606_s10 + $0x148] sm:$0xff]  }
  0x50   :  { %765 = vmatmul.mubr.bf16.vlgmr.msra.gmra.mxu0 %v241_v20  ;;  %v2802_v20 = vld [vmem:[%s3606_s10 + $0x150] sm:$0xff]  }
  0x51   :  { %2508 = vmatpush3.bf16.msra.mxu0 %v2752_v25  ;;  %1438 = vmatprep.mubr.bf16.mxu0 %v1002_v23  ;;  %v2804_v23 = vld [vmem:[%s3606_s10 + $0x110] sm:$0xff]  }
  0x52   :  { %805 = vmatmul.mubr.bf16.vlgmr.msra.gmra.mxu1 %v257_v26  ;;  %2509 = vmatprep.subr.bf16.mxu0 %v2754_v27  ;;  %v2805_v25 = vld [vmem:[%s3606_s10 + $0x190] sm:$0xff]   ;;  %v2807_v26 = vld [vmem:[%s3606_s10 + $0x1c8] sm:$0xff]  }
  0x53   :  { %2530 = vmatpush3.bf16.msra.mxu1 %v2753_v28  ;;  %1478 = vmatprep.mubr.bf16.mxu1 %v1012_v29  ;;  %v2808_v27 = vld [vmem:[%s3606_s10 + $0x108] sm:$0xff]   ;;  %v2810_v28 = vld [vmem:[%s3606_s10 + $0x140] sm:$0xff]  }
  0x54   :  { %2531 = vmatprep.subr.bf16.mxu1 %v2755_v30  ;;  %v2809_v29 = vld [vmem:[%s3606_s10 + $0x188] sm:$0xff]   ;;  %v2811_v30 = vld [vmem:[%s3606_s10 + $0x1c0] sm:$0xff]  }
  0x55   :  { %2510 = vmatpush3.bf16.msra.mxu0 %v2756_v31  ;;  %v2812_v31 = vld [vmem:[%s3606_s10 + $0x100] sm:$0xff]  }
  0x56   :  { %2511 = vmatprep.subr.bf16.mxu0 %v2758_v32  ;;  %v995_v32 = vrot.slane %v3274_v52, %v3066_v35  ;;  %v2815_v35 = vld [vmem:[%s3607_s28] sm:$0xff]  }
  0x57   :  { %2532 = vmatpush3.bf16.msra.mxu1 %v2757_v33  ;;  %v2813_v33 = vld [vmem:[%s3606_s10 + $0x180] sm:$0xff]  }
  0x58   :  { %2533 = vmatprep.subr.bf16.mxu1 %v2759_v34  ;;  %v1011_v34 = vcombine.high %v995_v32, %v995_v32 }
  0x59   :  { %2512 = vmatpush3.bf16.msra.mxu0 %v2760_v36  ;;  %v2814_v36 = vld [vmem:[%s3607_s28 + $0x8] sm:$0xff]  }
  0x5a   :  { %2513 = vmatprep.subr.bf16.mxu0 %v2762_v37  ;;  %v2851_v37 = vmov 0.0  }
  0x5b   :  { %2534 = vmatpush3.bf16.msra.mxu1 %v2761_v38 }
  0x5c   :  { %2535 = vmatprep.subr.bf16.mxu1 %v2763_v39 }
  0x5d   :  { %2514 = vmatpush3.bf16.msra.mxu0 %v2764_v40  ;;  %v2243_v40 = vld [vmem:[%s3608_s29] ss:$0 sm:$0xff] }
  0x5e   :  { %2515 = vmatprep.subr.bf16.mxu0 %v2766_v41 }
  0x5f   :  { %2536 = vmatpush3.bf16.msra.mxu1 %v2765_v42 }
  0x60   :  { %2537 = vmatprep.subr.bf16.mxu1 %v2767_v43 }
  0x61   :  { %2516 = vmatpush3.bf16.msra.mxu0 %v2768_v44 }
  0x62   :  { %2517 = vmatprep.subr.bf16.mxu0 %v2770_v45 }
  0x63   :  { %2538 = vmatpush3.bf16.msra.mxu1 %v2769_v47 }
  0x64   :  { %2539 = vmatprep.subr.bf16.mxu1 %v2771_v48 }
  0x65   :  { %2518 = vmatpush3.bf16.msra.mxu0 %v2772_v49 }
  0x66   :  { %2519 = vmatprep.subr.bf16.mxu0 %v2774_v50 }
  0x67   :  { %2540 = vmatpush3.bf16.msra.mxu1 %v2773_v51 }
  0x68   :  { %2541 = vmatprep.subr.bf16.mxu1 %v2775_v53 }
  0x69   :  { %2520 = vmatpush3.bf16.msra.mxu0 %v2776_v54 }
  0x6a   :  { %2521 = vmatprep.subr.bf16.mxu0 %v2778_v55 }
  0x6b   :  { %2542 = vmatpush3.bf16.msra.mxu1 %v2777_v56 }
  0x6c   :  { %2543 = vmatprep.subr.bf16.mxu1 %v2779_v58 }
  0x6d   :  { %2522 = vmatpush3.bf16.msra.mxu0 %v2780_v59 }
  0x6e   :  { %2551 = vmatprep.subr.bf16.mxu0 %v2782_v61 }
  0x6f   :  { %2544 = vmatpush3.bf16.msra.mxu1 %v2781_v62 }
  0x70   :  { %1439 = vmatmul.mubr.bf16.vlgmr.msra.gmra.mxu0 %v988_v60  ;;  %2573 = vmatprep.subr.bf16.mxu1 %v2783_v0 }
  0x71   :  { %2552 = vmatpush3.bf16.msra.mxu0 %v2784_v1  ;;  %1518 = vmatprep.mubr.bf16.mxu0 %v1009_v63 }
  0x72   :  { %1479 = vmatmul.mubr.bf16.vlgmr.msra.gmra.mxu1 %v1010_v2  ;;  %2553 = vmatprep.subr.bf16.mxu0 %v2786_v3 }
  0x73   :  { %2574 = vmatpush3.bf16.msra.mxu1 %v2785_v4  ;;  %1558 = vmatprep.mubr.bf16.mxu1 %v1013_v5 }
  0x74   :  { %2575 = vmatprep.subr.bf16.mxu1 %v2787_v6 }
  0x75   :  { %2554 = vmatpush3.bf16.msra.mxu0 %v2788_v7 }
  0x76   :  { %2555 = vmatprep.subr.bf16.mxu0 %v2790_v8  ;;  %v2309_v8 = vld [vmem:[%s3609_s0] ss:$0 sm:$0xff] }
  0x77   :  { %2576 = vmatpush3.bf16.msra.mxu1 %v2789_v9 }
  0x78   :  { %2577 = vmatprep.subr.bf16.mxu1 %v2791_v10 }
  0x79   :  { %2556 = vmatpush3.bf16.msra.mxu0 %v2792_v11 }
  0x7a   :  { %2557 = vmatprep.subr.bf16.mxu0 %v2794_v12 }
  0x7b   :  { %2578 = vmatpush3.bf16.msra.mxu1 %v2793_v13 }
  0x7c   :  { %2579 = vmatprep.subr.bf16.mxu1 %v2795_v14 }
  0x7d   :  { %2558 = vmatpush3.bf16.msra.mxu0 %v2796_v15 }
  0x7e   :  { %2559 = vmatprep.subr.bf16.mxu0 %v2798_v16 }
  0x7f   :  { %2580 = vmatpush3.bf16.msra.mxu1 %v2797_v17 }
  0x80   :  { %2581 = vmatprep.subr.bf16.mxu1 %v2799_v18 }
  0x81   :  { %2560 = vmatpush3.bf16.msra.mxu0 %v2800_v19 }
  0x82   :  { %2561 = vmatprep.subr.bf16.mxu0 %v2802_v20 }
  0x83   :  { %2582 = vmatpush3.bf16.msra.mxu1 %v2801_v21 }
  0x84   :  { %2583 = vmatprep.subr.bf16.mxu1 %v2803_v22 }
  0x85   :  { %2562 = vmatpush3.bf16.msra.mxu0 %v2804_v23 }
  0x86   :  { %2563 = vmatprep.subr.bf16.mxu0 %v2806_v24 }
  0x87   :  { %2584 = vmatpush3.bf16.msra.mxu1 %v2805_v25  ;;  %v2816_v25 = vld [vmem:[%s3610_s26 + $0x18] sm:$0xff]  }
  0x88   :  { %2585 = vmatprep.subr.bf16.mxu1 %v2807_v26  ;;  %v2817_v26 = vld [vmem:[%s3610_s26 + $0x10] sm:$0xff]  }
  0x89   :  { %2564 = vmatpush3.bf16.msra.mxu0 %v2808_v27  ;;  %v2818_v27 = vld [vmem:[%s3610_s26 + $0x8] sm:$0xff]  }
  0x8a   :  { %2565 = vmatprep.subr.bf16.mxu0 %v2810_v28  ;;  %v2819_v28 = vld [vmem:[%s3610_s26] sm:$0xff]  }
  0x8b   :  { %2586 = vmatpush3.bf16.msra.mxu1 %v2809_v29  ;;  %v2374_v29 = vld [vmem:[%s3576_s7] ss:$0 sm:$0xff]  ;;  %s2853_s7 = smov 126  }
  0x8c   :  { %2587 = vmatprep.subr.bf16.mxu1 %v2811_v30 }
  0x8d   :  { %2566 = vmatpush3.bf16.msra.mxu0 %v2812_v31 }
  0x8e   :  { %2617 = vmatprep.subr.bf16.mxu0 %v2851_v37 }
  0x8f   :  { %2588 = vmatpush3.bf16.msra.mxu1 %v2813_v33 }
  0x90   :  { %1519 = vmatmul.mubr.bf16.vlgmr.msra.gmra.mxu0 %v995_v32  ;;  %2625 = vmatprep.subr.bf16.mxu1 %v2851_v37 }
  0x91   :  { %2618 = vmatpush3.bf16.msra.mxu0 %v2814_v36  ;;  %2621 = vmatprep.mubr.msk.bf16.mxu0 %vm2852_vm0, %v2851_v37 }
  0x92   :  { %1559 = vmatmul.mubr.bf16.vlgmr.msra.gmra.mxu1 %v1011_v34  ;;  %2619 = vmatprep.subr.bf16.mxu0 %v2851_v37 }
  0x93   :  { %2633 = vmatprep.mubr.msk.bf16.mxu1 %vm2852_vm0, %v2851_v37  ;;  %2626 = vmatpush3.bf16.msra.mxu1 %v2816_v25 }
  0x94   :  { %2627 = vmatprep.subr.bf16.mxu1 %v2851_v37 }
  0x95   :  { %2620 = vmatpush3.bf16.msra.mxu0 %v2815_v35 }
  0x96   :  { %2637 = vmatprep.subr.bf16.mxu0 %v2851_v37 }
  0x97   :  { %2628 = vmatpush3.bf16.msra.mxu1 %v2817_v26 }
  0x98   :  { %2629 = vmatprep.subr.bf16.mxu1 %v2851_v37 }
  0x9b   :  { %2630 = vmatpush3.bf16.msra.mxu1 %v2818_v27 }
  0x9c   :  { %2631 = vmatprep.subr.bf16.mxu1 %v2851_v37 }
  0x9f   :  { %2632 = vmatpush3.bf16.msra.mxu1 %v2819_v28 }
  0xa0   :  { %2649 = vmatprep.subr.bf16.mxu1 %v2851_v37 }
  0xf0   :  { %v2435_v38 = vpop.f32.mrf.mxu0 }
  0xf1   :  { %v2457_v39 = vpop.f32.mrf.mxu1 }
  0xf2   :  { %v2436_v41 = vpop.f32.mrf.mxu0 }
  0xf3   :  { %v2437_v42 = vadd.f32 %v2436_v41, %v2435_v38  ;;  %v2458_v43 = vpop.f32.mrf.mxu1 }
  0xf4   :  { %v2438_v44 = vpop.f32.mrf.mxu0  ;;  %v2459_v46 = vadd.f32 %v2458_v43, %v2457_v39 }
  0xf5   :  { %v687_v45 = vadd.f32 %v2437_v42, %v2243_v40  ;;  %v2460_v47 = vpop.f32.mrf.mxu1 }
  0xf6   :  { %v2439_v48 = vpop.f32.mrf.mxu0 }
  0xf7   :  { %v727_v49 = vadd.f32 %v2459_v46, %v687_v45  ;;  %v2461_v50 = vpop.f32.mrf.mxu1 }
 0x110   :  { %v2479_v51 = vpop.f32.mrf.mxu0 }
 0x112   :  { %v2501_v52 = vpop.f32.mrf.mxu1  ;;  %v2480_v53 = vpop.f32.mrf.mxu0 }
 0x113   :  { %v2481_v54 = vadd.f32 %v2480_v53, %v2479_v51 }
 0x114   :  { %v2502_v55 = vpop.f32.mrf.mxu1  ;;  %v2482_v56 = vpop.f32.mrf.mxu0 }
 0x115   :  { %v767_v57 = vadd.f32 %v2481_v54, %v727_v49  ;;  %v2503_v58 = vadd.f32 %v2502_v55, %v2501_v52  ;;  %v2378_v56 = vld [vmem:[%s3577_s8] ss:$0 sm:$0xff] }
 0x116   :  { %v2504_v59 = vpop.f32.mrf.mxu1  ;;  %v2483_v60 = vpop.f32.mrf.mxu0 }
 0x117   :  { %v3417_v61 = vadd.f32 %v2503_v58, %v767_v57  ;;  %v2379_v58 = vld [vmem:[%s3578_s9] ss:$0 sm:$0xff] }
 0x118   :  { %v2505_v62 = vpop.f32.mrf.mxu1 }
 0x130   :  { %v2523_v63 = vpop.f32.mrf.mxu0 }
 0x132   :  { %v2545_v0 = vpop.f32.mrf.mxu1  ;;  %v2524_v1 = vpop.f32.mrf.mxu0 }
 0x133   :  { %v2525_v7 = vadd.f32 %v2524_v1, %v2523_v63  ;;  %v2821_v1 = vld [vmem:[%s3579_s14 + $0x10] sm:$0xff]  }
 0x134   :  { %v2546_v2 = vpop.f32.mrf.mxu1  ;;  %v2526_v3 = vpop.f32.mrf.mxu0 }
 0x135   :  { %v1441_v9 = vadd.f32 %v2525_v7, %v2309_v8  ;;  %v2547_v10 = vadd.f32 %v2546_v2, %v2545_v0  ;;  %v2820_v0 = vld [vmem:[%s3579_s14 + $0x18] sm:$0xff]   ;;  %v2822_v2 = vld [vmem:[%s3579_s14 + $0x8] sm:$0xff]   ;;  %v2823_v3 = vld [vmem:[%s3579_s14] sm:$0xff]  }
 0x136   :  { %v2548_v4 = vpop.f32.mrf.mxu1  ;;  %v2527_v5 = vpop.f32.mrf.mxu0 }
 0x137   :  { %v1481_v14 = vadd.f32 %v2547_v10, %v1441_v9  ;;  %v2380_v4 = vld [vmem:[%s3580_s11] ss:$0 sm:$0xff] }
 0x138   :  { %v2549_v6 = vpop.f32.mrf.mxu1 }
 0x150   :  { %v2567_v11 = vpop.f32.mrf.mxu0 }
 0x152   :  { %v2589_v12 = vpop.f32.mrf.mxu1  ;;  %v2568_v13 = vpop.f32.mrf.mxu0 }
 0x153   :  { %v2569_v15 = vadd.f32 %v2568_v13, %v2567_v11 }
 0x154   :  { %v2590_v16 = vpop.f32.mrf.mxu1  ;;  %v2570_v17 = vpop.f32.mrf.mxu0 }
 0x155   :  { %v1521_v18 = vadd.f32 %v2569_v15, %v1481_v14  ;;  %v2591_v19 = vadd.f32 %v2590_v16, %v2589_v12 }
 0x156   :  { %v2592_v20 = vpop.f32.mrf.mxu1  ;;  %v2571_v21 = vpop.f32.mrf.mxu0 }
 0x157   :  { %v1561_v22 = vadd.f32 %v2591_v19, %v1521_v18 }
 0x158   :  { %v2593_v23 = vpop.f32.mrf.mxu1 }
 0x159   :  { %v1566_v24 = vpack.c.bf16 %v1561_v22, %v1561_v22 }
 0x15b   :  { %2622 = vmatmul.mubr.msk.bf16.vlgmr.msra.gmra.mxu0 %vm1590_vm1, %v1566_v24 }
 0x15c   :  { %2645 = vmatprep.mubr.msk.bf16.mxu0 %vm2852_vm0, %v2851_v37  ;;  %2638 = vmatpush3.bf16.msra.mxu0 %v2820_v0 }
 0x15d   :  { %2639 = vmatprep.subr.bf16.mxu0 %v2851_v37 }
 0x160   :  { %2640 = vmatpush3.bf16.msra.mxu0 %v2821_v1  ;;  %v2826_v1 = vld [vmem:[%s3584_s16 + $0x18] sm:$0xff]  }
 0x161   :  { %2641 = vmatprep.subr.bf16.mxu0 %v2851_v37 }
 0x164   :  { %2642 = vmatpush3.bf16.msra.mxu0 %v2822_v2 }
 0x165   :  { %2643 = vmatprep.subr.bf16.mxu0 %v2851_v37 }
 0x168   :  { %2644 = vmatpush3.bf16.msra.mxu0 %v2823_v3  ;;  %v2827_v3 = vld [vmem:[%s3584_s16 + $0x10] sm:$0xff]  }
 0x169   :  { %2657 = vmatprep.subr.bf16.mxu0 %v2851_v37 }
 0x21b   :  { %v1628_v30 = vpop.f32.mrf.mxu0 }
 0x21c   :  { %v1629_v31 = vadd.f32 %v2374_v29, %v1628_v30  ;;  %v2386_v30 = vld [vmem:[%s3581_s12] ss:$0 sm:$0xff] }
 0x21d   :  { %v2623_v32 = vpop.f32.mrf.mxu0 }
 0x21e   :  { %v1637_v33 = vsel %vm1636_vm2, %v1629_v31, 0.0  ;;  %v2387_v32 = vld [vmem:[%s3582_s13] ss:$0 sm:$0xff] }
 0x21f   :  { %v1638_v34 = vrot.slane %v1637_v33, 4  ;;  %v1631_v36 = vpop.f32.mrf.mxu0 }
 0x221   :  { %v1639_v35 = vadd.f32 %v1638_v34, %v1637_v33  ;;  %v2624_v38 = vpop.f32.mrf.mxu0 }
 0x222   :  { %v74_v38 = vld [vmem:[%s3583_s1] sm:$0x3]  ;;  %s2854_s1 = smov 124  }
 0x223   :  { %v1640_v39 = vrot.slane %v1639_v35, 2  ;;  %2184 = vrot.lane.b32.xlu1 %v74_v38, %s2853_s7 }
 0x225   :  { %v1641_v40 = vadd.f32 %v1640_v39, %v1639_v35  ;;  %v2824_v39 = vld [vmem:[%s3584_s16 + $0x8] sm:$0xff]  }
 0x227   :  { %v1642_v41 = vrot.slane %v1641_v40, 1 }
 0x229   :  { %v1643_v42 = vadd.f32 %v1642_v41, %v1641_v40  ;;  %v2825_v40 = vld [vmem:[%s3584_s16] sm:$0xff]  }
 0x22a   :  { %v2388_v41 = vld [vmem:[%s3585_s15] ss:$0 sm:$0xff] }
 0x22b   :  { %v1645_v43 = vmul.f32 0.5, %v1643_v42 }
 0x22d   :  { %v1646_v44 = vsub.f32 %v1629_v31, %v1645_v43 }
 0x22f   :  { %v1647_v45 = vmul.f32 %v1646_v44, %v1646_v44 }
 0x231   :  { %v1648_v46 = vsel %vm1636_vm2, %v1647_v45, 0.0 }
 0x232   :  { %v1649_v47 = vrot.slane %v1648_v46, 4 }
 0x234   :  { %v1650_v48 = vadd.f32 %v1649_v47, %v1648_v46 }
 0x236   :  { %v1651_v49 = vrot.slane %v1650_v48, 2 }
 0x238   :  { %v1652_v50 = vadd.f32 %v1651_v49, %v1650_v48 }
 0x23a   :  { %v1653_v51 = vrot.slane %v1652_v50, 1 }
 0x23c   :  { %v1654_v52 = vadd.f32 %v1653_v51, %v1652_v50 }
 0x23e   :  { %v1655_v53 = vmul.f32 0.5, %v1654_v52 }
 0x240   :  { %v1656_v54 = vadd.f32 0.001, %v1655_v53 }
 0x242   :  { %2830 = vrsqrt.f32 %v1656_v54  ;;  %v2308_v54 = vmul.f32 -1.442695, %v3417_v61 }
 0x24f   :  { %v2831_v55 = vpop.eup %2830 }
 0x250   :  { %v1658_v57 = vmul.f32 %v2831_v55, %v1646_v44 }
 0x252   :  { %v1665_v59 = vmul.f32 %v2378_v56, %v1658_v57 }
 0x254   :  { %v1672_v60 = vadd.f32 %v2379_v58, %v1665_v59 }
 0x256   :  { %v1673_v62 = vmax.f32 %v1672_v60, 0.0 }
 0x258   :  { %v1674_v63 = vpack.c.bf16 %v1673_v62, %v1673_v62 }
 0x25a   :  { %2634 = vmatmul.mubr.msk.bf16.vlgmr.msra.gmra.mxu1 %vm1714_vm3, %v1674_v63 }
 0x25b   :  { %2653 = vmatprep.mubr.msk.bf16.mxu1 %vm2852_vm0, %v2851_v37  ;;  %2650 = vmatpush3.bf16.msra.mxu1 %v2824_v39  ;;  %v2829_v39 = vld [vmem:[%s3589_s20] sm:$0xff]  }
 0x25c   :  { %2651 = vmatprep.subr.bf16.mxu1 %v2851_v37 }
 0x25f   :  { %2652 = vmatpush3.bf16.msra.mxu1 %v2825_v40  ;;  %v2406_v40 = vld [vmem:[%s3586_s17 + $0x1] ss:$0 sm:$0xff] }
 0x260   :  { %2665 = vmatprep.subr.bf16.mxu1 %v2851_v37 }
 0x295   :  { %v3514_v63 = vpop.permute.xlu1 %2184 }
 0x31a   :  { %v1752_v5 = vpop.f32.mrf.mxu1 }
 0x31b   :  { %v1753_v6 = vadd.f32 %v2380_v4, %v1752_v5  ;;  %v2395_v4 = vld [vmem:[%s3586_s17] ss:$0 sm:$0xff] }
 0x31c   :  { %v2635_v7 = vpop.f32.mrf.mxu1 }
 0x31d   :  { %v1760_v8 = vsel %vm1636_vm2, %v1753_v6, 0.0 }
 0x31e   :  { %v1761_v9 = vrot.slane %v1760_v8, 4  ;;  %v1755_v10 = vpop.f32.mrf.mxu1 }
 0x320   :  { %v1762_v11 = vadd.f32 %v1761_v9, %v1760_v8  ;;  %v2636_v12 = vpop.f32.mrf.mxu1 }
 0x322   :  { %v1763_v13 = vrot.slane %v1762_v11, 2 }
 0x324   :  { %v1764_v14 = vadd.f32 %v1763_v13, %v1762_v11 }
 0x326   :  { %v1765_v15 = vrot.slane %v1764_v14, 1 }
 0x328   :  { %v1766_v16 = vadd.f32 %v1765_v15, %v1764_v14 }
 0x32a   :  { %v1767_v17 = vmul.f32 0.5, %v1766_v16 }
 0x32c   :  { %v1768_v18 = vsub.f32 %v1753_v6, %v1767_v17 }
 0x32e   :  { %v1769_v19 = vmul.f32 %v1768_v18, %v1768_v18 }
 0x330   :  { %v1770_v20 = vsel %vm1636_vm2, %v1769_v19, 0.0 }
 0x331   :  { %v1771_v21 = vrot.slane %v1770_v20, 4 }
 0x333   :  { %v1772_v22 = vadd.f32 %v1771_v21, %v1770_v20 }
 0x335   :  { %v1773_v23 = vrot.slane %v1772_v22, 2 }
 0x337   :  { %v1774_v24 = vadd.f32 %v1773_v23, %v1772_v22 }
 0x339   :  { %v1775_v25 = vrot.slane %v1774_v24, 1 }
 0x33b   :  { %v1776_v26 = vadd.f32 %v1775_v25, %v1774_v24 }
 0x33d   :  { %v1777_v27 = vmul.f32 0.5, %v1776_v26 }
 0x33f   :  { %v1778_v28 = vadd.f32 0.001, %v1777_v27 }
 0x341   :  { %2832 = vrsqrt.f32 %v1778_v28 }
 0x34e   :  { %v2833_v29 = vpop.eup %2832 }
 0x34f   :  { %v1780_v31 = vmul.f32 %v2833_v29, %v1768_v18 }
 0x351   :  { %v1787_v33 = vmul.f32 %v2386_v30, %v1780_v31  ;;  %v2399_v30 = vld [vmem:[%s3587_s18] ss:$0 sm:$0xff] }
 0x353   :  { %v1794_v34 = vadd.f32 %v2387_v32, %v1787_v33  ;;  %v2400_v32 = vld [vmem:[%s3588_s19] ss:$0 sm:$0xff] }
 0x355   :  { %v1795_v36 = vmax.f32 %v1794_v34, 0.0 }
 0x357   :  { %v1796_v35 = vpack.c.bf16 %v1795_v36, %v1795_v36 }
 0x359   :  { %2646 = vmatmul.mubr.msk.bf16.vlgmr.msra.gmra.mxu0 %vm1714_vm3, %v1796_v35 }
 0x35a   :  { %2661 = vmatprep.mubr.msk.bf16.mxu0 %vm2852_vm0, %v2851_v37  ;;  %2658 = vmatpush3.bf16.msra.mxu0 %v2826_v1 }
 0x35b   :  { %2659 = vmatprep.subr.bf16.mxu0 %v2851_v37 }
 0x35e   :  { %2660 = vmatpush3.bf16.msra.mxu0 %v2827_v3 }
 0x419   :  { %v1873_v42 = vpop.f32.mrf.mxu0 }
 0x41a   :  { %v3500_v43 = vadd.f32 %v2388_v41, %v1873_v42 }
 0x41b   :  { %v2647_v44 = vpop.f32.mrf.mxu0 }
 0x41c   :  { %v2394_v45 = vmul.f32 -1.442695, %v3500_v43  ;;  %v1892_v46 = vpack.c.bf16 %v3500_v43, %v3500_v43 }
 0x41d   :  { %v1876_v47 = vpop.f32.mrf.mxu0 }
 0x41e   :  { %2834 = vpow2.f32 %v2394_v45  ;;  %1905 = vrot.lane.b32.xlu0 %v1892_v46, %s2854_s1 }
 0x41f   :  { %v2648_v48 = vpop.f32.mrf.mxu0 }
 0x422   :  { %820 = vrot.lane.b32.xlu0 %v74_v38, %s2855_s5 }
 0x42b   :  { %v2835_v49 = vpop.eup %2834 }
 0x42c   :  { %v1882_v50 = vadd.f32 1.0, %v2835_v49 }
 0x42e   :  { %2836 = vrcp.f32 %v1882_v50 }
 0x42f   :  { %2838 = vpow2.f32 %v2308_v54 }
 0x43b   :  { %v2837_v51 = vpop.eup %2836 }
 0x43c   :  { %v1885_v52 = vadd.f32 0.001, %v2837_v51  ;;  %v2839_v55 = vpop.eup %2838 }
 0x43d   :  { %v815_v56 = vadd.f32 1.0, %v2839_v55 }
 0x43e   :  { %v1886_v53 = vmul.f32 %v1885_v52, %v74_v38  ;;  %v2828_v38 = vld [vmem:[%s3589_s20 + $0x8] sm:$0xff]  }
 0x43f   :  { %2840 = vrcp.f32 %v815_v56 }
 0x440   :  { %1888 = vrot.lane.b32.xlu0 %v1886_v53, %s2853_s7 }
 0x44c   :  { %v2841_v57 = vpop.eup %2840 }
 0x44d   :  { %v3510_v59 = vadd.f32 0.001, %v2841_v57 }
 0x490   :  { %v1906_v58 = vpop.permute.xlu0 %1905 }
 0x491   :  { %2654 = vmatmul.mubr.msk.bf16.vlgmr.msra.gmra.mxu1 %vm1590_vm1, %v1906_v58 }
 0x492   :  { %2669 = vmatprep.mubr.msk.bf16.mxu1 %vm2852_vm0, %v2851_v37  ;;  %2666 = vmatpush3.bf16.msra.mxu1 %v2828_v38 }
 0x493   :  { %2667 = vmatprep.subr.bf16.mxu1 %v2851_v37 }
 0x494   :  { %v821_v60 = vpop.permute.xlu0 %820 }
 0x495   :  { %v823_v62 = vmul.f32 %v821_v60, %v3510_v59 }
 0x496   :  { %2668 = vmatpush3.bf16.msra.mxu1 %v2829_v39 }
 0x497   :  { %825 = vrot.lane.b32.xlu1 %v823_v62, %s2853_s7 }
 0x509   :  { %v826_v0 = vpop.permute.xlu1 %825 }
 0x50a   :  { %v828_v2 = vadd.f32 %v826_v0, %v3417_v61 }
 0x50c   :  { %2194 = vrot.lane.b32.xlu0 %v828_v2, %s2856_s24 }
 0x510   :  { %2202 = vrot.lane.b32.xlu0 %v1885_v52, %s2857_s4 }
 0x551   :  { %v1956_v5 = vpop.f32.mrf.mxu1 }
 0x552   :  { %v1957_v6 = vadd.f32 %v2395_v4, %v1956_v5  ;;  %v2412_v5 = vld [vmem:[%s3587_s18 + $0x1] ss:$0 sm:$0xff]  ;;  %s2858_s18 = smov 12  }
 0x553   :  { %v2655_v7 = vpop.f32.mrf.mxu1 }
 0x554   :  { %v1965_v8 = vsel %vm1964_vm4, %v1957_v6, 0.0  ;;  %v2413_v7 = vld [vmem:[%s3588_s19 + $0x1] ss:$0 sm:$0xff]  ;;  %s2859_s19 = smov 10  }
 0x555   :  { %v1966_v9 = vrot.slane %v1965_v8, 4  ;;  %v1959_v10 = vpop.f32.mrf.mxu1 }
 0x557   :  { %v1967_v11 = vadd.f32 %v1966_v9, %v1965_v8  ;;  %v2656_v12 = vpop.f32.mrf.mxu1 }
 0x558   :  { %v2414_v12 = vld [vmem:[%s3590_s21] ss:$0 sm:$0xff]  ;;  %s2860_s21 = smov 16  }
 0x559   :  { %v1968_v13 = vrot.slane %v1967_v11, 2 }
 0x55b   :  { %v1969_v14 = vadd.f32 %v1968_v13, %v1967_v11 }
 0x55d   :  { %v1970_v15 = vrot.slane %v1969_v14, 1 }
 0x55f   :  { %v1971_v16 = vadd.f32 %v1970_v15, %v1969_v14 }
 0x561   :  { %v1972_v17 = vmul.f32 0.5, %v1971_v16 }
 0x563   :  { %v1973_v18 = vsub.f32 %v1957_v6, %v1972_v17 }
 0x565   :  { %v1974_v19 = vmul.f32 %v1973_v18, %v1973_v18 }
 0x567   :  { %v1975_v20 = vsel %vm1964_vm4, %v1974_v19, 0.0 }
 0x568   :  { %v1976_v21 = vrot.slane %v1975_v20, 4 }
 0x56a   :  { %v1977_v22 = vadd.f32 %v1976_v21, %v1975_v20 }
 0x56c   :  { %v1978_v23 = vrot.slane %v1977_v22, 2 }
 0x56e   :  { %v1979_v24 = vadd.f32 %v1978_v23, %v1977_v22 }
 0x570   :  { %v1980_v25 = vrot.slane %v1979_v24, 1 }
 0x572   :  { %v1981_v26 = vadd.f32 %v1980_v25, %v1979_v24  ;;  %v1889_v24 = vpop.permute.xlu0 %1888 }
 0x573   :  { %v1891_v25 = vadd.f32 %v1889_v24, %v3500_v43 }
 0x574   :  { %v1982_v27 = vmul.f32 0.5, %v1981_v26 }
 0x576   :  { %v1983_v28 = vadd.f32 0.001, %v1982_v27 }
 0x578   :  { %2842 = vrsqrt.f32 %v1983_v28 }
 0x585   :  { %v2843_v29 = vpop.eup %2842 }
 0x586   :  { %v1985_v31 = vmul.f32 %v2843_v29, %v1973_v18  ;;  %v2195_v29 = vpop.permute.xlu0 %2194 }
 0x588   :  { %v1992_v33 = vmul.f32 %v2399_v30, %v1985_v31 }
 0x58a   :  { %v1999_v34 = vadd.f32 %v2400_v32, %v1992_v33  ;;  %v2203_v32 = vpop.permute.xlu0 %2202 }
 0x58c   :  { %v2000_v36 = vmax.f32 %v1999_v34, 0.0 }
 0x58e   :  { %v2001_v35 = vpack.c.bf16 %v2000_v36, %v2000_v36 }
 0x590   :  { %2662 = vmatmul.mubr.msk.bf16.vlgmr.msra.gmra.mxu0 %vm1590_vm1, %v2001_v35 }
 0x650   :  { %v2064_v41 = vpop.f32.mrf.mxu0 }
 0x651   :  { %v2065_v42 = vadd.f32 %v2406_v40, %v2064_v41 }
 0x652   :  { %v2663_v44 = vpop.f32.mrf.mxu0 }
 0x653   :  { %v2074_v45 = vsel %vm1964_vm4, %v2065_v42, 0.0 }
 0x654   :  { %v2075_v46 = vrot.slane %v2074_v45, 4  ;;  %v2067_v47 = vpop.f32.mrf.mxu0 }
 0x656   :  { %v2076_v48 = vadd.f32 %v2075_v46, %v2074_v45  ;;  %v2664_v49 = vpop.f32.mrf.mxu0 }
 0x658   :  { %v2077_v50 = vrot.slane %v2076_v48, 2 }
 0x65a   :  { %v2078_v37 = vadd.f32 %v2077_v50, %v2076_v48 }
 0x65c   :  { %v2079_v51 = vrot.slane %v2078_v37, 1 }
 0x65e   :  { %v2080_v52 = vadd.f32 %v2079_v51, %v2078_v37 }
 0x660   :  { %v2081_v53 = vmul.f32 0.5, %v2080_v52 }
 0x662   :  { %v2082_v54 = vsub.f32 %v2065_v42, %v2081_v53 }
 0x664   :  { %v2083_v55 = vmul.f32 %v2082_v54, %v2082_v54 }
 0x666   :  { %v2084_v56 = vsel %vm1964_vm4, %v2083_v55, 0.0 }
 0x667   :  { %v2085_v57 = vrot.slane %v2084_v56, 4 }
 0x669   :  { %v2086_v58 = vadd.f32 %v2085_v57, %v2084_v56 }
 0x66b   :  { %v2087_v60 = vrot.slane %v2086_v58, 2 }
 0x66d   :  { %v2088_v62 = vadd.f32 %v2087_v60, %v2086_v58 }
 0x66f   :  { %v2089_v0 = vrot.slane %v2088_v62, 1 }
 0x671   :  { %v2090_v1 = vadd.f32 %v2089_v0, %v2088_v62 }
 0x673   :  { %v2091_v2 = vmul.f32 0.5, %v2090_v1 }
 0x675   :  { %v2092_v3 = vadd.f32 0.001, %v2091_v2 }
 0x677   :  { %2844 = vrsqrt.f32 %v2092_v3 }
 0x684   :  { %v2845_v4 = vpop.eup %2844 }
 0x685   :  { %v2094_v6 = vmul.f32 %v2845_v4, %v2082_v54 }
 0x687   :  { %v2101_v8 = vmul.f32 %v2412_v5, %v2094_v6 }
 0x689   :  { %v2108_v9 = vadd.f32 %v2413_v7, %v2101_v8 }
 0x68b   :  { %v2109_v10 = vmax.f32 %v2108_v9, 0.0 }
 0x68d   :  { %v2110_v11 = vpack.c.bf16 %v2109_v10, %v2109_v10 }
 0x68f   :  { %2670 = vmatmul.mubr.msk.bf16.vlgmr.msra.gmra.mxu1 %vm1590_vm1, %v2110_v11 }
 0x74f   :  { %v2171_v13 = vpop.f32.mrf.mxu1 }
 0x750   :  { %v2172_v14 = vadd.f32 %v2414_v12, %v2171_v13 }
 0x751   :  { %v2671_v15 = vpop.f32.mrf.mxu1 }
 0x752   :  { %v2418_v16 = vmul.f32 -1.442695, %v2172_v14  ;;  %2210 = vrot.lane.b32.xlu0 %v2172_v14, %s2858_s18 }
 0x753   :  { %v2174_v17 = vpop.f32.mrf.mxu1 }
 0x754   :  { %2846 = vpow2.f32 %v2418_v16 }
 0x755   :  { %v2672_v18 = vpop.f32.mrf.mxu1 }
 0x761   :  { %v2847_v19 = vpop.eup %2846 }
 0x762   :  { %v2180_v20 = vadd.f32 1.0, %v2847_v19 }
 0x764   :  { %2848 = vrcp.f32 %v2180_v20 }
 0x771   :  { %v2849_v21 = vpop.eup %2848 }
 0x772   :  { %v2183_v22 = vadd.f32 0.001, %v2849_v21 }
 0x774   :  { %v2187_v23 = vmul.f32 %v3514_v63, %v2183_v22  ;;  %v2222_v63 = vsel %vm2221_vm5, %v3417_v61, %v3510_v59 }
 0x775   :  { %v2224_v30 = vsel %vm2223_vm6, %v2222_v63, %v2195_v29 }
 0x776   :  { %2189 = vrot.lane.b32.xlu1 %v2187_v23, %s2853_s7 }
 0x77a   :  { %2198 = vrot.lane.b32.xlu1 %v3500_v43, %s2857_s4 }
 0x77e   :  { %2206 = vrot.lane.b32.xlu1 %v1891_v25, %s2859_s19 }
 0x782   :  { %2214 = vrot.lane.b32.xlu1 %v2183_v22, %s2858_s18 }
 0x7c4   :  { %v2211_v34 = vpop.permute.xlu0 %2210 }
 0x7e8   :  { %v2190_v26 = vpop.permute.xlu1 %2189 }
 0x7e9   :  { %v2192_v27 = vadd.f32 %v2190_v26, %v2172_v14 }
 0x7eb   :  { %2218 = vrot.lane.b32.xlu0 %v2192_v27, %s2860_s21 }
 0x7ec   :  { %v2199_v28 = vpop.permute.xlu1 %2198 }
 0x7ed   :  { %v2226_v33 = vsel %vm2225_vm7, %v2224_v30, %v2199_v28 }
 0x7ee   :  { %v2228_v43 = vsel %vm2227_vm8, %v2226_v33, %v2203_v32 }
 0x7f0   :  { %v2207_v31 = vpop.permute.xlu1 %2206 }
 0x7f1   :  { %v2230_v36 = vsel %vm2229_vm9, %v2228_v43, %v2207_v31 }
 0x7f2   :  { %v2232_v38 = vsel %vm2231_vm10, %v2230_v36, %v2211_v34 }
 0x7f4   :  { %v2215_v35 = vpop.permute.xlu1 %2214 }
 0x7f5   :  { %v2234_v39 = vsel %vm2233_vm11, %v2232_v38, %v2215_v35 }
 0x85d   :  { %v2219_v40 = vpop.permute.xlu0 %2218 }
 0x85e   :  { %v2236_v41 = vsel %vm2235_vm12, %v2234_v39, %v2219_v40 }
 0x85f   :  { %2238 = vst.msk [vmem:[%s3591_s22] sm:$0x3] %vm2237_vm13, %v2236_v41 }

// kernel: encoder_forward.2
= control target key start
LH: loop header
LB: loop body
LE: loop exit
PB: predicated region body
PF: predicated region fallthrough
CT: control target
= control target key end

     0   :  { %vm288_vm0 = vcmask 392192   ;;  %vm676_vm1 = vcmask 130048   ;;  %vm1345_vm2 = vcmask 123904   ;;  %v4484_v31 = vmov 0.0   ;;  %s4487_s28 = smov 48   ;;  %s4488_s29 = smov 64   ;;  %s7656_s1 = inlined_call_operand.vmem [shape: bf16[48,16], index: 1, kind: input, shape index: {}]   ;;  %s7657_s0 = inlined_call_operand.vmem [shape: bf16[512,48], index: 0, kind: input, shape index: {}]   ;;  %s7658_s2 = inlined_call_operand.vmem [shape: f32[1,16], index: 2, kind: input, shape index: {}]   ;;  %s7659_s3 = inlined_call_operand.vmem [shape: f32[1,16], index: 3, kind: input, shape index: {}]   ;;  %s7660_s4 = inlined_call_operand.vmem [shape: f32[1,16], index: 4, kind: input, shape index: {}]   ;;  %s7661_s5 = inlined_call_operand.vmem [shape: bf16[256,32], index: 5, kind: input, shape index: {}]   ;;  %s7662_s6 = inlined_call_operand.vmem [shape: f32[1,32], index: 6, kind: input, shape index: {}]   ;;  %s7663_s7 = inlined_call_operand.vmem [shape: f32[1,32], index: 7, kind: input, shape index: {}]   ;;  %s7664_s8 = inlined_call_operand.vmem [shape: f32[1,32], index: 8, kind: input, shape index: {}]   ;;  %s7665_s9 = inlined_call_operand.vmem [shape: bf16[2,2,64,16], index: 9, kind: output, shape index: {}]  }
   0x1   :  { %v4429_v0 = vld [vmem:[%s7656_s1 + $0x10] sm:$0xff]   ;;  %v4430_v1 = vld [vmem:[%s7656_s1 + $0x8] sm:$0xff]   ;;  %v4432_v2 = vld [vmem:[%s7657_s0] sm:$0xff]   ;;  %1351 = vst.msk [vmem:[#allocation2 + $0x30] sm:$0xff] %vm676_vm1, %v4484_v31  ;;  %s4489_s30 = smov 80   ;;  %s4490_s10 = smov 96  }
   0x2   :  { %3785 = vmatprep.subr.bf16.mxu0 %v4429_v0  ;;  %3855 = vmatprep.subr.bf16.mxu1 %v4429_v0  ;;  %v4431_v3 = vld [vmem:[%s7656_s1] sm:$0xff]   ;;  %v4433_v4 = vld [vmem:[%s7657_s0 + $0x8] sm:$0xff]   ;;  %v4434_v5 = vld [vmem:[%s7657_s0 + $0x10] sm:$0xff]   ;;  %1352 = vst.msk [vmem:[#allocation2 + $0x38] sm:$0x3] %vm1345_vm2, %v4484_v31  ;;  %vm2749_vm3 = vcmask 261120  }
   0x3   :  { %3786 = vmatpush3.bf16.msra.mxu0 %v4429_v0  ;;  %3858 = vmatpush3.bf16.msra.mxu1 %v4429_v0  ;;  %v4435_v6 = vld [vmem:[%s7657_s0 + $0x18] sm:$0xff]   ;;  %v4436_v7 = vld [vmem:[%s7657_s0 + $0x20] sm:$0xff]   ;;  %v4437_v8 = vld [vmem:[%s7657_s0 + $0x28] sm:$0xff]   ;;  %1347 = vst.msk [vmem:[#allocation2 + $0x10] sm:$0xff] %vm676_vm1, %v4484_v31  ;;  %vm2782_vm4 = vcmask 523264   ;;  %vm2799_vm5 = vcmask 654336  }
   0x4   :  { %3787 = vmatprep.subr.bf16.mxu0 %v4430_v1  ;;  %3856 = vmatprep.subr.bf16.mxu1 %v4430_v1  ;;  %v4438_v9 = vld [vmem:[%s7657_s0 + $0x30] sm:$0xff]   ;;  %v4456_v10 = vld [vmem:[%s7657_s0 + $0xc0] sm:$0xff]   ;;  %v4457_v11 = vld [vmem:[%s7657_s0 + $0xc8] sm:$0xff]   ;;  %1348 = vst.msk [vmem:[#allocation2 + $0x18] sm:$0x3] %vm1345_vm2, %v4484_v31  ;;  %vm2816_vm6 = vcmask 785408  }
   0x5   :  { %3791 = vmatprep.mubr.msk.bf16.mxu0 %vm288_vm0, %v4432_v2  ;;  %3839 = vmatprep.mubr.msk.bf16.mxu1 %vm288_vm0, %v4456_v10  ;;  %v4458_v12 = vld [vmem:[%s7657_s0 + $0xd0] sm:$0xff]   ;;  %v4439_v13 = vld [vmem:[%s7657_s0 + $0x38] sm:$0xff]   ;;  %v4440_v15 = vld [vmem:[%s7657_s0 + $0x40] sm:$0xff]   ;;  %1349 = vst.msk [vmem:[#allocation2 + $0x20] sm:$0xff] %vm676_vm1, %v4484_v31  ;;  %vm2833_vm7 = vcmask 916480   ;;  %vm3463_vm8 = vcmask 125952  }
   0x6   :  { %v4459_v14 = vld [vmem:[%s7657_s0 + $0xd8] sm:$0xff]   ;;  %v4460_v16 = vld [vmem:[%s7657_s0 + $0xe0] sm:$0xff]   ;;  %v4441_v17 = vld [vmem:[%s7657_s0 + $0x48] sm:$0xff]   ;;  %1350 = vst.msk [vmem:[#allocation2 + $0x28] sm:$0x3] %vm1345_vm2, %v4484_v31 }
   0x7   :  { %3788 = vmatpush3.bf16.msra.mxu0 %v4430_v1  ;;  %3859 = vmatpush3.bf16.msra.mxu1 %v4430_v1  ;;  %v4461_v18 = vld [vmem:[%s7657_s0 + $0xe8] sm:$0xff]   ;;  %v4442_v19 = vld [vmem:[%s7657_s0 + $0x50] sm:$0xff]   ;;  %v4443_v21 = vld [vmem:[%s7657_s0 + $0x58] sm:$0xff]   ;;  %1353 = vst.msk [vmem:[#allocation2 + $0x40] sm:$0xff] %vm676_vm1, %v4484_v31 }
   0x8   :  { %3789 = vmatprep.subr.bf16.mxu0 %v4431_v3  ;;  %3857 = vmatprep.subr.bf16.mxu1 %v4431_v3  ;;  %v4462_v20 = vld [vmem:[%s7657_s0 + $0xf0] sm:$0xff]   ;;  %v4463_v22 = vld [vmem:[%s7657_s0 + $0xf8] sm:$0xff]   ;;  %v4444_v23 = vld [vmem:[%s7657_s0 + $0x60] sm:$0xff]   ;;  %1354 = vst.msk [vmem:[#allocation2 + $0x48] sm:$0x3] %vm1345_vm2, %v4484_v31 }
   0x9   :  { %v4445_v24 = vld [vmem:[%s7657_s0 + $0x68] sm:$0xff]   ;;  %v4446_v25 = vld [vmem:[%s7657_s0 + $0x70] sm:$0xff]   ;;  %v4447_v26 = vld [vmem:[%s7657_s0 + $0x78] sm:$0xff]   ;;  %1355 = vst.msk [vmem:[#allocation2 + $0x50] sm:$0xff] %vm676_vm1, %v4484_v31 }
   0xa   :  { %v4448_v27 = vld [vmem:[%s7657_s0 + $0x80] sm:$0xff]   ;;  %v4449_v28 = vld [vmem:[%s7657_s0 + $0x88] sm:$0xff]   ;;  %v4450_v29 = vld [vmem:[%s7657_s0 + $0x90] sm:$0xff]   ;;  %1356 = vst.msk [vmem:[#allocation2 + $0x58] sm:$0x3] %vm1345_vm2, %v4484_v31 }
   0xb   :  { %3790 = vmatpush3.bf16.msra.mxu0 %v4431_v3  ;;  %3860 = vmatpush3.bf16.msra.mxu1 %v4431_v3  ;;  %v4662_v30 = vld [vmem:[%s7657_s0 + $0x98] sm:$0xff]   ;;  %1357 = vst.msk [vmem:[#allocation2 + $0x60] sm:$0xff] %vm676_vm1, %v4484_v31  ;;  %1359 = vst.msk [vmem:[#allocation2 + $0x70] sm:$0xff] %vm676_vm1, %v4484_v31  ;;  %v4452_v32 = vld [vmem:[%s7657_s0 + $0xa0] sm:$0xff]  }
   0xc   :  { %1358 = vst.msk [vmem:[#allocation2 + $0x68] sm:$0x3] %vm1345_vm2, %v4484_v31  ;;  %1360 = vst.msk [vmem:[#allocation2 + $0x78] sm:$0x3] %vm1345_vm2, %v4484_v31  ;;  %v4453_v33 = vld [vmem:[%s7657_s0 + $0xa8] sm:$0xff]   ;;  %v4454_v34 = vld [vmem:[%s7657_s0 + $0xb0] sm:$0xff]  }
   0xd   :  { %1361 = vst.msk [vmem:[#allocation2 + $0x80] sm:$0xff] %vm676_vm1, %v4484_v31  ;;  %1363 = vst.msk [vmem:[#allocation2 + $0x90] sm:$0xff] %vm676_vm1, %v4484_v31  ;;  %v4455_v35 = vld [vmem:[%s7657_s0 + $0xb8] sm:$0xff]   ;;  %v4973_v38 = vld [vmem:[%s7658_s2] ss:$0 sm:$0xff]  ;;  %s4491_s0 = smov 112  }
   0xe   :  { %3792 = vmatmul.mubr.msk.bf16.vlgmr.msra.gmra.mxu0 %vm288_vm0, %v4433_v4  ;;  %3840 = vmatmul.mubr.msk.bf16.vlgmr.msra.gmra.mxu1 %vm288_vm0, %v4457_v11  ;;  %1362 = vst.msk [vmem:[#allocation2 + $0x88] sm:$0x3] %vm1345_vm2, %v4484_v31  ;;  %1364 = vst.msk [vmem:[#allocation2 + $0x98] sm:$0x3] %vm1345_vm2, %v4484_v31 }
   0xf   :  { %3795 = vmatprep.mubr.msk.bf16.mxu0 %vm288_vm0, %v4434_v5  ;;  %3843 = vmatprep.mubr.msk.bf16.mxu1 %vm288_vm0, %v4458_v12  ;;  %1367 = vst.msk [vmem:[#allocation2 + $0xb0] sm:$0xff] %vm676_vm1, %v4484_v31  ;;  %1369 = vst.msk [vmem:[#allocation2 + $0xc0] sm:$0xff] %vm676_vm1, %v4484_v31 }
  0x10   :  { %1368 = vst.msk [vmem:[#allocation2 + $0xb8] sm:$0x3] %vm1345_vm2, %v4484_v31  ;;  %1370 = vst.msk [vmem:[#allocation2 + $0xc8] sm:$0x3] %vm1345_vm2, %v4484_v31 }
  0x11   :  { %1371 = vst.msk [vmem:[#allocation2 + $0xd0] sm:$0xff] %vm676_vm1, %v4484_v31  ;;  %1373 = vst.msk [vmem:[#allocation2 + $0xe0] sm:$0xff] %vm676_vm1, %v4484_v31 }
  0x12   :  { %1372 = vst.msk [vmem:[#allocation2 + $0xd8] sm:$0x3] %vm1345_vm2, %v4484_v31  ;;  %1374 = vst.msk [vmem:[#allocation2 + $0xe8] sm:$0x3] %vm1345_vm2, %v4484_v31 }
  0x13   :  { %1375 = vst.msk [vmem:[#allocation2 + $0xf0] sm:$0xff] %vm676_vm1, %v4484_v31  ;;  %1377 = vst.msk [vmem:[#allocation2 + $0x100] sm:$0xff] %vm676_vm1, %v4484_v31 }
  0x14   :  { %1376 = vst.msk [vmem:[#allocation2 + $0xf8] sm:$0x3] %vm1345_vm2, %v4484_v31  ;;  %1378 = vst.msk [vmem:[#allocation2 + $0x108] sm:$0x3] %vm1345_vm2, %v4484_v31 }
  0x15   :  { %1379 = vst.msk [vmem:[#allocation2 + $0x110] sm:$0xff] %vm676_vm1, %v4484_v31  ;;  %1381 = vst.msk [vmem:[#allocation2 + $0x120] sm:$0xff] %vm676_vm1, %v4484_v31 }
  0x16   :  { %3796 = vmatmul.mubr.msk.bf16.gmra.mxu0 %vm288_vm0, %v4435_v6  ;;  %3844 = vmatmul.mubr.msk.bf16.gmra.mxu1 %vm288_vm0, %v4459_v14  ;;  %1380 = vst.msk [vmem:[#allocation2 + $0x118] sm:$0x3] %vm1345_vm2, %v4484_v31  ;;  %1382 = vst.msk [vmem:[#allocation2 + $0x128] sm:$0x3] %vm1345_vm2, %v4484_v31 }
  0x17   :  { %3799 = vmatprep.mubr.msk.bf16.mxu0 %vm288_vm0, %v4436_v7  ;;  %3847 = vmatprep.mubr.msk.bf16.mxu1 %vm288_vm0, %v4460_v16  ;;  %1383 = vst.msk [vmem:[#allocation2 + $0x130] sm:$0xff] %vm676_vm1, %v4484_v31  ;;  %1385 = vst.msk [vmem:[#allocation2 + $0x140] sm:$0xff] %vm676_vm1, %v4484_v31 }
  0x18   :  { %1384 = vst.msk [vmem:[#allocation2 + $0x138] sm:$0x3] %vm1345_vm2, %v4484_v31  ;;  %1386 = vst.msk [vmem:[#allocation2 + $0x148] sm:$0x3] %vm1345_vm2, %v4484_v31 }
  0x19   :  { %1387 = vst.msk [vmem:[#allocation2 + $0x150] sm:$0xff] %vm676_vm1, %v4484_v31  ;;  %1389 = vst.msk [vmem:[#allocation2 + $0x160] sm:$0xff] %vm676_vm1, %v4484_v31 }
  0x1a   :  { %1388 = vst.msk [vmem:[#allocation2 + $0x158] sm:$0x3] %vm1345_vm2, %v4484_v31  ;;  %1390 = vst.msk [vmem:[#allocation2 + $0x168] sm:$0x3] %vm1345_vm2, %v4484_v31 }
  0x1b   :  { %1391 = vst.msk [vmem:[#allocation2 + $0x170] sm:$0xff] %vm676_vm1, %v4484_v31  ;;  %1393 = vst.msk [vmem:[#allocation2 + $0x180] sm:$0xff] %vm676_vm1, %v4484_v31 }
  0x1c   :  { %1392 = vst.msk [vmem:[#allocation2 + $0x178] sm:$0x3] %vm1345_vm2, %v4484_v31  ;;  %1394 = vst.msk [vmem:[#allocation2 + $0x188] sm:$0x3] %vm1345_vm2, %v4484_v31 }
  0x1d   :  { %1395 = vst.msk [vmem:[#allocation2 + $0x190] sm:$0xff] %vm676_vm1, %v4484_v31  ;;  %1397 = vst.msk [vmem:[#allocation2 + $0x1a0] sm:$0xff] %vm676_vm1, %v4484_v31 }
  0x1e   :  { %3800 = vmatmul.mubr.msk.bf16.gmra.mxu0 %vm288_vm0, %v4437_v8  ;;  %3848 = vmatmul.mubr.msk.bf16.gmra.mxu1 %vm288_vm0, %v4461_v18  ;;  %1396 = vst.msk [vmem:[#allocation2 + $0x198] sm:$0x3] %vm1345_vm2, %v4484_v31  ;;  %1398 = vst.msk [vmem:[#allocation2 + $0x1a8] sm:$0x3] %vm1345_vm2, %v4484_v31 }
  0x1f   :  { %3803 = vmatprep.mubr.msk.bf16.mxu0 %vm288_vm0, %v4438_v9  ;;  %3851 = vmatprep.mubr.msk.bf16.mxu1 %vm288_vm0, %v4462_v20  ;;  %1399 = vst.msk [vmem:[#allocation2 + $0x1b0] sm:$0xff] %vm676_vm1, %v4484_v31  ;;  %1401 = vst.msk [vmem:[#allocation2 + $0x1c0] sm:$0xff] %vm676_vm1, %v4484_v31 }
  0x20   :  { %1400 = vst.msk [vmem:[#allocation2 + $0x1b8] sm:$0x3] %vm1345_vm2, %v4484_v31  ;;  %1402 = vst.msk [vmem:[#allocation2 + $0x1c8] sm:$0x3] %vm1345_vm2, %v4484_v31 }
  0x21   :  { %1405 = vst.msk [vmem:[#allocation2 + $0x1e0] sm:$0xff] %vm676_vm1, %v4484_v31  ;;  %1407 = vst.msk [vmem:[#allocation2 + $0x1f0] sm:$0xff] %vm676_vm1, %v4484_v31 }
  0x22   :  { %1406 = vst.msk [vmem:[#allocation2 + $0x1e8] sm:$0x3] %vm1345_vm2, %v4484_v31  ;;  %1408 = vst.msk [vmem:[#allocation2 + $0x1f8] sm:$0x3] %vm1345_vm2, %v4484_v31 }
  0x23   :  { %1409 = vst.msk [vmem:[#allocation2 + $0x200] sm:$0xff] %vm676_vm1, %v4484_v31  ;;  %1411 = vst.msk [vmem:[#allocation2 + $0x210] sm:$0xff] %vm676_vm1, %v4484_v31 }
  0x24   :  { %1410 = vst.msk [vmem:[#allocation2 + $0x208] sm:$0x3] %vm1345_vm2, %v4484_v31  ;;  %1412 = vst.msk [vmem:[#allocation2 + $0x218] sm:$0x3] %vm1345_vm2, %v4484_v31 }
  0x25   :  { %1413 = vst.msk [vmem:[#allocation2 + $0x220] sm:$0xff] %vm676_vm1, %v4484_v31  ;;  %1415 = vst.msk [vmem:[#allocation2 + $0x230] sm:$0xff] %vm676_vm1, %v4484_v31 }
  0x26   :  { %3804 = vmatmul.mubr.msk.bf16.gmra.mxu0 %vm288_vm0, %v4439_v13  ;;  %3852 = vmatmul.mubr.msk.bf16.gmra.mxu1 %vm288_vm0, %v4463_v22  ;;  %1414 = vst.msk [vmem:[#allocation2 + $0x228] sm:$0x3] %vm1345_vm2, %v4484_v31  ;;  %1416 = vst.msk [vmem:[#allocation2 + $0x238] sm:$0x3] %vm1345_vm2, %v4484_v31 }
  0x27   :  { %3807 = vmatprep.mubr.msk.bf16.mxu0 %vm288_vm0, %v4440_v15  ;;  %1417 = vst.msk [vmem:[#allocation2 + $0x240] sm:$0xff] %vm676_vm1, %v4484_v31  ;;  %1419 = vst.msk [vmem:[#allocation2 + $0x250] sm:$0xff] %vm676_vm1, %v4484_v31 }
  0x28   :  { %1418 = vst.msk [vmem:[#allocation2 + $0x248] sm:$0x3] %vm1345_vm2, %v4484_v31  ;;  %1420 = vst.msk [vmem:[#allocation2 + $0x258] sm:$0x3] %vm1345_vm2, %v4484_v31 }
  0x29   :  { %1421 = vst.msk [vmem:[#allocation2 + $0x260] sm:$0xff] %vm676_vm1, %v4484_v31  ;;  %1427 = vst.msk [vmem:[#allocation2 + $0x290] sm:$0xff] %vm676_vm1, %v4484_v31 }
  0x2a   :  { %1422 = vst.msk [vmem:[#allocation2 + $0x268] sm:$0x3] %vm1345_vm2, %v4484_v31  ;;  %1428 = vst.msk [vmem:[#allocation2 + $0x298] sm:$0x3] %vm1345_vm2, %v4484_v31 }
  0x2b   :  { %1429 = vst.msk [vmem:[#allocation2 + $0x2a0] sm:$0xff] %vm676_vm1, %v4484_v31  ;;  %1431 = vst.msk [vmem:[#allocation2 + $0x2b0] sm:$0xff] %vm676_vm1, %v4484_v31 }
  0x2c   :  { %1430 = vst.msk [vmem:[#allocation2 + $0x2a8] sm:$0x3] %vm1345_vm2, %v4484_v31  ;;  %1432 = vst.msk [vmem:[#allocation2 + $0x2b8] sm:$0x3] %vm1345_vm2, %v4484_v31 }
  0x2d   :  { %1433 = vst.msk [vmem:[#allocation2 + $0x2c0] sm:$0xff] %vm676_vm1, %v4484_v31  ;;  %1435 = vst.msk [vmem:[#allocation2 + $0x2d0] sm:$0xff] %vm676_vm1, %v4484_v31 }
  0x2e   :  { %3808 = vmatmul.mubr.msk.bf16.gmra.mxu0 %vm288_vm0, %v4441_v17  ;;  %1434 = vst.msk [vmem:[#allocation2 + $0x2c8] sm:$0x3] %vm1345_vm2, %v4484_v31  ;;  %1436 = vst.msk [vmem:[#allocation2 + $0x2d8] sm:$0x3] %vm1345_vm2, %v4484_v31 }
  0x2f   :  { %3811 = vmatprep.mubr.msk.bf16.mxu0 %vm288_vm0, %v4442_v19  ;;  %1437 = vst.msk [vmem:[#allocation2 + $0x2e0] sm:$0xff] %vm676_vm1, %v4484_v31  ;;  %1439 = vst.msk [vmem:[#allocation2 + $0x2f0] sm:$0xff] %vm676_vm1, %v4484_v31 }
  0x30   :  { %1438 = vst.msk [vmem:[#allocation2 + $0x2e8] sm:$0x3] %vm1345_vm2, %v4484_v31  ;;  %1440 = vst.msk [vmem:[#allocation2 + $0x2f8] sm:$0x3] %vm1345_vm2, %v4484_v31 }
  0x31   :  { %1441 = vst.msk [vmem:[#allocation2 + $0x300] sm:$0xff] %vm676_vm1, %v4484_v31  ;;  %1443 = vst.msk [vmem:[#allocation2 + $0x310] sm:$0xff] %vm676_vm1, %v4484_v31 }
  0x32   :  { %1442 = vst.msk [vmem:[#allocation2 + $0x308] sm:$0x3] %vm1345_vm2, %v4484_v31  ;;  %1444 = vst.msk [vmem:[#allocation2 + $0x318] sm:$0x3] %vm1345_vm2, %v4484_v31 }
  0x33   :  { %1447 = vst.msk [vmem:[#allocation2 + $0x330] sm:$0xff] %vm676_vm1, %v4484_v31  ;;  %1449 = vst.msk [vmem:[#allocation2 + $0x340] sm:$0xff] %vm676_vm1, %v4484_v31 }
  0x34   :  { %1448 = vst.msk [vmem:[#allocation2 + $0x338] sm:$0x3] %vm1345_vm2, %v4484_v31  ;;  %1450 = vst.msk [vmem:[#allocation2 + $0x348] sm:$0x3] %vm1345_vm2, %v4484_v31 }
  0x35   :  { %1451 = vst.msk [vmem:[#allocation2 + $0x350] sm:$0xff] %vm676_vm1, %v4484_v31  ;;  %1453 = vst.msk [vmem:[#allocation2 + $0x360] sm:$0xff] %vm676_vm1, %v4484_v31 }
  0x36   :  { %3812 = vmatmul.mubr.msk.bf16.gmra.mxu0 %vm288_vm0, %v4443_v21  ;;  %1452 = vst.msk [vmem:[#allocation2 + $0x358] sm:$0x3] %vm1345_vm2, %v4484_v31  ;;  %1454 = vst.msk [vmem:[#allocation2 + $0x368] sm:$0x3] %vm1345_vm2, %v4484_v31 }
  0x37   :  { %3815 = vmatprep.mubr.msk.bf16.mxu0 %vm288_vm0, %v4444_v23  ;;  %1455 = vst.msk [vmem:[#allocation2 + $0x370] sm:$0xff] %vm676_vm1, %v4484_v31  ;;  %1457 = vst.msk [vmem:[#allocation2 + $0x380] sm:$0xff] %vm676_vm1, %v4484_v31 }
  0x38   :  { %1456 = vst.msk [vmem:[#allocation2 + $0x378] sm:$0x3] %vm1345_vm2, %v4484_v31  ;;  %1458 = vst.msk [vmem:[#allocation2 + $0x388] sm:$0x3] %vm1345_vm2, %v4484_v31 }
  0x39   :  { %1459 = vst.msk [vmem:[#allocation2 + $0x390] sm:$0xff] %vm676_vm1, %v4484_v31  ;;  %1461 = vst.msk [vmem:[#allocation2 + $0x3a0] sm:$0xff] %vm676_vm1, %v4484_v31 }
  0x3a   :  { %1460 = vst.msk [vmem:[#allocation2 + $0x398] sm:$0x3] %vm1345_vm2, %v4484_v31  ;;  %1462 = vst.msk [vmem:[#allocation2 + $0x3a8] sm:$0x3] %vm1345_vm2, %v4484_v31 }
  0x3b   :  { %1463 = vst.msk [vmem:[#allocation2 + $0x3b0] sm:$0xff] %vm676_vm1, %v4484_v31  ;;  %1465 = vst.msk [vmem:[#allocation2 + $0x3c0] sm:$0xff] %vm676_vm1, %v4484_v31 }
  0x3c   :  { %1464 = vst.msk [vmem:[#allocation2 + $0x3b8] sm:$0x3] %vm1345_vm2, %v4484_v31  ;;  %1466 = vst.msk [vmem:[#allocation2 + $0x3c8] sm:$0x3] %vm1345_vm2, %v4484_v31 }
  0x3d   :  { %1467 = vst.msk [vmem:[#allocation2 + $0x3d0] sm:$0xff] %vm676_vm1, %v4484_v31  ;;  %1469 = vst.msk [vmem:[#allocation2 + $0x3e0] sm:$0xff] %vm676_vm1, %v4484_v31 }
  0x3e   :  { %3816 = vmatmul.mubr.msk.bf16.gmra.mxu0 %vm288_vm0, %v4445_v24  ;;  %1468 = vst.msk [vmem:[#allocation2 + $0x3d8] sm:$0x3] %vm1345_vm2, %v4484_v31  ;;  %1470 = vst.msk [vmem:[#allocation2 + $0x3e8] sm:$0x3] %vm1345_vm2, %v4484_v31 }
  0x3f   :  { %3819 = vmatprep.mubr.msk.bf16.mxu0 %vm288_vm0, %v4446_v25  ;;  %1471 = vst.msk [vmem:[#allocation2 + $0x3f0] sm:$0xff] %vm676_vm1, %v4484_v31  ;;  %1473 = vst.msk [vmem:[#allocation2 + $0x400] sm:$0xff] %vm676_vm1, %v4484_v31 }
  0x40   :  { %1472 = vst.msk [vmem:[#allocation2 + $0x3f8] sm:$0x3] %vm1345_vm2, %v4484_v31  ;;  %1474 = vst.msk [vmem:[#allocation2 + $0x408] sm:$0x3] %vm1345_vm2, %v4484_v31 }
  0x41   :  { %1475 = vst.msk [vmem:[#allocation2 + $0x410] sm:$0xff] %vm676_vm1, %v4484_v31  ;;  %1477 = vst.msk [vmem:[#allocation2 + $0x420] sm:$0xff] %vm676_vm1, %v4484_v31 }
  0x42   :  { %1476 = vst.msk [vmem:[#allocation2 + $0x418] sm:$0x3] %vm1345_vm2, %v4484_v31  ;;  %1478 = vst.msk [vmem:[#allocation2 + $0x428] sm:$0x3] %vm1345_vm2, %v4484_v31 }
  0x43   :  { %1479 = vst.msk [vmem:[#allocation2 + $0x430] sm:$0xff] %vm676_vm1, %v4484_v31  ;;  %1481 = vst.msk [vmem:[#allocation2 + $0x440] sm:$0xff] %vm676_vm1, %v4484_v31 }
  0x44   :  { %1480 = vst.msk [vmem:[#allocation2 + $0x438] sm:$0x3] %vm1345_vm2, %v4484_v31  ;;  %1482 = vst.msk [vmem:[#allocation2 + $0x448] sm:$0x3] %vm1345_vm2, %v4484_v31 }
  0x45   :  { %1485 = vst.msk [vmem:[#allocation2 + $0x460] sm:$0xff] %vm676_vm1, %v4484_v31  ;;  %1487 = vst.msk [vmem:[#allocation2 + $0x470] sm:$0xff] %vm676_vm1, %v4484_v31 }
  0x46   :  { %3820 = vmatmul.mubr.msk.bf16.gmra.mxu0 %vm288_vm0, %v4447_v26  ;;  %1486 = vst.msk [vmem:[#allocation2 + $0x468] sm:$0x3] %vm1345_vm2, %v4484_v31  ;;  %1488 = vst.msk [vmem:[#allocation2 + $0x478] sm:$0x3] %vm1345_vm2, %v4484_v31 }
  0x47   :  { %3823 = vmatprep.mubr.msk.bf16.mxu0 %vm288_vm0, %v4448_v27  ;;  %1489 = vst.msk [vmem:[#allocation2 + $0x480] sm:$0xff] %vm676_vm1, %v4484_v31  ;;  %1491 = vst.msk [vmem:[#allocation2 + $0x490] sm:$0xff] %vm676_vm1, %v4484_v31 }
  0x48   :  { %1490 = vst.msk [vmem:[#allocation2 + $0x488] sm:$0x3] %vm1345_vm2, %v4484_v31  ;;  %1492 = vst.msk [vmem:[#allocation2 + $0x498] sm:$0x3] %vm1345_vm2, %v4484_v31 }
  0x49   :  { %1493 = vst.msk [vmem:[#allocation2 + $0x4a0] sm:$0xff] %vm676_vm1, %v4484_v31  ;;  %1495 = vst.msk [vmem:[#allocation2 + $0x4b0] sm:$0xff] %vm676_vm1, %v4484_v31 }
  0x4a   :  { %1494 = vst.msk [vmem:[#allocation2 + $0x4a8] sm:$0x3] %vm1345_vm2, %v4484_v31  ;;  %1496 = vst.msk [vmem:[#allocation2 + $0x4b8] sm:$0x3] %vm1345_vm2, %v4484_v31 }
  0x4b   :  { %1497 = vst.msk [vmem:[#allocation2 + $0x4c0] sm:$0xff] %vm676_vm1, %v4484_v31  ;;  %1499 = vst.msk [vmem:[#allocation2 + $0x4d0] sm:$0xff] %vm676_vm1, %v4484_v31 }
  0x4c   :  { %1498 = vst.msk [vmem:[#allocation2 + $0x4c8] sm:$0x3] %vm1345_vm2, %v4484_v31  ;;  %1500 = vst.msk [vmem:[#allocation2 + $0x4d8] sm:$0x3] %vm1345_vm2, %v4484_v31 }
  0x4d   :  { %1501 = vst.msk [vmem:[#allocation2 + $0x4e0] sm:$0xff] %vm676_vm1, %v4484_v31 }
  0x4e   :  { %3824 = vmatmul.mubr.msk.bf16.gmra.mxu0 %vm288_vm0, %v4449_v28  ;;  %1502 = vst.msk [vmem:[#allocation2 + $0x4e8] sm:$0x3] %vm1345_vm2, %v4484_v31 }
  0x4f   :  { %3827 = vmatprep.mubr.msk.bf16.mxu0 %vm288_vm0, %v4450_v29 }
  0x56   :  { %3828 = vmatmul.mubr.msk.bf16.gmra.mxu0 %vm288_vm0, %v4662_v30 }
  0x57   :  { %3831 = vmatprep.mubr.msk.bf16.mxu0 %vm288_vm0, %v4452_v32 }
  0x5e   :  { %3832 = vmatmul.mubr.msk.bf16.gmra.mxu0 %vm288_vm0, %v4453_v33 }
  0x5f   :  { %3835 = vmatprep.mubr.msk.bf16.mxu0 %vm288_vm0, %v4454_v34 }
  0x66   :  { %3836 = vmatmul.mubr.msk.bf16.gmra.mxu0 %vm288_vm0, %v4455_v35 }
  0xce   :  { %v3793_v36 = vpop.f32.mrf.mxu0 }
  0xcf   :  { %v4979_v42 = vadd.f32 %v3793_v36, %v4973_v38 }
  0xd0   :  { %v419_v37 = vpop.f32.mrf.mxu0 }
  0xd1   :  { %v4976_v40 = vadd.f32 %v4973_v38, %v419_v37  ;;  %v680_v50 = vsel %vm676_vm1, %v4979_v42, 0.0 }
  0xd2   :  { %v3794_v39 = vpop.f32.mrf.mxu0 }
  0xd3   :  { %v677_v45 = vsel %vm676_vm1, %v4976_v40, 0.0  ;;  %v4987_v46 = vadd.f32 %v3794_v39, %v4973_v38 }
  0xd4   :  { %v422_v41 = vpop.f32.mrf.mxu0 }
  0xd5   :  { %v4982_v43 = vadd.f32 %v4973_v38, %v422_v41  ;;  %v682_v54 = vsel %vm676_vm1, %v4987_v46, 0.0 }
  0xd6   :  { %v3797_v44 = vpop.f32.mrf.mxu0 }
  0xd7   :  { %v678_v47 = vsel %vm676_vm1, %v4982_v43, 0.0  ;;  %v4999_v57 = vadd.f32 %v3797_v44, %v4973_v38 }
  0xd8   :  { %v679_v48 = vadd.f32 %v678_v47, %v677_v45  ;;  %v435_v49 = vpop.f32.mrf.mxu0 }
  0xd9   :  { %v4994_v51 = vadd.f32 %v4973_v38, %v435_v49  ;;  %v688_v2 = vsel %vm676_vm1, %v4999_v57, 0.0 }
  0xda   :  { %v681_v52 = vadd.f32 %v680_v50, %v679_v48  ;;  %v3798_v53 = vpop.f32.mrf.mxu0 }
  0xdb   :  { %v684_v58 = vsel %vm676_vm1, %v4994_v51, 0.0  ;;  %v5007_v62 = vadd.f32 %v3798_v53, %v4973_v38 }
  0xdc   :  { %v683_v55 = vadd.f32 %v682_v54, %v681_v52  ;;  %v438_v56 = vpop.f32.mrf.mxu0 }
  0xdd   :  { %v5004_v59 = vadd.f32 %v4973_v38, %v438_v56  ;;  %v690_v6 = vsel %vm676_vm1, %v5007_v62, 0.0 }
  0xde   :  { %v685_v60 = vadd.f32 %v684_v58, %v683_v55  ;;  %v3801_v61 = vpop.f32.mrf.mxu0 }
  0xdf   :  { %v686_v63 = vsel %vm676_vm1, %v5004_v59, 0.0  ;;  %v5019_v9 = vadd.f32 %v3801_v61, %v4973_v38 }
  0xe0   :  { %v687_v0 = vadd.f32 %v686_v63, %v685_v60  ;;  %v451_v1 = vpop.f32.mrf.mxu0 }
  0xe1   :  { %v5014_v3 = vadd.f32 %v4973_v38, %v451_v1  ;;  %v696_v18 = vsel %vm676_vm1, %v5019_v9, 0.0 }
  0xe2   :  { %v689_v4 = vadd.f32 %v688_v2, %v687_v0  ;;  %v3802_v5 = vpop.f32.mrf.mxu0 }
  0xe3   :  { %v692_v10 = vsel %vm676_vm1, %v5014_v3, 0.0  ;;  %v5027_v14 = vadd.f32 %v3802_v5, %v4973_v38 }
  0xe4   :  { %v691_v7 = vadd.f32 %v690_v6, %v689_v4  ;;  %v454_v8 = vpop.f32.mrf.mxu0 }
  0xe5   :  { %v5024_v11 = vadd.f32 %v4973_v38, %v454_v8  ;;  %v698_v22 = vsel %vm676_vm1, %v5027_v14, 0.0 }
  0xe6   :  { %v693_v12 = vadd.f32 %v692_v10, %v691_v7  ;;  %v3805_v13 = vpop.f32.mrf.mxu0 }
  0xe7   :  { %v694_v15 = vsel %vm676_vm1, %v5024_v11, 0.0  ;;  %v5039_v25 = vadd.f32 %v3805_v13, %v4973_v38 }
  0xe8   :  { %v695_v16 = vadd.f32 %v694_v15, %v693_v12  ;;  %v467_v17 = vpop.f32.mrf.mxu0 }
  0xe9   :  { %v5034_v19 = vadd.f32 %v4973_v38, %v467_v17  ;;  %v704_v34 = vsel %vm676_vm1, %v5039_v25, 0.0 }
  0xea   :  { %v697_v20 = vadd.f32 %v696_v18, %v695_v16  ;;  %v3806_v21 = vpop.f32.mrf.mxu0 }
  0xeb   :  { %v700_v26 = vsel %vm676_vm1, %v5034_v19, 0.0  ;;  %v5047_v30 = vadd.f32 %v3806_v21, %v4973_v38 }
  0xec   :  { %v699_v23 = vadd.f32 %v698_v22, %v697_v20  ;;  %v470_v24 = vpop.f32.mrf.mxu0 }
  0xed   :  { %v5044_v27 = vadd.f32 %v4973_v38, %v470_v24  ;;  %v706_v39 = vsel %vm676_vm1, %v5047_v30, 0.0 }
  0xee   :  { %v701_v28 = vadd.f32 %v700_v26, %v699_v23  ;;  %v3809_v29 = vpop.f32.mrf.mxu0 }
  0xef   :  { %v702_v31 = vsel %vm676_vm1, %v5044_v27, 0.0  ;;  %v5059_v45 = vadd.f32 %v3809_v29, %v4973_v38 }
  0xf0   :  { %v703_v32 = vadd.f32 %v702_v31, %v701_v28  ;;  %v483_v33 = vpop.f32.mrf.mxu0 }
  0xf1   :  { %v5054_v35 = vadd.f32 %v4973_v38, %v483_v33  ;;  %v712_v56 = vsel %vm676_vm1, %v5059_v45, 0.0 }
  0xf2   :  { %v705_v36 = vadd.f32 %v704_v34, %v703_v32  ;;  %v3810_v37 = vpop.f32.mrf.mxu0 }
  0xf3   :  { %v708_v47 = vsel %vm676_vm1, %v5054_v35, 0.0  ;;  %v5067_v52 = vadd.f32 %v3810_v37, %v4973_v38 }
  0xf4   :  { %v707_v41 = vadd.f32 %v706_v39, %v705_v36  ;;  %v486_v44 = vpop.f32.mrf.mxu0 }
  0xf5   :  { %v5064_v48 = vadd.f32 %v4973_v38, %v486_v44  ;;  %v714_v63 = vsel %vm676_vm1, %v5067_v52, 0.0 }
  0xf6   :  { %v709_v49 = vadd.f32 %v708_v47, %v707_v41  ;;  %v3813_v50 = vpop.f32.mrf.mxu0 }
  0xf7   :  { %v710_v53 = vsel %vm676_vm1, %v5064_v48, 0.0  ;;  %v5079_v2 = vadd.f32 %v3813_v50, %v4973_v38  ;;  %v5118_v50 = vpop.f32.mrf.mxu1 }
  0xf8   :  { %v711_v54 = vadd.f32 %v710_v53, %v709_v49  ;;  %v499_v55 = vpop.f32.mrf.mxu0 }
  0xf9   :  { %v5074_v58 = vadd.f32 %v4973_v38, %v499_v55  ;;  %v720_v15 = vsel %vm676_vm1, %v5079_v2, 0.0 }
  0xfa   :  { %v713_v60 = vadd.f32 %v712_v56, %v711_v54  ;;  %v3814_v61 = vpop.f32.mrf.mxu0 }
  0xfb   :  { %v716_v4 = vsel %vm676_vm1, %v5074_v58, 0.0  ;;  %v5087_v8 = vadd.f32 %v3814_v61, %v4973_v38 }
  0xfc   :  { %v715_v0 = vadd.f32 %v714_v63, %v713_v60  ;;  %v502_v1 = vpop.f32.mrf.mxu0 }
  0xfd   :  { %v5084_v5 = vadd.f32 %v4973_v38, %v502_v1  ;;  %v722_v20 = vsel %vm676_vm1, %v5087_v8, 0.0 }
  0xfe   :  { %v717_v6 = vadd.f32 %v716_v4, %v715_v0  ;;  %v3817_v7 = vpop.f32.mrf.mxu0  ;;  %v5133_v4 = vpop.f32.mrf.mxu1 }
  0xff   :  { %v718_v10 = vsel %vm676_vm1, %v5084_v5, 0.0  ;;  %v5099_v23 = vadd.f32 %v3817_v7, %v4973_v38 }
 0x100   :  { %v719_v12 = vadd.f32 %v718_v10, %v717_v6  ;;  %v515_v13 = vpop.f32.mrf.mxu0 }
 0x101   :  { %v5094_v16 = vadd.f32 %v4973_v38, %v515_v13  ;;  %v728_v36 = vsel %vm676_vm1, %v5099_v23, 0.0 }
 0x102   :  { %v721_v17 = vadd.f32 %v720_v15, %v719_v12  ;;  %v3818_v18 = vpop.f32.mrf.mxu0 }
 0x103   :  { %v724_v24 = vsel %vm676_vm1, %v5094_v16, 0.0  ;;  %v5107_v31 = vadd.f32 %v3818_v18, %v4973_v38  ;;  %v5142_v18 = vpop.f32.mrf.mxu1 }
 0x104   :  { %v723_v21 = vadd.f32 %v722_v20, %v721_v17  ;;  %v518_v22 = vpop.f32.mrf.mxu0 }
 0x105   :  { %v5104_v26 = vadd.f32 %v4973_v38, %v518_v22  ;;  %v730_v44 = vsel %vm676_vm1, %v5107_v31, 0.0 }
 0x106   :  { %v725_v28 = vadd.f32 %v724_v24, %v723_v21  ;;  %v3821_v29 = vpop.f32.mrf.mxu0 }
 0x107   :  { %v726_v32 = vsel %vm676_vm1, %v5104_v26, 0.0  ;;  %v5121_v53 = vadd.f32 %v3821_v29, %v4973_v38 }
 0x108   :  { %v727_v33 = vadd.f32 %v726_v32, %v725_v28  ;;  %v531_v34 = vpop.f32.mrf.mxu0 }
 0x109   :  { %v5114_v37 = vadd.f32 %v4973_v38, %v531_v34  ;;  %v736_v6 = vsel %vm676_vm1, %v5121_v53, 0.0 }
 0x10a   :  { %v729_v39 = vadd.f32 %v728_v36, %v727_v33  ;;  %v3822_v41 = vpop.f32.mrf.mxu0  ;;  %v614_v36 = vpop.f32.mrf.mxu1 }
 0x10b   :  { %v732_v54 = vsel %vm676_vm1, %v5114_v37, 0.0  ;;  %v5129_v61 = vadd.f32 %v3822_v41, %v4973_v38 }
 0x10c   :  { %v731_v47 = vadd.f32 %v730_v44, %v729_v39  ;;  %v534_v49 = vpop.f32.mrf.mxu0 }
 0x10d   :  { %v5126_v55 = vadd.f32 %v4973_v38, %v534_v49  ;;  %v738_v13 = vsel %vm676_vm1, %v5129_v61, 0.0 }
 0x10e   :  { %v733_v56 = vadd.f32 %v732_v54, %v731_v47  ;;  %v3825_v60 = vpop.f32.mrf.mxu0 }
 0x10f   :  { %v734_v63 = vsel %vm676_vm1, %v5126_v55, 0.0  ;;  %v5145_v20 = vadd.f32 %v3825_v60, %v4973_v38  ;;  %v5164_v60 = vpop.f32.mrf.mxu1 }
 0x110   :  { %v735_v0 = vadd.f32 %v734_v63, %v733_v56  ;;  %v547_v1 = vpop.f32.mrf.mxu0 }
 0x111   :  { %v5138_v7 = vadd.f32 %v4973_v38, %v547_v1  ;;  %v744_v39 = vsel %vm676_vm1, %v5145_v20, 0.0 }
 0x112   :  { %v737_v10 = vadd.f32 %v736_v6, %v735_v0  ;;  %v3826_v12 = vpop.f32.mrf.mxu0 }
 0x113   :  { %v740_v21 = vsel %vm676_vm1, %v5138_v7, 0.0  ;;  %v5153_v29 = vadd.f32 %v3826_v12, %v4973_v38 }
 0x114   :  { %v739_v15 = vadd.f32 %v738_v13, %v737_v10  ;;  %v550_v17 = vpop.f32.mrf.mxu0 }
 0x115   :  { %v5150_v22 = vadd.f32 %v4973_v38, %v550_v17  ;;  %v746_v49 = vsel %vm676_vm1, %v5153_v29, 0.0 }
 0x116   :  { %v741_v24 = vadd.f32 %v740_v21, %v739_v15  ;;  %v3829_v28 = vpop.f32.mrf.mxu0  ;;  %v627_v21 = vpop.f32.mrf.mxu1 }
 0x117   :  { %v742_v32 = vsel %vm676_vm1, %v5150_v22, 0.0  ;;  %v5167_v63 = vadd.f32 %v3829_v28, %v4973_v38 }
 0x118   :  { %v743_v33 = vadd.f32 %v742_v32, %v741_v24  ;;  %v563_v34 = vpop.f32.mrf.mxu0 }
 0x119   :  { %v5160_v41 = vadd.f32 %v4973_v38, %v563_v34  ;;  %7702 = vst [vmem:[#allocation3_spill] sm:$0xff] %v5167_v63  ;;  %v752_v24 = vsel %vm676_vm1, %v5167_v63, 0.0 }
 0x11a   :  { %v745_v44 = vadd.f32 %v744_v39, %v743_v33  ;;  %v3830_v47 = vpop.f32.mrf.mxu0 }
 0x11b   :  { %v748_v0 = vsel %vm676_vm1, %v5160_v41, 0.0  ;;  %v5175_v12 = vadd.f32 %v3830_v47, %v4973_v38  ;;  %v3846_v47 = vpop.f32.mrf.mxu1 }
 0x11c   :  { %v747_v54 = vadd.f32 %v746_v49, %v745_v44  ;;  %v566_v56 = vpop.f32.mrf.mxu0 }
 0x11d   :  { %v5172_v1 = vadd.f32 %v4973_v38, %v566_v56  ;;  %7703 = vst [vmem:[#allocation4_spill] sm:$0xff] %v5175_v12  ;;  %v754_v34 = vsel %vm676_vm1, %v5175_v12, 0.0 }
 0x11e   :  { %v749_v6 = vadd.f32 %v748_v0, %v747_v54  ;;  %v3833_v10 = vpop.f32.mrf.mxu0 }
 0x11f   :  { %v750_v13 = vsel %vm676_vm1, %v5172_v1, 0.0  ;;  %v5187_v49 = vadd.f32 %v3833_v10, %v4973_v38 }
 0x120   :  { %v751_v15 = vadd.f32 %v750_v13, %v749_v6  ;;  %v579_v17 = vpop.f32.mrf.mxu0 }
 0x121   :  { %v5182_v28 = vadd.f32 %v4973_v38, %v579_v17  ;;  %7705 = vst [vmem:[#allocation6_spill] sm:$0xff] %v5187_v49  ;;  %v760_v10 = vsel %vm676_vm1, %v5187_v49, 0.0 }
 0x122   :  { %v753_v32 = vadd.f32 %v752_v24, %v751_v15  ;;  %v3834_v33 = vpop.f32.mrf.mxu0 }
 0x123   :  { %7704 = vst [vmem:[#allocation5_spill] sm:$0xff] %v5182_v28  ;;  %v756_v54 = vsel %vm676_vm1, %v5182_v28, 0.0  ;;  %v5195_v13 = vadd.f32 %v3834_v33, %v4973_v38 }
 0x124   :  { %v755_v39 = vadd.f32 %v754_v34, %v753_v32  ;;  %v582_v44 = vpop.f32.mrf.mxu0  ;;  %v630_v32 = vpop.f32.mrf.mxu1 }
 0x125   :  { %v5192_v56 = vadd.f32 %v4973_v38, %v582_v44 }
 0x126   :  { %v757_v0 = vadd.f32 %v756_v54, %v755_v39  ;;  %v3837_v6 = vpop.f32.mrf.mxu0  ;;  %v762_v39 = vsel %vm676_vm1, %v5195_v13, 0.0  ;;  %v3849_v12 = vpop.f32.mrf.mxu1 }
 0x127   :  { %v758_v15 = vsel %vm676_vm1, %v5192_v56, 0.0  ;;  %v5207_v63 = vadd.f32 %v3837_v6, %v4973_v38  ;;  %v5223_v6 = vadd.f32 %v4973_v38, %v5133_v4  ;;  %v5238_v4 = vadd.f32 %v5142_v18, %v4973_v38 }
 0x128   :  { %v759_v17 = vadd.f32 %v758_v15, %v757_v0  ;;  %v595_v24 = vpop.f32.mrf.mxu0 }
 0x129   :  { %v5202_v34 = vadd.f32 %v4973_v38, %v595_v24  ;;  %7707 = vst [vmem:[#allocation8_spill] sm:$0xff] %v5207_v63  ;;  %7708 = vst [vmem:[#allocation9_spill] sm:$0xff] %v5223_v6 }
 0x12a   :  { %v761_v28 = vadd.f32 %v760_v10, %v759_v17  ;;  %v3838_v44 = vpop.f32.mrf.mxu0  ;;  %7710 = vst [vmem:[#allocation11_spill] sm:$0xff] %v5238_v4 }
 0x12b   :  { %7706 = vst [vmem:[#allocation7_spill] sm:$0xff] %v5202_v34  ;;  %v764_v0 = vsel %vm676_vm1, %v5202_v34, 0.0  ;;  %v5215_v24 = vadd.f32 %v3838_v44, %v4973_v38 }
 0x12c   :  { %v763_v54 = vadd.f32 %v762_v39, %v761_v28  ;;  %v598_v33 = vpop.f32.mrf.mxu0  ;;  %v643_v28 = vpop.f32.mrf.mxu1  ;;  %v768_v39 = vsel %vm676_vm1, %v5207_v63, 0.0 }
 0x12d   :  { %v5212_v15 = vadd.f32 %v4973_v38, %v598_v33  ;;  %v770_v33 = vsel %vm676_vm1, %v5215_v24, 0.0 }
 0x12e   :  { %v765_v49 = vadd.f32 %v764_v0, %v763_v54  ;;  %v5228_v54 = vadd.f32 %v4973_v38, %v614_v36  ;;  %v3850_v0 = vpop.f32.mrf.mxu1 }
 0x12f   :  { %v766_v17 = vsel %vm676_vm1, %v5212_v15, 0.0 }
 0x130   :  { %v767_v10 = vadd.f32 %v766_v17, %v765_v49  ;;  %7709 = vst [vmem:[#allocation10_spill] sm:$0xff] %v5228_v54  ;;  %v5232_v49 = vadd.f32 %v5118_v50, %v4973_v38  ;;  %v772_v17 = vsel %vm676_vm1, %v5223_v6, 0.0  ;;  %v646_v36 = vpop.f32.mrf.mxu1  ;;  %v778_v6 = vsel %vm676_vm1, %v5238_v4, 0.0 }
 0x132   :  { %v769_v34 = vadd.f32 %v768_v39, %v767_v10  ;;  %v774_v10 = vsel %vm676_vm1, %v5228_v54, 0.0  ;;  %v5254_v54 = vadd.f32 %v5164_v60, %v4973_v38 }
 0x134   :  { %v771_v44 = vadd.f32 %v770_v33, %v769_v34  ;;  %v776_v34 = vsel %vm676_vm1, %v5232_v49, 0.0  ;;  %v5245_v33 = vadd.f32 %v4973_v38, %v627_v21  ;;  %7712 = vst [vmem:[#allocation13_spill] sm:$0xff] %v5254_v54  ;;  %v5259_v21 = vadd.f32 %v3846_v47, %v4973_v38 }
 0x136   :  { %v773_v63 = vadd.f32 %v772_v17, %v771_v44  ;;  %7711 = vst [vmem:[#allocation12_spill] sm:$0xff] %v5245_v33  ;;  %v5250_v44 = vadd.f32 %v4973_v38, %v630_v32  ;;  %v3853_v17 = vpop.f32.mrf.mxu1  ;;  %v784_v32 = vsel %vm676_vm1, %v5254_v54, 0.0  ;;  %v5279_v54 = vadd.f32 %v3850_v0, %v4973_v38 }
 0x138   :  { %v775_v39 = vadd.f32 %v774_v10, %v773_v63  ;;  %v780_v63 = vsel %vm676_vm1, %v5245_v33, 0.0  ;;  %v659_v4 = vpop.f32.mrf.mxu1  ;;  %v5274_v33 = vadd.f32 %v3849_v12, %v4973_v38  ;;  %7715 = vst [vmem:[#allocation16_spill] sm:$0xff] %v5279_v54 }
 0x13a   :  { %v777_v50 = vadd.f32 %v776_v34, %v775_v39  ;;  %v782_v39 = vsel %vm676_vm1, %v5250_v44, 0.0  ;;  %7714 = vst [vmem:[#allocation15_spill] sm:$0xff] %v5274_v33 }
 0x13c   :  { %v779_v18 = vadd.f32 %v778_v6, %v777_v50  ;;  %v5266_v6 = vadd.f32 %v4973_v38, %v643_v28  ;;  %v786_v50 = vsel %vm676_vm1, %v5259_v21, 0.0 }
 0x13e   :  { %v781_v10 = vadd.f32 %v780_v63, %v779_v18  ;;  %v5271_v18 = vadd.f32 %v4973_v38, %v646_v36  ;;  %v3854_v63 = vpop.f32.mrf.mxu1  ;;  %v792_v36 = vsel %vm676_vm1, %v5274_v33, 0.0 }
 0x13f   :  { %v5299_v33 = vadd.f32 %v3854_v63, %v4973_v38 }
 0x140   :  { %v783_v34 = vadd.f32 %v782_v39, %v781_v10  ;;  %7713 = vst [vmem:[#allocation14_spill] sm:$0xff] %v5271_v18  ;;  %v788_v10 = vsel %vm676_vm1, %v5266_v6, 0.0  ;;  %v790_v28 = vsel %vm676_vm1, %v5271_v18, 0.0 }
 0x142   :  { %v785_v60 = vadd.f32 %v784_v32, %v783_v34  ;;  %v662_v32 = vpop.f32.mrf.mxu1 }
 0x144   :  { %v787_v47 = vadd.f32 %v786_v50, %v785_v60  ;;  %v5286_v60 = vadd.f32 %v4973_v38, %v659_v4  ;;  %v794_v50 = vsel %vm676_vm1, %v5279_v54, 0.0 }
 0x146   :  { %v789_v39 = vadd.f32 %v788_v10, %v787_v47  ;;  %7716 = vst [vmem:[#allocation17_spill] sm:$0xff] %v5286_v60  ;;  %v5291_v47 = vadd.f32 %v4973_v38, %v662_v32  ;;  %v5294_v10 = vadd.f32 %v3853_v17, %v4973_v38 }
 0x148   :  { %v791_v34 = vadd.f32 %v790_v28, %v789_v39  ;;  %v796_v39 = vsel %vm676_vm1, %v5286_v60, 0.0  ;;  %v798_v4 = vsel %vm676_vm1, %v5291_v47, 0.0 }
 0x14a   :  { %v793_v12 = vadd.f32 %v792_v36, %v791_v34  ;;  %v800_v36 = vsel %vm676_vm1, %v5294_v10, 0.0 }
 0x14c   :  { %v795_v0 = vadd.f32 %v794_v50, %v793_v12  ;;  %v802_v12 = vsel %vm676_vm1, %v5299_v33, 0.0 }
 0x14e   :  { %v797_v28 = vadd.f32 %v796_v39, %v795_v0 }
 0x150   :  { %v799_v34 = vadd.f32 %v798_v4, %v797_v28 }
 0x152   :  { %v801_v32 = vadd.f32 %v800_v36, %v799_v34 }
 0x154   :  { %v803_v17 = vadd.f32 %v802_v12, %v801_v32 }
 0x156   :  { %v804_v50 = vrot.slane %v803_v17, 4 }
 0x158   :  { %v805_v54 = vadd.f32 %v804_v50, %v803_v17 }
 0x15a   :  { %v806_v18 = vrot.slane %v805_v54, 2 }
 0x15c   :  { %v807_v60 = vadd.f32 %v806_v18, %v805_v54 }
 0x15e   :  { %v808_v0 = vrot.slane %v807_v60, 1 }
 0x160   :  { %v809_v39 = vadd.f32 %v808_v0, %v807_v60 }
 0x162   :  { %v5307_v38 = vmul.f32 0.001953125, %v809_v39 }
 0x164   :  { %v5311_v63 = vsub.f32 %v5212_v15, %v5307_v38  ;;  %v5315_v28 = vsub.f32 %v4976_v40, %v5307_v38  ;;  %v5319_v4 = vsub.f32 %v4982_v43, %v5307_v38  ;;  %v5323_v34 = vsub.f32 %v4979_v42, %v5307_v38 }
 0x165   :  { %v5327_v54 = vsub.f32 %v4987_v46, %v5307_v38  ;;  %v5335_v40 = vsub.f32 %v4994_v51, %v5307_v38  ;;  %v5341_v42 = vsub.f32 %v5004_v59, %v5307_v38  ;;  %v5349_v12 = vsub.f32 %v4999_v57, %v5307_v38 }
 0x166   :  { %7717 = vst [vmem:[#allocation18_spill] sm:$0xff] %v5311_v63  ;;  %v876_v15 = vmul.f32 %v5315_v28, %v5315_v28  ;;  %v877_v18 = vmul.f32 %v5319_v4, %v5319_v4  ;;  %v878_v43 = vmul.f32 %v5323_v34, %v5323_v34  ;;  %v5356_v59 = vsub.f32 %v5007_v62, %v5307_v38 }
 0x167   :  { %v879_v46 = vmul.f32 %v5327_v54, %v5327_v54  ;;  %v880_v51 = vmul.f32 %v5335_v40, %v5335_v40  ;;  %v881_v0 = vmul.f32 %v5341_v42, %v5341_v42  ;;  %v5363_v57 = vsub.f32 %v5014_v3, %v5307_v38 }
 0x168   :  { %v940_v60 = vsel %vm676_vm1, %v876_v15, 0.0  ;;  %v941_v36 = vsel %vm676_vm1, %v877_v18, 0.0  ;;  %v943_v17 = vsel %vm676_vm1, %v878_v43, 0.0  ;;  %v882_v18 = vmul.f32 %v5349_v12, %v5349_v12 }
 0x169   :  { %v942_v32 = vadd.f32 %v941_v36, %v940_v60  ;;  %v945_v39 = vsel %vm676_vm1, %v879_v46, 0.0  ;;  %v947_v43 = vsel %vm676_vm1, %v880_v51, 0.0  ;;  %v5370_v62 = vsub.f32 %v5024_v11, %v5307_v38 }
 0x16a   :  { %v883_v36 = vmul.f32 %v5356_v59, %v5356_v59  ;;  %v949_v46 = vsel %vm676_vm1, %v881_v0, 0.0  ;;  %v5377_v3 = vsub.f32 %v5019_v9, %v5307_v38  ;;  %v951_v51 = vsel %vm676_vm1, %v882_v18, 0.0 }
 0x16b   :  { %v944_v50 = vadd.f32 %v943_v17, %v942_v32  ;;  %v884_v17 = vmul.f32 %v5363_v57, %v5363_v57  ;;  %v5384_v11 = vsub.f32 %v5027_v14, %v5307_v38  ;;  %v5391_v9 = vsub.f32 %v5034_v19, %v5307_v38 }
 0x16c   :  { %v953_v0 = vsel %vm676_vm1, %v883_v36, 0.0  ;;  %v5398_v14 = vsub.f32 %v5044_v27, %v5307_v38  ;;  %v5405_v19 = vsub.f32 %v5039_v25, %v5307_v38  ;;  %v5412_v27 = vsub.f32 %v5047_v30, %v5307_v38 }
 0x16d   :  { %v946_v15 = vadd.f32 %v945_v39, %v944_v50  ;;  %v885_v39 = vmul.f32 %v5370_v62, %v5370_v62  ;;  %v955_v18 = vsel %vm676_vm1, %v884_v17, 0.0  ;;  %v5419_v25 = vsub.f32 %v5054_v35, %v5307_v38 }
 0x16e   :  { %v5426_v30 = vsub.f32 %v5064_v48, %v5307_v38  ;;  %v5433_v35 = vsub.f32 %v5059_v45, %v5307_v38  ;;  %v5440_v48 = vsub.f32 %v5067_v52, %v5307_v38  ;;  %v5447_v45 = vsub.f32 %v5074_v58, %v5307_v38 }
 0x16f   :  { %v948_v60 = vadd.f32 %v947_v43, %v946_v15  ;;  %v886_v43 = vmul.f32 %v5377_v3, %v5377_v3  ;;  %v957_v36 = vsel %vm676_vm1, %v885_v39, 0.0  ;;  %v5454_v52 = vsub.f32 %v5084_v5, %v5307_v38 }
 0x170   :  { %v5461_v58 = vsub.f32 %v5079_v2, %v5307_v38  ;;  %v5468_v5 = vsub.f32 %v5087_v8, %v5307_v38  ;;  %v5475_v2 = vsub.f32 %v5094_v16, %v5307_v38  ;;  %v5482_v8 = vsub.f32 %v5104_v26, %v5307_v38 }
 0x171   :  { %v950_v32 = vadd.f32 %v949_v46, %v948_v60  ;;  %v887_v46 = vmul.f32 %v5384_v11, %v5384_v11  ;;  %v959_v17 = vsel %vm676_vm1, %v886_v43, 0.0  ;;  %v5489_v16 = vsub.f32 %v5099_v23, %v5307_v38 }
 0x172   :  { %v5496_v26 = vsub.f32 %v5107_v31, %v5307_v38  ;;  %v5503_v23 = vsub.f32 %v5114_v37, %v5307_v38  ;;  %v5510_v31 = vsub.f32 %v5126_v55, %v5307_v38  ;;  %v5517_v37 = vsub.f32 %v5121_v53, %v5307_v38 }
 0x173   :  { %v952_v50 = vadd.f32 %v951_v51, %v950_v32  ;;  %v888_v51 = vmul.f32 %v5391_v9, %v5391_v9  ;;  %v961_v39 = vsel %vm676_vm1, %v887_v46, 0.0  ;;  %v5524_v55 = vsub.f32 %v5129_v61, %v5307_v38 }
 0x174   :  { %v5531_v53 = vsub.f32 %v5138_v7, %v5307_v38  ;;  %v5538_v61 = vsub.f32 %v5150_v22, %v5307_v38  ;;  %v5545_v7 = vsub.f32 %v5145_v20, %v5307_v38  ;;  %v5552_v22 = vsub.f32 %v5153_v29, %v5307_v38 }
 0x175   :  { %v954_v15 = vadd.f32 %v953_v0, %v952_v50  ;;  %v889_v0 = vmul.f32 %v5398_v14, %v5398_v14  ;;  %v963_v43 = vsel %vm676_vm1, %v888_v51, 0.0  ;;  %v5559_v20 = vsub.f32 %v5160_v41, %v5307_v38 }
 0x176   :  { %v5566_v29 = vsub.f32 %v5172_v1, %v5307_v38 }
 0x177   :  { %v956_v60 = vadd.f32 %v955_v18, %v954_v15  ;;  %v890_v18 = vmul.f32 %v5405_v19, %v5405_v19  ;;  %v965_v46 = vsel %vm676_vm1, %v889_v0, 0.0  ;;  %7718 = vst [vmem:[#allocation19_spill] sm:$0xff] %v5559_v20 }
 0x179   :  { %v958_v32 = vadd.f32 %v957_v36, %v956_v60  ;;  %v891_v36 = vmul.f32 %v5412_v27, %v5412_v27  ;;  %v967_v51 = vsel %vm676_vm1, %v890_v18, 0.0 }
 0x17b   :  { %v960_v50 = vadd.f32 %v959_v17, %v958_v32  ;;  %v892_v17 = vmul.f32 %v5419_v25, %v5419_v25  ;;  %v969_v0 = vsel %vm676_vm1, %v891_v36, 0.0 }
 0x17d   :  { %v962_v15 = vadd.f32 %v961_v39, %v960_v50  ;;  %v893_v39 = vmul.f32 %v5426_v30, %v5426_v30  ;;  %v971_v18 = vsel %vm676_vm1, %v892_v17, 0.0 }
 0x17f   :  { %v964_v60 = vadd.f32 %v963_v43, %v962_v15  ;;  %v894_v43 = vmul.f32 %v5433_v35, %v5433_v35  ;;  %v973_v36 = vsel %vm676_vm1, %v893_v39, 0.0 }
 0x181   :  { %v966_v32 = vadd.f32 %v965_v46, %v964_v60  ;;  %v895_v46 = vmul.f32 %v5440_v48, %v5440_v48  ;;  %v975_v17 = vsel %vm676_vm1, %v894_v43, 0.0 }
 0x183   :  { %v968_v50 = vadd.f32 %v967_v51, %v966_v32  ;;  %v896_v51 = vmul.f32 %v5447_v45, %v5447_v45  ;;  %v977_v39 = vsel %vm676_vm1, %v895_v46, 0.0 }
 0x185   :  { %v970_v15 = vadd.f32 %v969_v0, %v968_v50  ;;  %v897_v0 = vmul.f32 %v5454_v52, %v5454_v52  ;;  %v979_v43 = vsel %vm676_vm1, %v896_v51, 0.0 }
 0x187   :  { %v972_v60 = vadd.f32 %v971_v18, %v970_v15  ;;  %v898_v18 = vmul.f32 %v5461_v58, %v5461_v58  ;;  %v981_v46 = vsel %vm676_vm1, %v897_v0, 0.0 }
 0x189   :  { %v974_v32 = vadd.f32 %v973_v36, %v972_v60  ;;  %v899_v36 = vmul.f32 %v5468_v5, %v5468_v5  ;;  %v983_v51 = vsel %vm676_vm1, %v898_v18, 0.0 }
 0x18b   :  { %v976_v50 = vadd.f32 %v975_v17, %v974_v32  ;;  %v900_v17 = vmul.f32 %v5475_v2, %v5475_v2  ;;  %v985_v0 = vsel %vm676_vm1, %v899_v36, 0.0 }
 0x18d   :  { %v978_v15 = vadd.f32 %v977_v39, %v976_v50  ;;  %v901_v39 = vmul.f32 %v5482_v8, %v5482_v8  ;;  %v987_v18 = vsel %vm676_vm1, %v900_v17, 0.0 }
 0x18f   :  { %v980_v60 = vadd.f32 %v979_v43, %v978_v15  ;;  %v902_v43 = vmul.f32 %v5489_v16, %v5489_v16  ;;  %v989_v36 = vsel %vm676_vm1, %v901_v39, 0.0 }
 0x191   :  { %v982_v32 = vadd.f32 %v981_v46, %v980_v60  ;;  %v903_v46 = vmul.f32 %v5496_v26, %v5496_v26  ;;  %v991_v17 = vsel %vm676_vm1, %v902_v43, 0.0 }
 0x193   :  { %v984_v50 = vadd.f32 %v983_v51, %v982_v32  ;;  %v904_v51 = vmul.f32 %v5503_v23, %v5503_v23  ;;  %v993_v39 = vsel %vm676_vm1, %v903_v46, 0.0 }
 0x195   :  { %v986_v15 = vadd.f32 %v985_v0, %v984_v50  ;;  %v905_v0 = vmul.f32 %v5510_v31, %v5510_v31  ;;  %v995_v43 = vsel %vm676_vm1, %v904_v51, 0.0 }
 0x197   :  { %v988_v60 = vadd.f32 %v987_v18, %v986_v15  ;;  %v906_v18 = vmul.f32 %v5517_v37, %v5517_v37  ;;  %v997_v46 = vsel %vm676_vm1, %v905_v0, 0.0 }
 0x199   :  { %v990_v32 = vadd.f32 %v989_v36, %v988_v60  ;;  %v907_v36 = vmul.f32 %v5524_v55, %v5524_v55  ;;  %v999_v51 = vsel %vm676_vm1, %v906_v18, 0.0 }
 0x19b   :  { %v992_v50 = vadd.f32 %v991_v17, %v990_v32  ;;  %v908_v17 = vmul.f32 %v5531_v53, %v5531_v53  ;;  %v1001_v0 = vsel %vm676_vm1, %v907_v36, 0.0 }
 0x19d   :  { %v994_v15 = vadd.f32 %v993_v39, %v992_v50  ;;  %v909_v39 = vmul.f32 %v5538_v61, %v5538_v61  ;;  %v1003_v18 = vsel %vm676_vm1, %v908_v17, 0.0 }
 0x19f   :  { %v996_v60 = vadd.f32 %v995_v43, %v994_v15  ;;  %v910_v43 = vmul.f32 %v5545_v7, %v5545_v7  ;;  %v1005_v36 = vsel %vm676_vm1, %v909_v39, 0.0 }
 0x1a1   :  { %v998_v32 = vadd.f32 %v997_v46, %v996_v60  ;;  %v911_v46 = vmul.f32 %v5552_v22, %v5552_v22  ;;  %v1007_v17 = vsel %vm676_vm1, %v910_v43, 0.0 }
 0x1a3   :  { %v1000_v50 = vadd.f32 %v999_v51, %v998_v32  ;;  %v7719_v51 = vld [vmem:[#allocation3_spill] sm:$0xff]  ;;  %v1009_v39 = vsel %vm676_vm1, %v911_v46, 0.0 }
 0x1a4   :  { %v5573_v41 = vsub.f32 %v7719_v51, %v5307_v38 }
 0x1a5   :  { %v1002_v15 = vadd.f32 %v1001_v0, %v1000_v50  ;;  %v912_v50 = vmul.f32 %v5559_v20, %v5559_v20 }
 0x1a6   :  { %7720 = vst [vmem:[#allocation3_spill] sm:$0xff] %v5573_v41  ;;  %v914_v20 = vmul.f32 %v5573_v41, %v5573_v41 }
 0x1a7   :  { %v1004_v60 = vadd.f32 %v1003_v18, %v1002_v15  ;;  %v7721_v15 = vld [vmem:[#allocation4_spill] sm:$0xff]  ;;  %v913_v18 = vmul.f32 %v5566_v29, %v5566_v29  ;;  %v1011_v43 = vsel %vm676_vm1, %v912_v50, 0.0 }
 0x1a8   :  { %v5580_v1 = vsub.f32 %v7721_v15, %v5307_v38  ;;  %v1015_v50 = vsel %vm676_vm1, %v914_v20, 0.0 }
 0x1a9   :  { %v1006_v32 = vadd.f32 %v1005_v36, %v1004_v60  ;;  %v7723_v36 = vld [vmem:[#allocation5_spill] sm:$0xff]  ;;  %v1013_v46 = vsel %vm676_vm1, %v913_v18, 0.0 }
 0x1aa   :  { %7722 = vst [vmem:[#allocation4_spill] sm:$0xff] %v5580_v1  ;;  %v5587_v51 = vsub.f32 %v7723_v36, %v5307_v38  ;;  %v915_v15 = vmul.f32 %v5580_v1, %v5580_v1 }
 0x1ab   :  { %v1008_v0 = vadd.f32 %v1007_v17, %v1006_v32  ;;  %v5594_v17 = vsub.f32 %v5192_v56, %v5307_v38  ;;  %v5608_v56 = vsub.f32 %v5195_v13, %v5307_v38 }
 0x1ac   :  { %7724 = vst [vmem:[#allocation5_spill] sm:$0xff] %v5587_v51  ;;  %v916_v41 = vmul.f32 %v5587_v51, %v5587_v51  ;;  %v1017_v18 = vsel %vm676_vm1, %v915_v15, 0.0 }
 0x1ad   :  { %v1010_v60 = vadd.f32 %v1009_v39, %v1008_v0  ;;  %7725 = vst [vmem:[#allocation20_spill] sm:$0xff] %v5594_v17  ;;  %v7726_v39 = vld [vmem:[#allocation6_spill] sm:$0xff]  ;;  %v919_v13 = vmul.f32 %v5608_v56, %v5608_v56 }
 0x1ae   :  { %v5601_v36 = vsub.f32 %v7726_v39, %v5307_v38  ;;  %v1019_v20 = vsel %vm676_vm1, %v916_v41, 0.0  ;;  %v5632_v41 = vsub.f32 %v5215_v24, %v5307_v38 }
 0x1af   :  { %v1012_v32 = vadd.f32 %v1011_v43, %v1010_v60  ;;  %v917_v43 = vmul.f32 %v5594_v17, %v5594_v17  ;;  %v7728_v17 = vld [vmem:[#allocation8_spill] sm:$0xff] }
 0x1b0   :  { %v918_v51 = vmul.f32 %v5601_v36, %v5601_v36  ;;  %v5625_v15 = vsub.f32 %v7728_v17, %v5307_v38  ;;  %7729 = vst [vmem:[#allocation6_spill] sm:$0xff] %v5632_v41 }
 0x1b1   :  { %v1014_v0 = vadd.f32 %v1013_v46, %v1012_v32  ;;  %v7727_v46 = vld [vmem:[#allocation7_spill] sm:$0xff] }
 0x1b2   :  { %v5615_v39 = vsub.f32 %v7727_v46, %v5307_v38 }
 0x1b3   :  { %v1016_v60 = vadd.f32 %v1015_v50, %v1014_v0  ;;  %v1021_v50 = vsel %vm676_vm1, %v917_v43, 0.0  ;;  %v1025_v43 = vsel %vm676_vm1, %v919_v13, 0.0 }
 0x1b5   :  { %v1018_v32 = vadd.f32 %v1017_v18, %v1016_v60  ;;  %v920_v60 = vmul.f32 %v5615_v39, %v5615_v39  ;;  %v1023_v18 = vsel %vm676_vm1, %v918_v51, 0.0 }
 0x1b7   :  { %v1020_v0 = vadd.f32 %v1019_v20, %v1018_v32  ;;  %v921_v32 = vmul.f32 %v5311_v63, %v5311_v63  ;;  %v1027_v51 = vsel %vm676_vm1, %v920_v60, 0.0  ;;  %v923_v63 = vmul.f32 %v5632_v41, %v5632_v41 }
 0x1b9   :  { %v1022_v1 = vadd.f32 %v1021_v50, %v1020_v0  ;;  %v7730_v0 = vld [vmem:[#allocation9_spill] sm:$0xff]  ;;  %v922_v50 = vmul.f32 %v5625_v15, %v5625_v15  ;;  %v1029_v13 = vsel %vm676_vm1, %v921_v32, 0.0  ;;  %v1033_v32 = vsel %vm676_vm1, %v923_v63, 0.0 }
 0x1ba   :  { %v5639_v17 = vsub.f32 %v7730_v0, %v5307_v38 }
 0x1bb   :  { %v1024_v46 = vadd.f32 %v1023_v18, %v1022_v1  ;;  %v7732_v18 = vld [vmem:[#allocation10_spill] sm:$0xff]  ;;  %v1031_v60 = vsel %vm676_vm1, %v922_v50, 0.0 }
 0x1bc   :  { %7731 = vst [vmem:[#allocation7_spill] sm:$0xff] %v5639_v17  ;;  %v5646_v24 = vsub.f32 %v7732_v18, %v5307_v38  ;;  %v924_v0 = vmul.f32 %v5639_v17, %v5639_v17 }
 0x1bd   :  { %v1026_v20 = vadd.f32 %v1025_v43, %v1024_v46  ;;  %v5653_v43 = vsub.f32 %v5232_v49, %v5307_v38 }
 0x1be   :  { %v925_v41 = vmul.f32 %v5646_v24, %v5646_v24  ;;  %v1035_v50 = vsel %vm676_vm1, %v924_v0, 0.0 }
 0x1bf   :  { %v1028_v1 = vadd.f32 %v1027_v51, %v1026_v20  ;;  %7733 = vst [vmem:[#allocation8_spill] sm:$0xff] %v5653_v43  ;;  %v7734_v51 = vld [vmem:[#allocation11_spill] sm:$0xff]  ;;  %v926_v17 = vmul.f32 %v5653_v43, %v5653_v43 }
 0x1c0   :  { %v5660_v18 = vsub.f32 %v7734_v51, %v5307_v38  ;;  %v1037_v63 = vsel %vm676_vm1, %v925_v41, 0.0 }
 0x1c1   :  { %v1030_v46 = vadd.f32 %v1029_v13, %v1028_v1  ;;  %v7735_v13 = vld [vmem:[#allocation12_spill] sm:$0xff]  ;;  %v1039_v0 = vsel %vm676_vm1, %v926_v17, 0.0 }
 0x1c2   :  { %v5667_v49 = vsub.f32 %v7735_v13, %v5307_v38  ;;  %v927_v51 = vmul.f32 %v5660_v18, %v5660_v18 }
 0x1c3   :  { %v1032_v20 = vadd.f32 %v1031_v60, %v1030_v46  ;;  %v5674_v60 = vsub.f32 %v5250_v44, %v5307_v38  ;;  %v5688_v44 = vsub.f32 %v5259_v21, %v5307_v38 }
 0x1c4   :  { %7736 = vst [vmem:[#allocation9_spill] sm:$0xff] %v5667_v49  ;;  %v928_v43 = vmul.f32 %v5667_v49, %v5667_v49  ;;  %v1041_v41 = vsel %vm676_vm1, %v927_v51, 0.0 }
 0x1c5   :  { %v1034_v1 = vadd.f32 %v1033_v32, %v1032_v20  ;;  %7737 = vst [vmem:[#allocation10_spill] sm:$0xff] %v5674_v60  ;;  %v7738_v32 = vld [vmem:[#allocation13_spill] sm:$0xff]  ;;  %7740 = vst [vmem:[#allocation12_spill] sm:$0xff] %v5688_v44 }
 0x1c6   :  { %v5681_v13 = vsub.f32 %v7738_v32, %v5307_v38  ;;  %v1043_v17 = vsel %vm676_vm1, %v928_v43, 0.0 }
 0x1c7   :  { %v1036_v46 = vadd.f32 %v1035_v50, %v1034_v1  ;;  %v929_v50 = vmul.f32 %v5674_v60, %v5674_v60  ;;  %v931_v60 = vmul.f32 %v5688_v44, %v5688_v44 }
 0x1c8   :  { %7739 = vst [vmem:[#allocation11_spill] sm:$0xff] %v5681_v13  ;;  %v930_v32 = vmul.f32 %v5681_v13, %v5681_v13 }
 0x1c9   :  { %v1038_v20 = vadd.f32 %v1037_v63, %v1036_v46  ;;  %v5695_v63 = vsub.f32 %v5266_v6, %v5307_v38  ;;  %v1045_v51 = vsel %vm676_vm1, %v929_v50, 0.0  ;;  %v1049_v50 = vsel %vm676_vm1, %v931_v60, 0.0 }
 0x1ca   :  { %v1047_v43 = vsel %vm676_vm1, %v930_v32, 0.0 }
 0x1cb   :  { %v1040_v1 = vadd.f32 %v1039_v0, %v1038_v20  ;;  %7741 = vst [vmem:[#allocation13_spill] sm:$0xff] %v5695_v63  ;;  %v7742_v0 = vld [vmem:[#allocation14_spill] sm:$0xff]  ;;  %v932_v13 = vmul.f32 %v5695_v63, %v5695_v63 }
 0x1cc   :  { %v5702_v21 = vsub.f32 %v7742_v0, %v5307_v38 }
 0x1cd   :  { %v1042_v46 = vadd.f32 %v1041_v41, %v1040_v1  ;;  %v7744_v41 = vld [vmem:[#allocation15_spill] sm:$0xff]  ;;  %v1051_v32 = vsel %vm676_vm1, %v932_v13, 0.0 }
 0x1ce   :  { %7743 = vst [vmem:[#allocation14_spill] sm:$0xff] %v5702_v21  ;;  %v5709_v6 = vsub.f32 %v7744_v41, %v5307_v38  ;;  %v933_v44 = vmul.f32 %v5702_v21, %v5702_v21 }
 0x1cf   :  { %v1044_v20 = vadd.f32 %v1043_v17, %v1042_v46  ;;  %v7746_v17 = vld [vmem:[#allocation16_spill] sm:$0xff] }
 0x1d0   :  { %7745 = vst [vmem:[#allocation15_spill] sm:$0xff] %v5709_v6  ;;  %v5716_v0 = vsub.f32 %v7746_v17, %v5307_v38  ;;  %v934_v63 = vmul.f32 %v5709_v6, %v5709_v6  ;;  %v1053_v21 = vsel %vm676_vm1, %v933_v44, 0.0 }
 0x1d1   :  { %v1046_v1 = vadd.f32 %v1045_v51, %v1044_v20  ;;  %v7748_v51 = vld [vmem:[#allocation17_spill] sm:$0xff] }
 0x1d2   :  { %7747 = vst [vmem:[#allocation16_spill] sm:$0xff] %v5716_v0  ;;  %v5723_v41 = vsub.f32 %v7748_v51, %v5307_v38  ;;  %v935_v17 = vmul.f32 %v5716_v0, %v5716_v0  ;;  %v1055_v51 = vsel %vm676_vm1, %v934_v63, 0.0 }
 0x1d3   :  { %v1048_v46 = vadd.f32 %v1047_v43, %v1046_v1  ;;  %v873_v43 = vsub.f32 %v5291_v47, %v5307_v38 }
 0x1d4   :  { %7749 = vst [vmem:[#allocation17_spill] sm:$0xff] %v5723_v41 }
 0x1d5   :  { %v1050_v20 = vadd.f32 %v1049_v50, %v1048_v46  ;;  %v5735_v46 = vsub.f32 %v5294_v10, %v5307_v38  ;;  %v936_v50 = vmul.f32 %v5723_v41, %v5723_v41  ;;  %v937_v47 = vmul.f32 %v873_v43, %v873_v43 }
 0x1d7   :  { %v1052_v1 = vadd.f32 %v1051_v32, %v1050_v20  ;;  %7750 = vst [vmem:[#allocation21_spill] sm:$0xff] %v5735_v46  ;;  %v5742_v20 = vsub.f32 %v5299_v33, %v5307_v38  ;;  %v1057_v32 = vsel %vm676_vm1, %v935_v17, 0.0  ;;  %v938_v44 = vmul.f32 %v5735_v46, %v5735_v46 }
 0x1d8   :  { %v1059_v10 = vsel %vm676_vm1, %v936_v50, 0.0  ;;  %v1061_v63 = vsel %vm676_vm1, %v937_v47, 0.0  ;;  %v5758_v47 = vld [vmem:[%s7659_s3] ss:$0 sm:$0xff]  ;;  %s4485_s3 = smov 32  }
 0x1d9   :  { %v1054_v60 = vadd.f32 %v1053_v21, %v1052_v1  ;;  %v939_v1 = vmul.f32 %v5742_v20, %v5742_v20 }
 0x1db   :  { %v1056_v13 = vadd.f32 %v1055_v51, %v1054_v60  ;;  %v1063_v51 = vsel %vm676_vm1, %v938_v44, 0.0  ;;  %v1065_v38 = vsel %vm676_vm1, %v939_v1, 0.0 }
 0x1dd   :  { %v1058_v0 = vadd.f32 %v1057_v32, %v1056_v13 }
 0x1df   :  { %v1060_v21 = vadd.f32 %v1059_v10, %v1058_v0 }
 0x1e1   :  { %v1062_v60 = vadd.f32 %v1061_v63, %v1060_v21 }
 0x1e3   :  { %v1064_v33 = vadd.f32 %v1063_v51, %v1062_v60 }
 0x1e5   :  { %v1066_v41 = vadd.f32 %v1065_v38, %v1064_v33  ;;  %v7752_v33 = vld [vmem:[#allocation3_spill] sm:$0xff]  ;;  %v7753_v38 = vld [vmem:[#allocation4_spill] sm:$0xff] }
 0x1e7   :  { %v1067_v17 = vrot.slane %v1066_v41, 4 }
 0x1e9   :  { %v1068_v13 = vadd.f32 %v1067_v17, %v1066_v41  ;;  %v7754_v17 = vld [vmem:[#allocation5_spill] sm:$0xff] }
 0x1eb   :  { %v1069_v32 = vrot.slane %v1068_v13, 2 }
 0x1ed   :  { %v1070_v6 = vadd.f32 %v1069_v32, %v1068_v13  ;;  %v7755_v13 = vld [vmem:[#allocation20_spill] sm:$0xff] }
 0x1ef   :  { %v1071_v46 = vrot.slane %v1070_v6, 1 }
 0x1f1   :  { %v1072_v49 = vadd.f32 %v1071_v46, %v1070_v6  ;;  %v5776_v6 = vld [vmem:[%s7660_s4] ss:$0 sm:$0xff]  ;;  %s4486_s4 = smov 16  }
 0x1f3   :  { %v1073_v50 = vmul.f32 0.001953125, %v1072_v49 }
 0x1f5   :  { %v1074_v0 = vadd.f32 0.001, %v1073_v50 }
 0x1f7   :  { %4480 = vrsqrt.f32 %v1074_v0 }
 0x204   :  { %v5753_v10 = vpop.eup %4480 }
 0x205   :  { %v1137_v44 = vmul.f32 %v5753_v10, %v873_v43  ;;  %v5763_v21 = vmul.f32 %v5753_v10, %v5315_v28  ;;  %v5767_v41 = vmul.f32 %v5753_v10, %v5319_v4  ;;  %v5771_v49 = vmul.f32 %v5753_v10, %v5323_v34 }
 0x206   :  { %v5780_v43 = vmul.f32 %v5753_v10, %v5327_v54  ;;  %v5784_v28 = vmul.f32 %v5753_v10, %v5335_v40  ;;  %v5788_v4 = vmul.f32 %v5753_v10, %v5341_v42  ;;  %v5792_v34 = vmul.f32 %v5753_v10, %v5349_v12 }
 0x207   :  { %v1207_v46 = vmul.f32 %v5758_v47, %v1137_v44  ;;  %v5797_v1 = vmul.f32 %v5753_v10, %v5356_v59  ;;  %v5801_v54 = vmul.f32 %v5753_v10, %v5363_v57  ;;  %v5805_v40 = vmul.f32 %v5753_v10, %v5370_v62  ;;  %v7756_v44 = vld [vmem:[#allocation18_spill] sm:$0xff] }
 0x208   :  { %v5809_v42 = vmul.f32 %v5753_v10, %v5377_v3  ;;  %v5813_v12 = vmul.f32 %v5753_v10, %v5384_v11  ;;  %v5817_v59 = vmul.f32 %v5753_v10, %v5391_v9  ;;  %v5821_v57 = vmul.f32 %v5753_v10, %v5398_v14 }
 0x209   :  { %v1277_v63 = vadd.f32 %v5776_v6, %v1207_v46  ;;  %v5826_v62 = vmul.f32 %v5753_v10, %v5405_v19  ;;  %v5830_v3 = vmul.f32 %v5753_v10, %v5412_v27  ;;  %v5834_v11 = vmul.f32 %v5753_v10, %v5419_v25 }
 0x20a   :  { %v5838_v9 = vmul.f32 %v5753_v10, %v5426_v30  ;;  %v5842_v14 = vmul.f32 %v5753_v10, %v5433_v35  ;;  %v5846_v19 = vmul.f32 %v5753_v10, %v5440_v48  ;;  %v5850_v27 = vmul.f32 %v5753_v10, %v5447_v45 }
 0x20b   :  { %v1341_v60 = vmax.f32 %v1277_v63, 0.0  ;;  %v5854_v25 = vmul.f32 %v5753_v10, %v5454_v52  ;;  %v5858_v30 = vmul.f32 %v5753_v10, %v5461_v58  ;;  %v5862_v35 = vmul.f32 %v5753_v10, %v5468_v5 }
 0x20c   :  { %v1100_v48 = vmul.f32 %v5753_v10, %v5475_v2  ;;  %v1101_v45 = vmul.f32 %v5753_v10, %v5482_v8  ;;  %v5870_v51 = vmul.f32 %v5753_v10, %v5489_v16  ;;  %v5874_v52 = vmul.f32 %v5753_v10, %v5496_v26 }
 0x20d   :  { %1574 = vst.msk [vmem:[#allocation2 + $0x4c1] sm:$0xff] %vm676_vm1, %v1341_v60  ;;  %v5879_v58 = vmul.f32 %v5753_v10, %v5503_v23  ;;  %v5883_v5 = vmul.f32 %v5753_v10, %v5510_v31  ;;  %v5887_v2 = vmul.f32 %v5753_v10, %v5517_v37  ;;  %v5891_v8 = vmul.f32 %v5753_v10, %v5524_v55  ;;  %v7751_v37 = vld [vmem:[#allocation19_spill] sm:$0xff]  ;;  %v7757_v60 = vld [vmem:[#allocation6_spill] sm:$0xff] }
 0x20e   :  { %v5895_v16 = vmul.f32 %v5753_v10, %v5531_v53  ;;  %v5899_v26 = vmul.f32 %v5753_v10, %v5538_v61  ;;  %v5903_v23 = vmul.f32 %v5753_v10, %v5545_v7  ;;  %v5907_v31 = vmul.f32 %v5753_v10, %v5552_v22 }
 0x20f   :  { %v5911_v55 = vmul.f32 %v5753_v10, %v7751_v37  ;;  %v5915_v53 = vmul.f32 %v5753_v10, %v5566_v29  ;;  %v5919_v61 = vmul.f32 %v5753_v10, %v7752_v33  ;;  %v5923_v7 = vmul.f32 %v5753_v10, %v7753_v38  ;;  %v7758_v37 = vld [vmem:[#allocation7_spill] sm:$0xff]  ;;  %v7760_v33 = vld [vmem:[#allocation8_spill] sm:$0xff] }
 0x210   :  { %v5927_v22 = vmul.f32 %v5753_v10, %v7754_v17  ;;  %v5931_v32 = vmul.f32 %v5753_v10, %v7755_v13  ;;  %v5935_v29 = vmul.f32 %v5753_v10, %v5601_v36  ;;  %v5939_v50 = vmul.f32 %v5753_v10, %v5608_v56  ;;  %v7763_v17 = vld [vmem:[#allocation9_spill] sm:$0xff] }
 0x211   :  { %v5943_v0 = vmul.f32 %v5753_v10, %v5615_v39  ;;  %v5947_v46 = vmul.f32 %v5753_v10, %v7756_v44  ;;  %v5951_v63 = vmul.f32 %v5753_v10, %v5625_v15  ;;  %v5955_v36 = vmul.f32 %v5753_v10, %v7757_v60  ;;  %v7765_v44 = vld [vmem:[#allocation10_spill] sm:$0xff] }
 0x212   :  { %v5959_v56 = vmul.f32 %v5753_v10, %v7758_v37  ;;  %v5963_v39 = vmul.f32 %v5753_v10, %v5646_v24  ;;  %v5967_v38 = vmul.f32 %v5753_v10, %v7760_v33  ;;  %v5971_v15 = vmul.f32 %v5753_v10, %v5660_v18  ;;  %v7767_v37 = vld [vmem:[#allocation11_spill] sm:$0xff] }
 0x213   :  { %v5975_v13 = vmul.f32 %v5753_v10, %v7763_v17  ;;  %v5979_v60 = vmul.f32 %v5753_v10, %v7765_v44  ;;  %v5983_v24 = vmul.f32 %v5753_v10, %v7767_v37 }
 0x214   :  { %7759 = vst [vmem:[#allocation19_spill] sm:$0xff] %v5963_v39  ;;  %7761 = vst [vmem:[#allocation3_spill] sm:$0xff] %v5967_v38  ;;  %v7769_v39 = vld [vmem:[#allocation12_spill] sm:$0xff]  ;;  %v7771_v38 = vld [vmem:[#allocation13_spill] sm:$0xff] }
 0x215   :  { %7762 = vst [vmem:[#allocation4_spill] sm:$0xff] %v5971_v15  ;;  %7764 = vst [vmem:[#allocation5_spill] sm:$0xff] %v5975_v13  ;;  %v5987_v33 = vmul.f32 %v5753_v10, %v7769_v39  ;;  %v5991_v18 = vmul.f32 %v5753_v10, %v7771_v38  ;;  %v7772_v15 = vld [vmem:[#allocation14_spill] sm:$0xff]  ;;  %v7774_v13 = vld [vmem:[#allocation15_spill] sm:$0xff] }
 0x216   :  { %7766 = vst [vmem:[#allocation20_spill] sm:$0xff] %v5979_v60  ;;  %7768 = vst [vmem:[#allocation18_spill] sm:$0xff] %v5983_v24  ;;  %v5995_v17 = vmul.f32 %v5753_v10, %v7772_v15  ;;  %v5999_v44 = vmul.f32 %v5753_v10, %v7774_v13  ;;  %v7775_v60 = vld [vmem:[#allocation16_spill] sm:$0xff]  ;;  %v7776_v24 = vld [vmem:[#allocation17_spill] sm:$0xff]  ;;  %v6015_v15 = vmul.f32 %v5753_v10, %v5742_v20 }
 0x217   :  { %7770 = vst [vmem:[#allocation6_spill] sm:$0xff] %v5987_v33  ;;  %v6003_v37 = vmul.f32 %v5753_v10, %v7775_v60  ;;  %v6007_v39 = vmul.f32 %v5753_v10, %v7776_v24  ;;  %v7777_v33 = vld [vmem:[#allocation21_spill] sm:$0xff]  ;;  %v1171_v13 = vmul.f32 %v5758_v47, %v1101_v45  ;;  %v6021_v60 = vmul.f32 %v5758_v47, %v5763_v21 }
 0x218   :  { %7773 = vst [vmem:[#allocation7_spill] sm:$0xff] %v5995_v17  ;;  %v6011_v38 = vmul.f32 %v5753_v10, %v7777_v33  ;;  %v1170_v17 = vmul.f32 %v5758_v47, %v1100_v48  ;;  %v6025_v24 = vmul.f32 %v5758_v47, %v5767_v41  ;;  %v6029_v33 = vmul.f32 %v5758_v47, %v5771_v49 }
 0x219   :  { %v6034_v20 = vmul.f32 %v5758_v47, %v5780_v43  ;;  %v6038_v10 = vmul.f32 %v5758_v47, %v5784_v28  ;;  %v6042_v21 = vmul.f32 %v5758_v47, %v5788_v4  ;;  %v1241_v41 = vadd.f32 %v5776_v6, %v1171_v13 }
 0x21a   :  { %7778 = vst [vmem:[#allocation8_spill] sm:$0xff] %v6011_v38  ;;  %v1240_v38 = vadd.f32 %v5776_v6, %v1170_v17  ;;  %v6047_v49 = vmul.f32 %v5758_v47, %v5792_v34  ;;  %v6051_v48 = vmul.f32 %v5758_v47, %v5797_v1  ;;  %v6055_v43 = vmul.f32 %v5758_v47, %v5801_v54 }
 0x21b   :  { %v6059_v45 = vmul.f32 %v5758_v47, %v5805_v40  ;;  %v6063_v4 = vmul.f32 %v5758_v47, %v5809_v42  ;;  %v6067_v34 = vmul.f32 %v5758_v47, %v5813_v12  ;;  %v1305_v17 = vmax.f32 %v1241_v41, 0.0  ;;  %v7783_v13 = vld [vmem:[#allocation19_spill] sm:$0xff] }
 0x21c   :  { %v1304_v28 = vmax.f32 %v1240_v38, 0.0  ;;  %v6071_v1 = vmul.f32 %v5758_v47, %v5817_v59  ;;  %v6075_v54 = vmul.f32 %v5758_v47, %v5821_v57  ;;  %v6079_v40 = vmul.f32 %v5758_v47, %v5826_v62 }
 0x21d   :  { %v6084_v42 = vmul.f32 %v5758_v47, %v5830_v3  ;;  %v1162_v12 = vmul.f32 %v5758_v47, %v5834_v11  ;;  %v6090_v59 = vmul.f32 %v5758_v47, %v5838_v9  ;;  %v6094_v57 = vmul.f32 %v5758_v47, %v5842_v14  ;;  %1534 = vst.msk [vmem:[#allocation2 + $0x201] sm:$0xff] %vm676_vm1, %v1305_v17 }
 0x21e   :  { %1533 = vst.msk [vmem:[#allocation2 + $0x1f1] sm:$0xff] %vm676_vm1, %v1304_v28  ;;  %v6099_v62 = vmul.f32 %v5758_v47, %v5846_v19  ;;  %v6103_v3 = vmul.f32 %v5758_v47, %v5850_v27  ;;  %v6107_v11 = vmul.f32 %v5758_v47, %v5854_v25  ;;  %v6111_v9 = vmul.f32 %v5758_v47, %v5858_v30 }
 0x21f   :  { %v6115_v14 = vmul.f32 %v5758_v47, %v5862_v35  ;;  %v6119_v19 = vmul.f32 %v5758_v47, %v5870_v51  ;;  %v6123_v27 = vmul.f32 %v5758_v47, %v5874_v52  ;;  %v6127_v25 = vmul.f32 %v5758_v47, %v5879_v58 }
 0x220   :  { %v6131_v30 = vmul.f32 %v5758_v47, %v5883_v5  ;;  %v6135_v35 = vmul.f32 %v5758_v47, %v5887_v2  ;;  %v6139_v51 = vmul.f32 %v5758_v47, %v5891_v8  ;;  %v6143_v52 = vmul.f32 %v5758_v47, %v5895_v16 }
 0x221   :  { %v6147_v58 = vmul.f32 %v5758_v47, %v5899_v26  ;;  %v6151_v5 = vmul.f32 %v5758_v47, %v5903_v23  ;;  %v6155_v2 = vmul.f32 %v5758_v47, %v5907_v31  ;;  %v6159_v8 = vmul.f32 %v5758_v47, %v5911_v55 }
 0x222   :  { %v6163_v16 = vmul.f32 %v5758_v47, %v5915_v53  ;;  %v6167_v26 = vmul.f32 %v5758_v47, %v5919_v61  ;;  %v6171_v23 = vmul.f32 %v5758_v47, %v5923_v7  ;;  %v6175_v31 = vmul.f32 %v5758_v47, %v5927_v22 }
 0x223   :  { %v6179_v55 = vmul.f32 %v5758_v47, %v5931_v32  ;;  %v6183_v53 = vmul.f32 %v5758_v47, %v5935_v29  ;;  %v6187_v61 = vmul.f32 %v5758_v47, %v5939_v50  ;;  %v6191_v7 = vmul.f32 %v5758_v47, %v5943_v0 }
 0x224   :  { %v6197_v22 = vmul.f32 %v5758_v47, %v5947_v46  ;;  %v6201_v32 = vmul.f32 %v5758_v47, %v5951_v63  ;;  %v6205_v29 = vmul.f32 %v5758_v47, %v5955_v36  ;;  %v6209_v50 = vmul.f32 %v5758_v47, %v5959_v56  ;;  %v6211_v0 = vld [vmem:[#allocation2 + $0x201] sm:$0xff]  ;;  %v7788_v36 = vld [vmem:[#allocation5_spill] sm:$0xff] }
 0x225   :  { %v6193_v38 = vld [vmem:[#allocation2 + $0x1f1] sm:$0xff]  ;;  %7782 = vst [vmem:[#allocation12_spill] sm:$0xff] %v6211_v0  ;;  %v6215_v41 = vmul.f32 %v5758_v47, %v7783_v13  ;;  %v7785_v46 = vld [vmem:[#allocation3_spill] sm:$0xff]  ;;  %v7787_v63 = vld [vmem:[#allocation4_spill] sm:$0xff] }
 0x226   :  { %7779 = vst [vmem:[#allocation9_spill] sm:$0xff] %v6201_v32  ;;  %7780 = vst [vmem:[#allocation10_spill] sm:$0xff] %v6205_v29  ;;  %v6219_v28 = vmul.f32 %v5758_v47, %v7785_v46  ;;  %v6223_v17 = vmul.f32 %v5758_v47, %v7787_v63  ;;  %v6227_v29 = vmul.f32 %v5758_v47, %v7788_v36  ;;  %v7791_v13 = vld [vmem:[#allocation18_spill] sm:$0xff]  ;;  %v7793_v36 = vld [vmem:[#allocation7_spill] sm:$0xff] }
 0x227   :  { %7781 = vst [vmem:[#allocation11_spill] sm:$0xff] %v6209_v50  ;;  %7784 = vst [vmem:[#allocation13_spill] sm:$0xff] %v6215_v41  ;;  %v3879_v56 = vpack.i.bf16 %v6211_v0, %v6193_v38  ;;  %v7790_v50 = vld [vmem:[#allocation20_spill] sm:$0xff]  ;;  %v6237_v41 = vmul.f32 %v5758_v47, %v7791_v13  ;;  %v7792_v46 = vld [vmem:[#allocation6_spill] sm:$0xff]  ;;  %v6245_v63 = vmul.f32 %v5758_v47, %v5991_v18 }
 0x228   :  { %7786 = vst [vmem:[#allocation14_spill] sm:$0xff] %v6219_v28  ;;  %7789 = vst [vmem:[#allocation15_spill] sm:$0xff] %v6227_v29  ;;  %v6233_v32 = vmul.f32 %v5758_v47, %v7790_v50  ;;  %v6241_v28 = vmul.f32 %v5758_v47, %v7792_v46  ;;  %v6249_v29 = vmul.f32 %v5758_v47, %v7793_v36  ;;  %v7794_v18 = vld [vmem:[#allocation8_spill] sm:$0xff] }
 0x229   :  { %v6253_v50 = vmul.f32 %v5758_v47, %v5999_v44  ;;  %v6257_v13 = vmul.f32 %v5758_v47, %v6003_v37  ;;  %3880 = vrot.lane.b32.xlu1 %v3879_v56, %s4485_s3  ;;  %v6262_v46 = vmul.f32 %v5758_v47, %v6007_v39  ;;  %v6266_v0 = vmul.f32 %v5758_v47, %v7794_v18 }
 0x22a   :  { %v6270_v36 = vmul.f32 %v5758_v47, %v6015_v15  ;;  %v1232_v44 = vadd.f32 %v5776_v6, %v1162_v12  ;;  %v6275_v37 = vadd.f32 %v5776_v6, %v6021_v60  ;;  %v6279_v56 = vadd.f32 %v5776_v6, %v6025_v24 }
 0x22b   :  { %v6283_v39 = vadd.f32 %v5776_v6, %v6029_v33  ;;  %v6287_v18 = vadd.f32 %v5776_v6, %v6034_v20  ;;  %v6291_v15 = vadd.f32 %v5776_v6, %v6038_v10  ;;  %v6295_v60 = vadd.f32 %v5776_v6, %v6042_v21 }
 0x22c   :  { %v1296_v47 = vmax.f32 %v1232_v44, 0.0  ;;  %v6299_v24 = vadd.f32 %v5776_v6, %v6047_v49  ;;  %v6303_v33 = vadd.f32 %v5776_v6, %v6051_v48  ;;  %v6307_v20 = vadd.f32 %v5776_v6, %v6055_v43 }
 0x22d   :  { %v6311_v10 = vadd.f32 %v5776_v6, %v6059_v45  ;;  %v6315_v21 = vadd.f32 %v5776_v6, %v6063_v4  ;;  %v6320_v49 = vadd.f32 %v5776_v6, %v6067_v34  ;;  %v6324_v48 = vadd.f32 %v5776_v6, %v6071_v1 }
 0x22e   :  { %1524 = vst.msk [vmem:[#allocation2 + $0x151] sm:$0xff] %vm676_vm1, %v1296_v47  ;;  %v6328_v43 = vadd.f32 %v5776_v6, %v6075_v54  ;;  %v6332_v45 = vadd.f32 %v5776_v6, %v6079_v40  ;;  %v6336_v4 = vadd.f32 %v5776_v6, %v6084_v42  ;;  %v6340_v34 = vadd.f32 %v5776_v6, %v6090_v59  ;;  %v7801_v47 = vld [vmem:[#allocation9_spill] sm:$0xff] }
 0x22f   :  { %v6344_v1 = vadd.f32 %v5776_v6, %v6094_v57  ;;  %v6348_v54 = vadd.f32 %v5776_v6, %v6099_v62  ;;  %v6352_v40 = vadd.f32 %v5776_v6, %v6103_v3  ;;  %v6356_v42 = vadd.f32 %v5776_v6, %v6107_v11 }
 0x230   :  { %v6360_v12 = vadd.f32 %v5776_v6, %v6111_v9  ;;  %v6364_v59 = vadd.f32 %v5776_v6, %v6115_v14  ;;  %v6368_v57 = vadd.f32 %v5776_v6, %v6119_v19  ;;  %v6372_v62 = vadd.f32 %v5776_v6, %v6123_v27 }
 0x231   :  { %v6376_v3 = vadd.f32 %v5776_v6, %v6127_v25  ;;  %v6380_v11 = vadd.f32 %v5776_v6, %v6131_v30  ;;  %v6384_v9 = vadd.f32 %v5776_v6, %v6135_v35  ;;  %v6388_v14 = vadd.f32 %v5776_v6, %v6139_v51  ;;  %v1595_v25 = vld [vmem:[#allocation2 + $0x141] sm:$0xff] }
 0x232   :  { %v6392_v19 = vadd.f32 %v5776_v6, %v6143_v52  ;;  %v6396_v27 = vadd.f32 %v5776_v6, %v6147_v58  ;;  %v6400_v30 = vadd.f32 %v5776_v6, %v6151_v5  ;;  %v6404_v35 = vadd.f32 %v5776_v6, %v6155_v2 }
 0x233   :  { %v6408_v51 = vadd.f32 %v5776_v6, %v6159_v8  ;;  %v6412_v52 = vadd.f32 %v5776_v6, %v6163_v16  ;;  %v6416_v58 = vadd.f32 %v5776_v6, %v6167_v26  ;;  %v6420_v5 = vadd.f32 %v5776_v6, %v6171_v23 }
 0x234   :  { %v6424_v2 = vadd.f32 %v5776_v6, %v6175_v31  ;;  %v6428_v8 = vadd.f32 %v5776_v6, %v6179_v55  ;;  %v6434_v16 = vadd.f32 %v5776_v6, %v6183_v53  ;;  %v6438_v26 = vadd.f32 %v5776_v6, %v6187_v61  ;;  %v7802_v53 = vld [vmem:[#allocation10_spill] sm:$0xff]  ;;  %v7803_v61 = vld [vmem:[#allocation11_spill] sm:$0xff] }
 0x235   :  { %v6430_v44 = vld [vmem:[#allocation2 + $0x151] sm:$0xff]  ;;  %v6442_v23 = vadd.f32 %v5776_v6, %v6191_v7  ;;  %v6446_v31 = vadd.f32 %v5776_v6, %v6197_v22 }
 0x236   :  { %7795 = vst [vmem:[#allocation16_spill] sm:$0xff] %v6428_v8  ;;  %7796 = vst [vmem:[#allocation17_spill] sm:$0xff] %v6430_v44  ;;  %v3869_v55 = vpack.i.bf16 %v6430_v44, %v1595_v25  ;;  %v6451_v8 = vadd.f32 %v5776_v6, %v7801_v47  ;;  %v7804_v7 = vld [vmem:[#allocation13_spill] sm:$0xff]  ;;  %v7805_v22 = vld [vmem:[#allocation14_spill] sm:$0xff]  ;;  %v6471_v25 = vadd.f32 %v5776_v6, %v6223_v17 }
 0x237   :  { %7797 = vst [vmem:[#allocation21_spill] sm:$0xff] %v6434_v16  ;;  %7798 = vst [vmem:[#allocation19_spill] sm:$0xff] %v6438_v26  ;;  %v6455_v16 = vadd.f32 %v5776_v6, %v7802_v53  ;;  %v6459_v26 = vadd.f32 %v5776_v6, %v7803_v61  ;;  %v7806_v47 = vld [vmem:[#allocation15_spill] sm:$0xff]  ;;  %v6480_v61 = vadd.f32 %v5776_v6, %v6233_v32 }
 0x238   :  { %7799 = vst [vmem:[#allocation3_spill] sm:$0xff] %v6442_v23  ;;  %7800 = vst [vmem:[#allocation4_spill] sm:$0xff] %v6446_v31  ;;  %v6463_v23 = vadd.f32 %v5776_v6, %v7804_v7  ;;  %v6467_v31 = vadd.f32 %v5776_v6, %v7805_v22  ;;  %v6475_v53 = vadd.f32 %v5776_v6, %v7806_v47  ;;  %v1611_v44 = vld [vmem:[#allocation2 + $0x1e1] sm:$0xff]  ;;  %3870 = vrot.lane.b32.xlu0 %v3869_v55, %s4486_s4  ;;  %v4464_v55 = vld [vmem:[%s7661_s5 + $0x78] sm:$0xff]  }
 0x239   :  { %v6484_v7 = vadd.f32 %v5776_v6, %v6237_v41  ;;  %v6488_v17 = vadd.f32 %v5776_v6, %v6241_v28  ;;  %v6492_v22 = vadd.f32 %v5776_v6, %v6245_v63  ;;  %v6499_v32 = vadd.f32 %v5776_v6, %v6249_v29  ;;  %v4465_v47 = vld [vmem:[%s7661_s5 + $0x38] sm:$0xff]   ;;  %3721 = vmatprep.subr.bf16.mxu1 %v4464_v55 }
 0x23a   :  { %v6503_v41 = vadd.f32 %v5776_v6, %v6253_v50  ;;  %v6507_v28 = vadd.f32 %v5776_v6, %v6257_v13  ;;  %v6511_v63 = vadd.f32 %v5776_v6, %v6262_v46  ;;  %v6518_v29 = vadd.f32 %v5776_v6, %v6266_v0  ;;  %3722 = vmatpush3.bf16.msra.mxu1 %v4465_v47  ;;  %v4466_v0 = vld [vmem:[%s7661_s5 + $0x70] sm:$0xff]  }
 0x23b   :  { %7807 = vst [vmem:[#allocation5_spill] sm:$0xff] %v6499_v32  ;;  %v6522_v50 = vadd.f32 %v5776_v6, %v6270_v36  ;;  %v1280_v13 = vmax.f32 %v6275_v37, 0.0  ;;  %v1281_v46 = vmax.f32 %v6279_v56, 0.0  ;;  %v1284_v32 = vmax.f32 %v6291_v15, 0.0  ;;  %v4467_v6 = vld [vmem:[%s7661_s5 + $0x30] sm:$0xff]   ;;  %3723 = vmatprep.subr.bf16.mxu1 %v4466_v0 }
 0x23c   :  { %7808 = vst [vmem:[#allocation20_spill] sm:$0xff] %v6503_v41  ;;  %7809 = vst [vmem:[#allocation18_spill] sm:$0xff] %v6507_v28  ;;  %v3884_v41 = vpack.i.bf16 %v6193_v38, %v1611_v44  ;;  %v1283_v28 = vmax.f32 %v6287_v18, 0.0  ;;  %v1285_v38 = vmax.f32 %v6295_v60, 0.0  ;;  %v1286_v36 = vmax.f32 %v6299_v24, 0.0 }
 0x23d   :  { %7810 = vst [vmem:[#allocation6_spill] sm:$0xff] %v6511_v63  ;;  %v1282_v63 = vmax.f32 %v6283_v39, 0.0  ;;  %v1287_v37 = vmax.f32 %v6303_v33, 0.0  ;;  %v1288_v56 = vmax.f32 %v6307_v20, 0.0  ;;  %1506 = vst.msk [vmem:[#allocation2 + $0x11] sm:$0xff] %vm676_vm1, %v1280_v13  ;;  %v1289_v39 = vmax.f32 %v6311_v10, 0.0 }
 0x23e   :  { %3885 = vrot.lane.b32.xlu1 %v3884_v41, %s4485_s3  ;;  %v1290_v18 = vmax.f32 %v6315_v21, 0.0  ;;  %v1291_v15 = vmax.f32 %v6320_v49, 0.0  ;;  %v1292_v44 = vmax.f32 %v6324_v48, 0.0  ;;  %1507 = vst.msk [vmem:[#allocation2 + $0x21] sm:$0xff] %vm676_vm1, %v1281_v46  ;;  %1509 = vst.msk [vmem:[#allocation2 + $0x41] sm:$0xff] %vm676_vm1, %v1283_v28  ;;  %v1293_v60 = vmax.f32 %v6328_v43, 0.0  ;;  %3724 = vmatpush3.bf16.msra.mxu1 %v4467_v6 }
 0x23f   :  { %1508 = vst.msk [vmem:[#allocation2 + $0x31] sm:$0xff] %vm676_vm1, %v1282_v63  ;;  %1510 = vst.msk [vmem:[#allocation2 + $0x51] sm:$0xff] %vm676_vm1, %v1284_v32  ;;  %v1294_v24 = vmax.f32 %v6332_v45, 0.0  ;;  %v1295_v33 = vmax.f32 %v6336_v4, 0.0  ;;  %v1297_v20 = vmax.f32 %v6340_v34, 0.0  ;;  %v1298_v10 = vmax.f32 %v6344_v1, 0.0 }
 0x240   :  { %1511 = vst.msk [vmem:[#allocation2 + $0x61] sm:$0xff] %vm676_vm1, %v1285_v38  ;;  %1512 = vst.msk [vmem:[#allocation2 + $0x71] sm:$0xff] %vm676_vm1, %v1286_v36  ;;  %v1299_v21 = vmax.f32 %v6348_v54, 0.0  ;;  %v1300_v49 = vmax.f32 %v6352_v40, 0.0  ;;  %v1301_v48 = vmax.f32 %v6356_v42, 0.0  ;;  %v1302_v43 = vmax.f32 %v6360_v12, 0.0 }
 0x241   :  { %1513 = vst.msk [vmem:[#allocation2 + $0x81] sm:$0xff] %vm676_vm1, %v1287_v37  ;;  %1515 = vst.msk [vmem:[#allocation2 + $0xb1] sm:$0xff] %vm676_vm1, %v1288_v56  ;;  %v1303_v45 = vmax.f32 %v6364_v59, 0.0  ;;  %v1306_v4 = vmax.f32 %v6368_v57, 0.0  ;;  %v1307_v34 = vmax.f32 %v6372_v62, 0.0  ;;  %v4468_v1 = vld [vmem:[%s7661_s5 + $0x68] sm:$0xff]  }
 0x242   :  { %1516 = vst.msk [vmem:[#allocation2 + $0xc1] sm:$0xff] %vm676_vm1, %v1289_v39  ;;  %1517 = vst.msk [vmem:[#allocation2 + $0xd1] sm:$0xff] %vm676_vm1, %v1290_v18  ;;  %v4469_v54 = vld [vmem:[%s7661_s5 + $0x28] sm:$0xff]   ;;  %v1308_v40 = vmax.f32 %v6376_v3, 0.0  ;;  %v1309_v42 = vmax.f32 %v6380_v11, 0.0  ;;  %v1310_v12 = vmax.f32 %v6384_v9, 0.0  ;;  %3725 = vmatprep.subr.bf16.mxu1 %v4468_v1 }
 0x243   :  { %1518 = vst.msk [vmem:[#allocation2 + $0xe1] sm:$0xff] %vm676_vm1, %v1291_v15  ;;  %1519 = vst.msk [vmem:[#allocation2 + $0xf1] sm:$0xff] %vm676_vm1, %v1292_v44  ;;  %v1311_v59 = vmax.f32 %v6388_v14, 0.0  ;;  %v1312_v57 = vmax.f32 %v6392_v19, 0.0  ;;  %v1313_v62 = vmax.f32 %v6396_v27, 0.0  ;;  %v1314_v3 = vmax.f32 %v6400_v30, 0.0  ;;  %3726 = vmatpush3.bf16.msra.mxu1 %v4469_v54 }
 0x244   :  { %1525 = vst.msk [vmem:[#allocation2 + $0x161] sm:$0xff] %vm676_vm1, %v1297_v20  ;;  %1520 = vst.msk [vmem:[#allocation2 + $0x101] sm:$0xff] %vm676_vm1, %v1293_v60  ;;  %v1315_v11 = vmax.f32 %v6404_v35, 0.0  ;;  %v1316_v9 = vmax.f32 %v6408_v51, 0.0  ;;  %v1317_v14 = vmax.f32 %v6412_v52, 0.0  ;;  %v1318_v19 = vmax.f32 %v6416_v58, 0.0 }
 0x245   :  { %1521 = vst.msk [vmem:[#allocation2 + $0x111] sm:$0xff] %vm676_vm1, %v1294_v24  ;;  %1522 = vst.msk [vmem:[#allocation2 + $0x121] sm:$0xff] %vm676_vm1, %v1295_v33  ;;  %v1319_v27 = vmax.f32 %v6420_v5, 0.0  ;;  %v1320_v30 = vmax.f32 %v6424_v2, 0.0  ;;  %v7811_v35 = vld [vmem:[#allocation16_spill] sm:$0xff]  ;;  %v7812_v51 = vld [vmem:[#allocation21_spill] sm:$0xff] }
 0x246   :  { %1526 = vst.msk [vmem:[#allocation2 + $0x171] sm:$0xff] %vm676_vm1, %v1298_v10  ;;  %1527 = vst.msk [vmem:[#allocation2 + $0x181] sm:$0xff] %vm676_vm1, %v1299_v21  ;;  %v1321_v55 = vmax.f32 %v7811_v35, 0.0  ;;  %v1322_v32 = vmax.f32 %v7812_v51, 0.0  ;;  %v7813_v52 = vld [vmem:[#allocation19_spill] sm:$0xff]  ;;  %v7815_v28 = vld [vmem:[#allocation4_spill] sm:$0xff] }
 0x247   :  { %1528 = vst.msk [vmem:[#allocation2 + $0x191] sm:$0xff] %vm676_vm1, %v1300_v49  ;;  %1529 = vst.msk [vmem:[#allocation2 + $0x1a1] sm:$0xff] %vm676_vm1, %v1301_v48  ;;  %v1323_v41 = vmax.f32 %v7813_v52, 0.0  ;;  %v7814_v58 = vld [vmem:[#allocation3_spill] sm:$0xff]  ;;  %v1325_v63 = vmax.f32 %v7815_v28, 0.0  ;;  %v1326_v2 = vmax.f32 %v6451_v8, 0.0 }
 0x248   :  { %1530 = vst.msk [vmem:[#allocation2 + $0x1b1] sm:$0xff] %vm676_vm1, %v1302_v43  ;;  %1531 = vst.msk [vmem:[#allocation2 + $0x1c1] sm:$0xff] %vm676_vm1, %v1303_v45  ;;  %v1324_v5 = vmax.f32 %v7814_v58, 0.0  ;;  %v1327_v47 = vmax.f32 %v6455_v16, 0.0  ;;  %v1328_v13 = vmax.f32 %v6459_v26, 0.0  ;;  %v1329_v46 = vmax.f32 %v6463_v23, 0.0 }
 0x249   :  { %1535 = vst.msk [vmem:[#allocation2 + $0x211] sm:$0xff] %vm676_vm1, %v1306_v4  ;;  %1536 = vst.msk [vmem:[#allocation2 + $0x221] sm:$0xff] %vm676_vm1, %v1307_v34  ;;  %v1330_v0 = vmax.f32 %v6467_v31, 0.0  ;;  %v1331_v6 = vmax.f32 %v6471_v25, 0.0  ;;  %v1627_v8 = vld [vmem:[#allocation2 + $0x142] sm:$0xff]  ;;  %v1332_v16 = vmax.f32 %v6475_v53, 0.0 }
 0x24a   :  { %1537 = vst.msk [vmem:[#allocation2 + $0x231] sm:$0xff] %vm676_vm1, %v1308_v40  ;;  %1538 = vst.msk [vmem:[#allocation2 + $0x241] sm:$0xff] %vm676_vm1, %v1309_v42  ;;  %v1333_v38 = vmax.f32 %v6480_v61, 0.0  ;;  %v1334_v26 = vmax.f32 %v6484_v7, 0.0  ;;  %v1335_v23 = vmax.f32 %v6488_v17, 0.0  ;;  %v1628_v25 = vld [vmem:[#allocation2 + $0x152] sm:$0xff] }
 0x24b   :  { %1539 = vst.msk [vmem:[#allocation2 + $0x251] sm:$0xff] %vm676_vm1, %v1310_v12  ;;  %1540 = vst.msk [vmem:[#allocation2 + $0x261] sm:$0xff] %vm676_vm1, %v1311_v59  ;;  %v6632_v31 = vld [vmem:[#allocation2 + $0x161] sm:$0xff]  ;;  %v1336_v36 = vmax.f32 %v6492_v22, 0.0  ;;  %v7816_v53 = vld [vmem:[#allocation5_spill] sm:$0xff]  ;;  %v1342_v15 = vmax.f32 %v6518_v29, 0.0  ;;  %v3894_v29 = vpack.i.bf16 %v1628_v25, %v1627_v8 }
 0x24c   :  { %1542 = vst.msk [vmem:[#allocation2 + $0x291] sm:$0xff] %vm676_vm1, %v1312_v57  ;;  %1543 = vst.msk [vmem:[#allocation2 + $0x2a1] sm:$0xff] %vm676_vm1, %v1313_v62  ;;  %v1337_v37 = vmax.f32 %v7816_v53, 0.0  ;;  %v7817_v61 = vld [vmem:[#allocation20_spill] sm:$0xff]  ;;  %v7818_v7 = vld [vmem:[#allocation18_spill] sm:$0xff]  ;;  %v1343_v22 = vmax.f32 %v6522_v50, 0.0 }
 0x24d   :  { %1544 = vst.msk [vmem:[#allocation2 + $0x2b1] sm:$0xff] %vm676_vm1, %v1314_v3  ;;  %1545 = vst.msk [vmem:[#allocation2 + $0x2c1] sm:$0xff] %vm676_vm1, %v1315_v11  ;;  %v1338_v56 = vmax.f32 %v7817_v61, 0.0  ;;  %v1339_v39 = vmax.f32 %v7818_v7, 0.0  ;;  %v7819_v17 = vld [vmem:[#allocation6_spill] sm:$0xff]  ;;  %v7820_v44 = vld [vmem:[#allocation17_spill] sm:$0xff]  ;;  %3895 = vrot.lane.b32.xlu1 %v3894_v29, %s4487_s28 }
 0x24e   :  { %1546 = vst.msk [vmem:[#allocation2 + $0x2d1] sm:$0xff] %vm676_vm1, %v1316_v9  ;;  %1547 = vst.msk [vmem:[#allocation2 + $0x2e1] sm:$0xff] %vm676_vm1, %v1317_v14  ;;  %v1340_v18 = vmax.f32 %v7819_v17, 0.0  ;;  %v3874_v60 = vpack.i.bf16 %v6632_v31, %v7820_v44  ;;  %v6659_v50 = vld [vmem:[#allocation2 + $0x162] sm:$0xff]  ;;  %v1643_v33 = vld [vmem:[#allocation2 + $0xb0] sm:$0xff] }
 0x24f   :  { %1548 = vst.msk [vmem:[#allocation2 + $0x2f1] sm:$0xff] %vm676_vm1, %v1318_v19  ;;  %1549 = vst.msk [vmem:[#allocation2 + $0x301] sm:$0xff] %vm676_vm1, %v1319_v27  ;;  %v1772_v24 = vld [vmem:[#allocation2 + $0xc0] sm:$0xff]  ;;  %v3889_v20 = vpack.i.bf16 %v6659_v50, %v1628_v25  ;;  %v6667_v10 = vld [vmem:[#allocation2 + $0xd0] sm:$0xff] }
 0x250   :  { %1551 = vst.msk [vmem:[#allocation2 + $0x331] sm:$0xff] %vm676_vm1, %v1320_v30  ;;  %1552 = vst.msk [vmem:[#allocation2 + $0x341] sm:$0xff] %vm676_vm1, %v1321_v55  ;;  %3875 = vrot.lane.b32.xlu0 %v3874_v60, %s4486_s4  ;;  %v3904_v21 = vpack.i.bf16 %v1772_v24, %v1643_v33  ;;  %v1789_v49 = vld [vmem:[#allocation2 + $0x21] sm:$0xff]  ;;  %v1659_v48 = vld [vmem:[#allocation2 + $0x11] sm:$0xff]  ;;  %v3899_v43 = vpack.i.bf16 %v6667_v10, %v1772_v24 }
 0x251   :  { %1553 = vst.msk [vmem:[#allocation2 + $0x351] sm:$0xff] %vm676_vm1, %v1322_v32  ;;  %1554 = vst.msk [vmem:[#allocation2 + $0x361] sm:$0xff] %vm676_vm1, %v1323_v41  ;;  %v6672_v45 = vld [vmem:[#allocation2 + $0x31] sm:$0xff]  ;;  %v3914_v4 = vpack.i.bf16 %v1789_v49, %v1659_v48  ;;  %v1805_v34 = vld [vmem:[#allocation2 + $0xc1] sm:$0xff] }
 0x252   :  { %1555 = vst.msk [vmem:[#allocation2 + $0x371] sm:$0xff] %vm676_vm1, %v1324_v5  ;;  %1556 = vst.msk [vmem:[#allocation2 + $0x381] sm:$0xff] %vm676_vm1, %v1325_v63  ;;  %3905 = vrot.lane.b32.xlu1 %v3904_v21, %s4488_s29  ;;  %v1675_v1 = vld [vmem:[#allocation2 + $0xb1] sm:$0xff]  ;;  %v3909_v54 = vpack.i.bf16 %v6672_v45, %v1789_v49  ;;  %v1821_v12 = vld [vmem:[#allocation2 + $0x22] sm:$0xff] }
 0x253   :  { %1557 = vst.msk [vmem:[#allocation2 + $0x391] sm:$0xff] %vm676_vm1, %v1326_v2  ;;  %1558 = vst.msk [vmem:[#allocation2 + $0x3a1] sm:$0xff] %vm676_vm1, %v1327_v47  ;;  %v6677_v40 = vld [vmem:[#allocation2 + $0xd1] sm:$0xff]  ;;  %v3924_v42 = vpack.i.bf16 %v1805_v34, %v1675_v1  ;;  %v4470_v11 = vld [vmem:[%s7661_s5 + $0x60] sm:$0xff]  }
 0x254   :  { %1560 = vst.msk [vmem:[#allocation2 + $0x3d1] sm:$0xff] %vm676_vm1, %v1328_v13  ;;  %1561 = vst.msk [vmem:[#allocation2 + $0x3e1] sm:$0xff] %vm676_vm1, %v1329_v46  ;;  %3890 = vrot.lane.b32.xlu0 %v3889_v20, %s4487_s28  ;;  %v1691_v59 = vld [vmem:[#allocation2 + $0x12] sm:$0xff]  ;;  %v3919_v57 = vpack.i.bf16 %v6677_v40, %v1805_v34  ;;  %v4471_v14 = vld [vmem:[%s7661_s5 + $0x20] sm:$0xff]   ;;  %3727 = vmatprep.subr.bf16.mxu1 %v4470_v11 }
 0x255   :  { %1562 = vst.msk [vmem:[#allocation2 + $0x3f1] sm:$0xff] %vm676_vm1, %v1330_v0  ;;  %1563 = vst.msk [vmem:[#allocation2 + $0x401] sm:$0xff] %vm676_vm1, %v1331_v6  ;;  %v6682_v62 = vld [vmem:[#allocation2 + $0x32] sm:$0xff]  ;;  %v3934_v3 = vpack.i.bf16 %v1821_v12, %v1691_v59  ;;  %3728 = vmatpush3.bf16.msra.mxu1 %v4471_v14  ;;  %v1726_v30 = vld [vmem:[#allocation2 + $0x181] sm:$0xff] }
 0x256   :  { %1564 = vst.msk [vmem:[#allocation2 + $0x411] sm:$0xff] %vm676_vm1, %v1332_v16  ;;  %1565 = vst.msk [vmem:[#allocation2 + $0x421] sm:$0xff] %vm676_vm1, %v1333_v38  ;;  %3915 = vrot.lane.b32.xlu1 %v3914_v4, %s4489_s30  ;;  %v1725_v9 = vld [vmem:[#allocation2 + $0x171] sm:$0xff]  ;;  %v3929_v19 = vpack.i.bf16 %v6682_v62, %v1821_v12  ;;  %v1742_v41 = vld [vmem:[#allocation2 + $0x221] sm:$0xff] }
 0x257   :  { %1566 = vst.msk [vmem:[#allocation2 + $0x431] sm:$0xff] %vm676_vm1, %v1334_v26  ;;  %1567 = vst.msk [vmem:[#allocation2 + $0x441] sm:$0xff] %vm676_vm1, %v1335_v23  ;;  %v4472_v27 = vld [vmem:[%s7661_s5 + $0x58] sm:$0xff]   ;;  %v3944_v35 = vpack.i.bf16 %v1725_v9, %v6632_v31  ;;  %v4474_v32 = vld [vmem:[%s7661_s5 + $0x50] sm:$0xff]   ;;  %v3939_v52 = vpack.i.bf16 %v1726_v30, %v1725_v9 }
 0x258   :  { %1569 = vst.msk [vmem:[#allocation2 + $0x471] sm:$0xff] %vm676_vm1, %v1336_v36  ;;  %1570 = vst.msk [vmem:[#allocation2 + $0x481] sm:$0xff] %vm676_vm1, %v1337_v37  ;;  %3900 = vrot.lane.b32.xlu0 %v3899_v43, %s4488_s29  ;;  %v4473_v55 = vld [vmem:[%s7661_s5 + $0x18] sm:$0xff]   ;;  %3729 = vmatprep.subr.bf16.mxu1 %v4472_v27  ;;  %v4475_v58 = vld [vmem:[%s7661_s5 + $0x10] sm:$0xff]  }
 0x259   :  { %1571 = vst.msk [vmem:[#allocation2 + $0x491] sm:$0xff] %vm676_vm1, %v1338_v56  ;;  %1572 = vst.msk [vmem:[#allocation2 + $0x4a1] sm:$0xff] %vm676_vm1, %v1339_v39  ;;  %v1741_v51 = vld [vmem:[#allocation2 + $0x211] sm:$0xff]  ;;  %3730 = vmatpush3.bf16.msra.mxu1 %v4473_v55  ;;  %v7821_v5 = vld [vmem:[#allocation12_spill] sm:$0xff] }
 0x25a   :  { %1573 = vst.msk [vmem:[#allocation2 + $0x4b1] sm:$0xff] %vm676_vm1, %v1340_v18  ;;  %1575 = vst.msk [vmem:[#allocation2 + $0x4d1] sm:$0xff] %vm676_vm1, %v1342_v15  ;;  %3925 = vrot.lane.b32.xlu1 %v3924_v42, %s4490_s10  ;;  %v3954_v28 = vpack.i.bf16 %v1741_v51, %v7821_v5  ;;  %v1757_v63 = vld [vmem:[#allocation2 + $0x172] sm:$0xff]  ;;  %3731 = vmatprep.subr.bf16.mxu1 %v4474_v32  ;;  %v4476_v2 = vld [vmem:[%s7661_s5 + $0x48] sm:$0xff]   ;;  %v3949_v13 = vpack.i.bf16 %v1742_v41, %v1741_v51 }
 0x25b   :  { %1576 = vst.msk [vmem:[#allocation2 + $0x4e1] sm:$0xff] %vm676_vm1, %v1343_v22  ;;  %v1758_v47 = vld [vmem:[#allocation2 + $0x182] sm:$0xff]  ;;  %v3964_v0 = vpack.i.bf16 %v1757_v63, %v6659_v50  ;;  %v1775_v26 = vld [vmem:[#allocation2 + $0xf0] sm:$0xff] }
 0x25c   :  { %3910 = vrot.lane.b32.xlu0 %v3909_v54, %s4489_s30  ;;  %v4477_v46 = vld [vmem:[%s7661_s5 + $0x8] sm:$0xff]   ;;  %v4478_v6 = vld [vmem:[%s7661_s5 + $0x40] sm:$0xff]   ;;  %v3959_v16 = vpack.i.bf16 %v1758_v47, %v1757_v63  ;;  %v1792_v36 = vld [vmem:[#allocation2 + $0x51] sm:$0xff] }
 0x25d   :  { %3732 = vmatpush3.bf16.msra.mxu1 %v4475_v58  ;;  %v1774_v8 = vld [vmem:[#allocation2 + $0xe0] sm:$0xff]  ;;  %v1808_v56 = vld [vmem:[#allocation2 + $0xf1] sm:$0xff] }
 0x25e   :  { %3935 = vrot.lane.b32.xlu1 %v3934_v3, %s4491_s0  ;;  %3733 = vmatprep.subr.bf16.mxu1 %v4476_v2  ;;  %v4479_v38 = vld [vmem:[%s7661_s5] sm:$0xff]   ;;  %v3974_v23 = vpack.i.bf16 %v1774_v8, %v6667_v10  ;;  %v3969_v25 = vpack.i.bf16 %v1775_v26, %v1774_v8  ;;  %v1824_v18 = vld [vmem:[#allocation2 + $0x52] sm:$0xff] }
 0x25f   :  { %v1791_v31 = vld [vmem:[#allocation2 + $0x41] sm:$0xff]  ;;  %v1727_v22 = vld [vmem:[#allocation2 + $0x191] sm:$0xff] }
 0x260   :  { %3920 = vrot.lane.b32.xlu0 %v3919_v57, %s4490_s10  ;;  %v3984_v53 = vpack.i.bf16 %v1791_v31, %v6672_v45  ;;  %v1807_v37 = vld [vmem:[#allocation2 + $0xe1] sm:$0xff]  ;;  %v3979_v61 = vpack.i.bf16 %v1792_v36, %v1791_v31  ;;  %v4014_v29 = vpack.i.bf16 %v1727_v22, %v1726_v30  ;;  %v1743_v50 = vld [vmem:[#allocation2 + $0x231] sm:$0xff] }
 0x261   :  { %3734 = vmatpush3.bf16.msra.mxu1 %v4477_v46  ;;  %v3994_v7 = vpack.i.bf16 %v1807_v37, %v6677_v40  ;;  %v1823_v39 = vld [vmem:[#allocation2 + $0x42] sm:$0xff]  ;;  %v3989_v17 = vpack.i.bf16 %v1808_v56, %v1807_v37  ;;  %v4024_v20 = vpack.i.bf16 %v1743_v50, %v1742_v41  ;;  %v1759_v10 = vld [vmem:[#allocation2 + $0x192] sm:$0xff] }
 0x262   :  { %3945 = vrot.lane.b32.xlu1 %v3944_v35, %s4486_s4  ;;  %3735 = vmatprep.subr.bf16.mxu1 %v4478_v6  ;;  %v4004_v15 = vpack.i.bf16 %v1823_v39, %v6682_v62  ;;  %v3999_v44 = vpack.i.bf16 %v1824_v18, %v1823_v39  ;;  %v1728_v60 = vld [vmem:[#allocation2 + $0x1a1] sm:$0xff]  ;;  %v4034_v48 = vpack.i.bf16 %v1759_v10, %v1758_v47  ;;  %v1777_v4 = vld [vmem:[#allocation2 + $0x110] sm:$0xff] }
 0x263   :  { %v4009_v24 = vpack.i.bf16 %v1728_v60, %v1727_v22  ;;  %v1744_v33 = vld [vmem:[#allocation2 + $0x241] sm:$0xff]  ;;  %v1794_v40 = vld [vmem:[#allocation2 + $0x71] sm:$0xff] }
 0x264   :  { %3930 = vrot.lane.b32.xlu0 %v3929_v19, %s4491_s0  ;;  %v4019_v21 = vpack.i.bf16 %v1744_v33, %v1743_v50  ;;  %v1760_v49 = vld [vmem:[#allocation2 + $0x1a2] sm:$0xff]  ;;  %v1810_v57 = vld [vmem:[#allocation2 + $0x111] sm:$0xff] }
 0x265   :  { %3736 = vmatpush3.bf16.msra.mxu1 %v4479_v38  ;;  %v1776_v43 = vld [vmem:[#allocation2 + $0x100] sm:$0xff]  ;;  %v4029_v45 = vpack.i.bf16 %v1760_v49, %v1759_v10  ;;  %v1826_v9 = vld [vmem:[#allocation2 + $0x72] sm:$0xff] }
 0x266   :  { %3955 = vrot.lane.b32.xlu1 %v3954_v28, %s4485_s3  ;;  %v4044_v34 = vpack.i.bf16 %v1776_v43, %v1775_v26  ;;  %v1793_v1 = vld [vmem:[#allocation2 + $0x61] sm:$0xff]  ;;  %v4039_v54 = vpack.i.bf16 %v1777_v4, %v1776_v43  ;;  %v1729_v19 = vld [vmem:[#allocation2 + $0x1b1] sm:$0xff] }
 0x267   :  { %v4054_v42 = vpack.i.bf16 %v1793_v1, %v1792_v36  ;;  %v1809_v12 = vld [vmem:[#allocation2 + $0x101] sm:$0xff]  ;;  %v4049_v59 = vpack.i.bf16 %v1794_v40, %v1793_v1  ;;  %v4084_v35 = vpack.i.bf16 %v1729_v19, %v1728_v60  ;;  %v1745_v55 = vld [vmem:[#allocation2 + $0x251] sm:$0xff] }
 0x268   :  { %3940 = vrot.lane.b32.xlu0 %v3939_v52, %s4486_s4  ;;  %v4064_v62 = vpack.i.bf16 %v1809_v12, %v1808_v56  ;;  %v1825_v3 = vld [vmem:[#allocation2 + $0x62] sm:$0xff]  ;;  %v4059_v11 = vpack.i.bf16 %v1810_v57, %v1809_v12  ;;  %v4094_v52 = vpack.i.bf16 %v1745_v55, %v1744_v33  ;;  %v1761_v41 = vld [vmem:[#allocation2 + $0x1b2] sm:$0xff] }
 0x269   :  { %v4074_v14 = vpack.i.bf16 %v1825_v3, %v1824_v18  ;;  %v4069_v27 = vpack.i.bf16 %v1826_v9, %v1825_v3  ;;  %v1730_v30 = vld [vmem:[#allocation2 + $0x1c1] sm:$0xff]  ;;  %v4104_v28 = vpack.i.bf16 %v1761_v41, %v1760_v49  ;;  %v1779_v47 = vld [vmem:[#allocation2 + $0x130] sm:$0xff] }
 0x26a   :  { %3965 = vrot.lane.b32.xlu1 %v3964_v0, %s4487_s28  ;;  %v4079_v51 = vpack.i.bf16 %v1730_v30, %v1729_v19  ;;  %v1746_v32 = vld [vmem:[#allocation2 + $0x261] sm:$0xff]  ;;  %v1796_v6 = vld [vmem:[#allocation2 + $0x91] sm:$0xff] }
 0x26b   :  { %v4089_v58 = vpack.i.bf16 %v1746_v32, %v1745_v55  ;;  %v1762_v5 = vld [vmem:[#allocation2 + $0x1c2] sm:$0xff]  ;;  %v1812_v26 = vld [vmem:[#allocation2 + $0x131] sm:$0xff] }
 0x26c   :  { %3950 = vrot.lane.b32.xlu0 %v3949_v13, %s4485_s3  ;;  %v1778_v63 = vld [vmem:[#allocation2 + $0x120] sm:$0xff]  ;;  %v4099_v2 = vpack.i.bf16 %v1762_v5, %v1761_v41  ;;  %v1828_v36 = vld [vmem:[#allocation2 + $0x92] sm:$0xff] }
 0x26d   :  { %v4114_v13 = vpack.i.bf16 %v1778_v63, %v1777_v4  ;;  %v1795_v46 = vld [vmem:[#allocation2 + $0x81] sm:$0xff]  ;;  %v4109_v0 = vpack.i.bf16 %v1779_v47, %v1778_v63  ;;  %v1731_v37 = vld [vmem:[#allocation2 + $0x3d1] sm:$0xff] }
 0x26e   :  { %3975 = vrot.lane.b32.xlu1 %v3974_v23, %s4488_s29  ;;  %v4124_v8 = vpack.i.bf16 %v1795_v46, %v1794_v40  ;;  %v4119_v38 = vpack.i.bf16 %v1796_v6, %v1795_v46  ;;  %v1827_v31 = vld [vmem:[#allocation2 + $0x82] sm:$0xff]  ;;  %v1747_v18 = vld [vmem:[#allocation2 + $0x471] sm:$0xff] }
 0x26f   :  { %v4139_v56 = vpack.i.bf16 %v1828_v36, %v1827_v31  ;;  %v1763_v50 = vld [vmem:[#allocation2 + $0x3d2] sm:$0xff]  ;;  %v6782_v10 = vld [vmem:[#allocation2 + $0x3e2] sm:$0xff] }
 0x270   :  { %3960 = vrot.lane.b32.xlu0 %v3959_v16, %s4487_s28  ;;  %v1811_v16 = vld [vmem:[#allocation2 + $0x121] sm:$0xff]  ;;  %v1667_v40 = vld [vmem:[#allocation2 + $0x291] sm:$0xff] }
 0x271   :  { %v4134_v23 = vpack.i.bf16 %v1811_v16, %v1810_v57  ;;  %v1780_v49 = vld [vmem:[#allocation2 + $0x340] sm:$0xff]  ;;  %v6804_v19 = vld [vmem:[#allocation2 + $0x2b2] sm:$0xff] }
 0x272   :  { %3985 = vrot.lane.b32.xlu1 %v3984_v53, %s4489_s30  ;;  %v4144_v53 = vpack.i.bf16 %v1827_v31, %v1826_v9  ;;  %v1813_v57 = vld [vmem:[#allocation2 + $0x341] sm:$0xff]  ;;  %v1683_v9 = vld [vmem:[#allocation2 + $0x331] sm:$0xff] }
 0x273   :  { %v6807_v30 = vld [vmem:[#allocation2 + $0x3f1] sm:$0xff]  ;;  %v4204_v63 = vpack.i.bf16 %v1813_v57, %v1683_v9  ;;  %v1578_v47 = vld [vmem:[#allocation2 + $0x1e0] sm:$0xff] }
 0x274   :  { %3970 = vrot.lane.b32.xlu0 %v3969_v25, %s4488_s29  ;;  %v4129_v25 = vpack.i.bf16 %v1812_v26, %v1811_v16  ;;  %v6814_v41 = vld [vmem:[#allocation2 + $0x491] sm:$0xff] }
 0x275   :  { %v1579_v16 = vld [vmem:[#allocation2 + $0x1f0] sm:$0xff] }
 0x276   :  { %3995 = vrot.lane.b32.xlu1 %v3994_v7, %s4490_s10  ;;  %v6766_v7 = vld [vmem:[#allocation2 + $0x3e1] sm:$0xff] }
 0x277   :  { %v4149_v22 = vpack.i.bf16 %v6766_v7, %v1731_v37  ;;  %v4224_v31 = vpack.i.bf16 %v6807_v30, %v6766_v7 }
 0x278   :  { %3980 = vrot.lane.b32.xlu0 %v3979_v61, %s4489_s30  ;;  %v1603_v61 = vld [vmem:[#allocation2 + $0x3c1] sm:$0xff] }
 0x279   :  { %v4154_v39 = vpack.i.bf16 %v1731_v37, %v1603_v61 }
 0x27a   :  { %4005 = vrot.lane.b32.xlu1 %v4004_v15, %s4491_s0  ;;  %v1619_v15 = vld [vmem:[#allocation2 + $0x461] sm:$0xff] }
 0x27b   :  { %v4164_v60 = vpack.i.bf16 %v1747_v18, %v1619_v15 }
 0x27c   :  { %3990 = vrot.lane.b32.xlu0 %v3989_v17, %s4490_s10 }
 0x27e   :  { %4015 = vrot.lane.b32.xlu1 %v4014_v29, %s4486_s4 }
 0x280   :  { %4000 = vrot.lane.b32.xlu0 %v3999_v44, %s4491_s0  ;;  %v6773_v44 = vld [vmem:[#allocation2 + $0x481] sm:$0xff] }
 0x282   :  { %4025 = vrot.lane.b32.xlu1 %v4024_v20, %s4485_s3  ;;  %v4159_v20 = vpack.i.bf16 %v6773_v44, %v1747_v18 }
 0x284   :  { %4010 = vrot.lane.b32.xlu0 %v4009_v24, %s4486_s4  ;;  %v1635_v24 = vld [vmem:[#allocation2 + $0x3c2] sm:$0xff] }
 0x286   :  { %4035 = vrot.lane.b32.xlu1 %v4034_v48, %s4487_s28  ;;  %v1651_v48 = vld [vmem:[#allocation2 + $0x330] sm:$0xff] }
 0x287   :  { %v4184_v1 = vpack.i.bf16 %v1780_v49, %v1651_v48 }
 0x288   :  { %4020 = vrot.lane.b32.xlu0 %v4019_v21, %s4485_s3  ;;  %v4174_v21 = vpack.i.bf16 %v1763_v50, %v1635_v24 }
 0x28a   :  { %4045 = vrot.lane.b32.xlu1 %v4044_v34, %s4488_s29  ;;  %v6789_v34 = vld [vmem:[#allocation2 + $0x350] sm:$0xff] }
 0x28b   :  { %v4179_v12 = vpack.i.bf16 %v6789_v34, %v1780_v49 }
 0x28c   :  { %4030 = vrot.lane.b32.xlu0 %v4029_v45, %s4487_s28  ;;  %v4169_v45 = vpack.i.bf16 %v6782_v10, %v1763_v50 }
 0x28e   :  { %4055 = vrot.lane.b32.xlu1 %v4054_v42, %s4489_s30 }
 0x290   :  { %4040 = vrot.lane.b32.xlu0 %v4039_v54, %s4488_s29  ;;  %v1797_v54 = vld [vmem:[#allocation2 + $0x2a1] sm:$0xff] }
 0x292   :  { %4065 = vrot.lane.b32.xlu1 %v4064_v62, %s4490_s10  ;;  %v6798_v62 = vld [vmem:[#allocation2 + $0x351] sm:$0xff] }
 0x294   :  { %4050 = vrot.lane.b32.xlu0 %v4049_v59, %s4489_s30  ;;  %v6796_v59 = vld [vmem:[#allocation2 + $0x2b1] sm:$0xff] }
 0x295   :  { %v4189_v32 = vpack.i.bf16 %v6796_v59, %v1797_v54 }
 0x296   :  { %4075 = vrot.lane.b32.xlu1 %v4074_v14, %s4491_s0  ;;  %v6802_v14 = vld [vmem:[#allocation2 + $0x2a2] sm:$0xff] }
 0x298   :  { %4060 = vrot.lane.b32.xlu0 %v4059_v11, %s4490_s10  ;;  %v4194_v11 = vpack.i.bf16 %v1797_v54, %v1667_v40 }
 0x29a   :  { %4085 = vrot.lane.b32.xlu1 %v4084_v35, %s4486_s4  ;;  %v6809_v35 = vld [vmem:[#allocation2 + $0x401] sm:$0xff] }
 0x29b   :  { %v6768_v17 = vpop.permute.xlu1 %3880 }
 0x29c   :  { %4070 = vrot.lane.b32.xlu0 %v4069_v27, %s4491_s0  ;;  %v1699_v27 = vld [vmem:[#allocation2 + $0x292] sm:$0xff]  ;;  %v3883_v36 = vunpack.i.h.bf16 %v6768_v17 }
 0x29d   :  { %v4214_v6 = vpack.i.bf16 %v6802_v14, %v1699_v27 }
 0x29e   :  { %4095 = vrot.lane.b32.xlu1 %v4094_v52, %s4485_s3  ;;  %v4199_v52 = vpack.i.bf16 %v6798_v62, %v1813_v57 }
 0x2a0   :  { %4080 = vrot.lane.b32.xlu0 %v4079_v51, %s4486_s4 }
 0x2a2   :  { %4105 = vrot.lane.b32.xlu1 %v4104_v28, %s4487_s28 }
 0x2a4   :  { %4090 = vrot.lane.b32.xlu0 %v4089_v58, %s4485_s3 }
 0x2a6   :  { %4115 = vrot.lane.b32.xlu1 %v4114_v13, %s4488_s29 }
 0x2a8   :  { %4100 = vrot.lane.b32.xlu0 %v4099_v2, %s4487_s28  ;;  %v4209_v2 = vpack.i.bf16 %v6804_v19, %v6802_v14 }
 0x2aa   :  { %4125 = vrot.lane.b32.xlu1 %v4124_v8, %s4489_s30  ;;  %v6776_v29 = vpop.permute.xlu0 %3870  ;;  %v4219_v8 = vpack.i.bf16 %v6809_v35, %v6807_v30 }
 0x2ab   :  { %v3873_v58 = vunpack.i.h.bf16 %v6776_v29  ;;  %v3872_v5 = vunpack.i.l.bf16 %v6776_v29 }
 0x2ac   :  { %4110 = vrot.lane.b32.xlu0 %v4109_v0, %s4488_s29 }
 0x2ae   :  { %4135 = vrot.lane.b32.xlu1 %v4134_v23, %s4490_s10 }
 0x2b0   :  { %4120 = vrot.lane.b32.xlu0 %v4119_v38, %s4489_s30  ;;  %v6779_v33 = vpop.permute.xlu1 %3885  ;;  %v6827_v38 = vld [vmem:[#allocation2 + $0x200] sm:$0xff] }
 0x2b1   :  { %v3888_v13 = vunpack.i.h.bf16 %v6779_v33  ;;  %v3887_v46 = vunpack.i.l.bf16 %v6779_v33 }
 0x2b2   :  { %4145 = vrot.lane.b32.xlu1 %v4144_v53, %s4491_s0  ;;  %v3882_v53 = vunpack.i.l.bf16 %v6768_v17 }
 0x2b4   :  { %4130 = vrot.lane.b32.xlu0 %v4129_v25, %s4490_s10  ;;  %v4234_v25 = vpack.i.bf16 %v6814_v41, %v6773_v44 }
 0x2b6   :  { %4155 = vrot.lane.b32.xlu1 %v4154_v39, %s4486_s4  ;;  %v2733_v39 = vsel %vm676_vm1, %v1578_v47, %v3872_v5 }
 0x2b8   :  { %4140 = vrot.lane.b32.xlu0 %v4139_v56, %s4491_s0  ;;  %v2734_v56 = vsel %vm676_vm1, %v1579_v16, %v3873_v58 }
 0x2b9   :  { %v2751_v17 = vsel %vm2749_vm3, %v2734_v56, %v3888_v13 }
 0x2ba   :  { %4165 = vrot.lane.b32.xlu1 %v4164_v60, %s4485_s3 }
 0x2bc   :  { %4150 = vrot.lane.b32.xlu0 %v4149_v22, %s4486_s4  ;;  %v2750_v22 = vsel %vm2749_vm3, %v2733_v39, %v3887_v46 }
 0x2be   :  { %4175 = vrot.lane.b32.xlu1 %v4174_v21, %s4487_s28 }
 0x2bf   :  { %v6787_v4 = vpop.permute.xlu1 %3895 }
 0x2c0   :  { %4160 = vrot.lane.b32.xlu0 %v4159_v20, %s4485_s3  ;;  %v3898_v26 = vunpack.i.h.bf16 %v6787_v4  ;;  %v3897_v23 = vunpack.i.l.bf16 %v6787_v4 }
 0x2c2   :  { %v3876_v43 = vpop.permute.xlu0 %3875  ;;  %4185 = vrot.lane.b32.xlu1 %v4184_v1, %s4488_s29  ;;  %v2766_v24 = vsel %vm288_vm0, %v2750_v22, %v3897_v23  ;;  %v2767_v33 = vsel %vm288_vm0, %v2751_v17, %v3898_v26  ;;  %v6876_v23 = vld [vmem:[#allocation2 + $0x4a1] sm:$0xff] }
 0x2c3   :  { %v3878_v55 = vunpack.i.h.bf16 %v3876_v43  ;;  %v3877_v51 = vunpack.i.l.bf16 %v3876_v43  ;;  %v4229_v30 = vpack.i.bf16 %v6876_v23, %v6814_v41  ;;  %v1782_v22 = vld [vmem:[#allocation2 + $0x360] sm:$0xff] }
 0x2c4   :  { %4170 = vrot.lane.b32.xlu0 %v4169_v45, %s4487_s28  ;;  %v6800_v3 = vpop.permute.xlu1 %3905  ;;  %v4254_v41 = vpack.i.bf16 %v1782_v22, %v6789_v34  ;;  %v6915_v34 = vld [vmem:[#allocation2 + $0x2d2] sm:$0xff] }
 0x2c5   :  { %v2851_v37 = vsel %vm676_vm1, %v6827_v38, %v3878_v55  ;;  %v2850_v61 = vsel %vm676_vm1, %v1579_v16, %v3877_v51  ;;  %v3908_v7 = vunpack.i.h.bf16 %v6800_v3  ;;  %v3907_v18 = vunpack.i.l.bf16 %v6800_v3 }
 0x2c6   :  { %v6793_v42 = vpop.permute.xlu0 %3890  ;;  %4195 = vrot.lane.b32.xlu1 %v4194_v11, %s4489_s30  ;;  %v2866_v20 = vsel %vm2749_vm3, %v2850_v61, %v3882_v53  ;;  %v2867_v21 = vsel %vm2749_vm3, %v2851_v37, %v3883_v36  ;;  %v1765_v53 = vld [vmem:[#allocation2 + $0x3f2] sm:$0xff] }
 0x2c7   :  { %v3893_v49 = vunpack.i.h.bf16 %v6793_v42  ;;  %v3892_v48 = vunpack.i.l.bf16 %v6793_v42  ;;  %v2784_v54 = vsel %vm2782_vm4, %v2767_v33, %v3908_v7  ;;  %v2783_v40 = vsel %vm2782_vm4, %v2766_v24, %v3907_v18  ;;  %v6894_v18 = vld [vmem:[#allocation2 + $0x402] sm:$0xff]  ;;  %v6908_v24 = vld [vmem:[#allocation2 + $0x2d1] sm:$0xff] }
 0x2c8   :  { %4180 = vrot.lane.b32.xlu0 %v4179_v12, %s4488_s29  ;;  %v3916_v0 = vpop.permute.xlu1 %3915  ;;  %v1815_v33 = vld [vmem:[#allocation2 + $0x361] sm:$0xff] }
 0x2c9   :  { %v3918_v60 = vunpack.i.h.bf16 %v3916_v0  ;;  %v3917_v29 = vunpack.i.l.bf16 %v3916_v0 }
 0x2ca   :  { %v6818_v28 = vpop.permute.xlu0 %3900  ;;  %4205 = vrot.lane.b32.xlu1 %v4204_v63, %s4490_s10 }
 0x2cb   :  { %v3903_v4 = vunpack.i.h.bf16 %v6818_v28  ;;  %v3902_v1 = vunpack.i.l.bf16 %v6818_v28  ;;  %v2801_v11 = vsel %vm2799_vm5, %v2784_v54, %v3918_v60  ;;  %v2800_v9 = vsel %vm2799_vm5, %v2783_v40, %v3917_v29  ;;  %v6900_v60 = vld [vmem:[#allocation2 + $0x370] sm:$0xff]  ;;  %v1799_v29 = vld [vmem:[#allocation2 + $0x2c1] sm:$0xff] }
 0x2cc   :  { %4190 = vrot.lane.b32.xlu0 %v4189_v32, %s4489_s30  ;;  %v3926_v50 = vpop.permute.xlu1 %3925  ;;  %v2882_v32 = vsel %vm288_vm0, %v2866_v20, %v3892_v48  ;;  %v6910_v20 = vld [vmem:[#allocation2 + $0x371] sm:$0xff]  ;;  %v6913_v48 = vld [vmem:[#allocation2 + $0x2c2] sm:$0xff] }
 0x2cd   :  { %v3928_v43 = vunpack.i.h.bf16 %v3926_v50  ;;  %v3927_v45 = vunpack.i.l.bf16 %v3926_v50  ;;  %v2898_v63 = vsel %vm2782_vm4, %v2882_v32, %v3902_v1  ;;  %v4249_v50 = vpack.i.bf16 %v6900_v60, %v1782_v22  ;;  %v1709_v32 = vld [vmem:[#allocation2 + $0x210] sm:$0xff] }
 0x2ce   :  { %v3911_v15 = vpop.permute.xlu0 %3910  ;;  %4215 = vrot.lane.b32.xlu1 %v4214_v6, %s4491_s0  ;;  %v4259_v1 = vpack.i.bf16 %v6908_v24, %v1799_v29  ;;  %v4269_v54 = vpack.i.bf16 %v6910_v20, %v1815_v33 }
 0x2cf   :  { %v3913_v57 = vunpack.i.h.bf16 %v3911_v15  ;;  %v3912_v3 = vunpack.i.l.bf16 %v3911_v15  ;;  %v2817_v58 = vsel %vm2816_vm6, %v2800_v9, %v3927_v45  ;;  %v2818_v5 = vsel %vm2816_vm6, %v2801_v11, %v3928_v43  ;;  %v6918_v43 = vld [vmem:[#allocation2 + $0x411] sm:$0xff]  ;;  %v6930_v11 = vld [vmem:[#allocation2 + $0x421] sm:$0xff] }
 0x2d0   :  { %4200 = vrot.lane.b32.xlu0 %v4199_v52, %s4490_s10  ;;  %v3936_v42 = vpop.permute.xlu1 %3935  ;;  %v2883_v52 = vsel %vm288_vm0, %v2867_v21, %v3893_v49  ;;  %v4244_v15 = vpack.i.bf16 %v1765_v53, %v6782_v10  ;;  %v4264_v49 = vpack.i.bf16 %v1799_v29, %v6796_v59  ;;  %v6932_v9 = vld [vmem:[#allocation2 + $0x4b1] sm:$0xff] }
 0x2d1   :  { %v3938_v55 = vunpack.i.h.bf16 %v3936_v42  ;;  %v3937_v51 = vunpack.i.l.bf16 %v3936_v42  ;;  %v2899_v28 = vsel %vm2782_vm4, %v2883_v52, %v3903_v4  ;;  %v2914_v0 = vsel %vm2799_vm5, %v2898_v63, %v3912_v3 }
 0x2d2   :  { %v3921_v12 = vpop.permute.xlu0 %3920  ;;  %4225 = vrot.lane.b32.xlu1 %v4224_v31, %s4486_s4  ;;  %v2915_v46 = vsel %vm2799_vm5, %v2899_v28, %v3913_v57  ;;  %v4274_v57 = vpack.i.bf16 %v1815_v33, %v6798_v62  ;;  %v4279_v3 = vpack.i.bf16 %v6915_v34, %v6913_v48  ;;  %v6941_v28 = vld [vmem:[#allocation2 + $0x220] sm:$0xff] }
 0x2d3   :  { %v3923_v14 = vunpack.i.h.bf16 %v3921_v12  ;;  %v3922_v27 = vunpack.i.l.bf16 %v3921_v12  ;;  %v2834_v13 = vsel %vm2833_vm7, %v2817_v58, %v3937_v51  ;;  %v4294_v51 = vpack.i.bf16 %v6918_v43, %v6809_v35 }
 0x2d4   :  { %4210 = vrot.lane.b32.xlu0 %v4209_v2, %s4491_s0  ;;  %v2835_v2 = vsel %vm2833_vm7, %v2818_v5, %v3938_v55  ;;  %v6874_v26 = vpop.permute.xlu1 %3945  ;;  %v4284_v55 = vpack.i.bf16 %v6913_v48, %v6804_v19  ;;  %v4289_v19 = vpack.i.bf16 %v6930_v11, %v6918_v43  ;;  %v4304_v35 = vpack.i.bf16 %v6932_v9, %v6876_v23 }
 0x2d5   :  { %v2930_v31 = vsel %vm2816_vm6, %v2914_v0, %v3922_v27  ;;  %v2931_v36 = vsel %vm2816_vm6, %v2915_v46, %v3923_v14  ;;  %v2962_v37 = vpack.c.bf16 %v2835_v2, %v2834_v13  ;;  %v3948_v45 = vunpack.i.h.bf16 %v6874_v26 }
 0x2d6   :  { %v3931_v47 = vpop.permute.xlu0 %3930  ;;  %4235 = vrot.lane.b32.xlu1 %v4234_v25, %s4485_s3  ;;  %v4239_v25 = vpack.i.bf16 %v6894_v18, %v1765_v53  ;;  %v3947_v4 = vunpack.i.l.bf16 %v6874_v26 }
 0x2d7   :  { %v3933_v6 = vunpack.i.h.bf16 %v3931_v47  ;;  %v3932_v16 = vunpack.i.l.bf16 %v3931_v47  ;;  %v2736_v63 = vsel %vm676_vm1, %v1709_v32, %v3948_v45 }
 0x2d8   :  { %4220 = vrot.lane.b32.xlu0 %v4219_v8, %s4486_s4  ;;  %v6892_v7 = vpop.permute.xlu1 %3955  ;;  %v2735_v47 = vsel %vm676_vm1, %v6827_v38, %v3947_v4 }
 0x2d9   :  { %v2946_v61 = vsel %vm2833_vm7, %v2930_v31, %v3932_v16  ;;  %v2947_v56 = vsel %vm2833_vm7, %v2931_v36, %v3933_v6  ;;  %v3958_v42 = vunpack.i.h.bf16 %v6892_v7  ;;  %v3957_v14 = vunpack.i.l.bf16 %v6892_v7 }
 0x2da   :  { %v3941_v39 = vpop.permute.xlu0 %3940  ;;  %v2963_v8 = vpack.c.bf16 %v2947_v56, %v2946_v61  ;;  %4245 = vrot.lane.b32.xlu1 %v4244_v15, %s4487_s28 }
 0x2db   :  { %v3943_v40 = vunpack.i.h.bf16 %v3941_v39  ;;  %v3942_v59 = vunpack.i.l.bf16 %v3941_v39  ;;  %v2752_v16 = vsel %vm2749_vm3, %v2735_v47, %v3957_v14  ;;  %v2753_v38 = vsel %vm2749_vm3, %v2736_v63, %v3958_v42 }
 0x2dc   :  { %4230 = vrot.lane.b32.xlu0 %v4229_v30, %s4485_s3  ;;  %3145 = vmatprep.mubr.bf16.mxu1 %v2963_v8  ;;  %v3966_v17 = vpop.permute.xlu1 %3965 }
 0x2dd   :  { %3146 = vmatmul.mubr.bf16.vlgmr.msra.gmra.mxu1 %v2962_v37  ;;  %v3968_v58 = vunpack.i.h.bf16 %v3966_v17  ;;  %v3967_v5 = vunpack.i.l.bf16 %v3966_v17  ;;  %v2853_v13 = vsel %vm676_vm1, %v6941_v28, %v3943_v40  ;;  %v2852_v2 = vsel %vm676_vm1, %v1709_v32, %v3942_v59 }
 0x2de   :  { %v3951_v44 = vpop.permute.xlu0 %3950  ;;  %4255 = vrot.lane.b32.xlu1 %v4254_v41, %s4488_s29 }
 0x2df   :  { %v3953_v62 = vunpack.i.h.bf16 %v3951_v44  ;;  %v3952_v52 = vunpack.i.l.bf16 %v3951_v44  ;;  %v2768_v23 = vsel %vm288_vm0, %v2752_v16, %v3967_v5  ;;  %v2769_v61 = vsel %vm288_vm0, %v2753_v38, %v3968_v58 }
 0x2e0   :  { %4240 = vrot.lane.b32.xlu0 %v4239_v25, %s4487_s28  ;;  %v3976_v21 = vpop.permute.xlu1 %3975 }
 0x2e1   :  { %v3978_v46 = vunpack.i.h.bf16 %v3976_v21  ;;  %v3977_v0 = vunpack.i.l.bf16 %v3976_v21  ;;  %v2868_v53 = vsel %vm2749_vm3, %v2852_v2, %v3952_v52  ;;  %v2869_v37 = vsel %vm2749_vm3, %v2853_v13, %v3953_v62  ;;  %v1767_v52 = vld [vmem:[#allocation2 + $0x412] sm:$0xff] }
 0x2e2   :  { %v6905_v10 = vpop.permute.xlu0 %3960  ;;  %4265 = vrot.lane.b32.xlu1 %v4264_v49, %s4489_s30 }
 0x2e3   :  { %v3963_v56 = vunpack.i.h.bf16 %v6905_v10  ;;  %v3962_v39 = vunpack.i.l.bf16 %v6905_v10  ;;  %v2785_v22 = vsel %vm2782_vm4, %v2768_v23, %v3977_v0  ;;  %v2786_v44 = vsel %vm2782_vm4, %v2769_v61, %v3978_v46  ;;  %v7012_v23 = vld [vmem:[#allocation2 + $0x391] sm:$0xff] }
 0x2e4   :  { %4250 = vrot.lane.b32.xlu0 %v4249_v50, %s4488_s29  ;;  %v3986_v27 = vpop.permute.xlu1 %3985  ;;  %v4314_v0 = vpack.i.bf16 %v1767_v52, %v6894_v18 }
 0x2e5   :  { %v3988_v26 = vunpack.i.h.bf16 %v3986_v27  ;;  %v3987_v31 = vunpack.i.l.bf16 %v3986_v27  ;;  %v2884_v43 = vsel %vm288_vm0, %v2868_v53, %v3962_v39  ;;  %v2885_v45 = vsel %vm288_vm0, %v2869_v37, %v3963_v56  ;;  %v7010_v53 = vld [vmem:[#allocation2 + $0x2f1] sm:$0xff]  ;;  %v1817_v37 = vld [vmem:[#allocation2 + $0x381] sm:$0xff] }
 0x2e6   :  { %v6925_v12 = vpop.permute.xlu0 %3970  ;;  %4275 = vrot.lane.b32.xlu1 %v4274_v57, %s4490_s10  ;;  %v7015_v39 = vld [vmem:[#allocation2 + $0x2e2] sm:$0xff] }
 0x2e7   :  { %v3973_v7 = vunpack.i.h.bf16 %v6925_v12  ;;  %v3972_v15 = vunpack.i.l.bf16 %v6925_v12  ;;  %v2802_v29 = vsel %vm2799_vm5, %v2785_v22, %v3987_v31  ;;  %v2803_v50 = vsel %vm2799_vm5, %v2786_v44, %v3988_v26  ;;  %v7002_v26 = vld [vmem:[#allocation2 + $0x390] sm:$0xff]  ;;  %v1801_v31 = vld [vmem:[#allocation2 + $0x2e1] sm:$0xff] }
 0x2e8   :  { %4260 = vrot.lane.b32.xlu0 %v4259_v1, %s4489_s30  ;;  %v3996_v36 = vpop.permute.xlu1 %3995  ;;  %v4334_v56 = vpack.i.bf16 %v1801_v31, %v6908_v24  ;;  %v4339_v22 = vpack.i.bf16 %v7012_v23, %v1817_v37 }
 0x2e9   :  { %v3998_v30 = vunpack.i.h.bf16 %v3996_v36  ;;  %v3997_v8 = vunpack.i.l.bf16 %v3996_v36  ;;  %v2901_v40 = vsel %vm2782_vm4, %v2885_v45, %v3973_v7 }
 0x2ea   :  { %v3981_v6 = vpop.permute.xlu0 %3980  ;;  %4285 = vrot.lane.b32.xlu1 %v4284_v55, %s4491_s0 }
 0x2eb   :  { %v3983_v17 = vunpack.i.h.bf16 %v3981_v6  ;;  %v3982_v41 = vunpack.i.l.bf16 %v3981_v6  ;;  %v2819_v4 = vsel %vm2816_vm6, %v2802_v29, %v3997_v8  ;;  %v2820_v1 = vsel %vm2816_vm6, %v2803_v50, %v3998_v30  ;;  %v7020_v30 = vld [vmem:[#allocation2 + $0x431] sm:$0xff]  ;;  %v7032_v29 = vld [vmem:[#allocation2 + $0x441] sm:$0xff] }
 0x2ec   :  { %4270 = vrot.lane.b32.xlu0 %v4269_v54, %s4490_s10  ;;  %v4006_v10 = vpop.permute.xlu1 %4005  ;;  %v2900_v54 = vsel %vm2782_vm4, %v2884_v43, %v3972_v15  ;;  %v4329_v15 = vpack.i.bf16 %v7010_v53, %v1801_v31  ;;  %v7034_v50 = vld [vmem:[#allocation2 + $0x4d1] sm:$0xff] }
 0x2ed   :  { %v4008_v49 = vunpack.i.h.bf16 %v4006_v10  ;;  %v4007_v48 = vunpack.i.l.bf16 %v4006_v10  ;;  %v2917_v42 = vsel %vm2799_vm5, %v2901_v40, %v3983_v17  ;;  %v4344_v17 = vpack.i.bf16 %v1817_v37, %v6910_v20  ;;  %v1711_v43 = vld [vmem:[#allocation2 + $0x230] sm:$0xff] }
 0x2ee   :  { %v3991_v25 = vpop.permute.xlu0 %3990  ;;  %4295 = vrot.lane.b32.xlu1 %v4294_v51, %s4486_s4  ;;  %v6984_v51 = vld [vmem:[#allocation2 + $0x4c1] sm:$0xff] }
 0x2ef   :  { %v3993_v33 = vunpack.i.h.bf16 %v3991_v25  ;;  %v3992_v21 = vunpack.i.l.bf16 %v3991_v25  ;;  %v2836_v12 = vsel %vm2833_vm7, %v2819_v4, %v4007_v48  ;;  %v2837_v57 = vsel %vm2833_vm7, %v2820_v1, %v4008_v49 }
 0x2f0   :  { %4280 = vrot.lane.b32.xlu0 %v4279_v3, %s4491_s0  ;;  %v2916_v3 = vsel %vm2799_vm5, %v2900_v54, %v3982_v41  ;;  %v6982_v55 = vpop.permute.xlu1 %4015  ;;  %v2964_v63 = vpack.c.bf16 %v2837_v57, %v2836_v12  ;;  %v4299_v13 = vpack.i.bf16 %v6984_v51, %v6932_v9  ;;  %v4354_v49 = vpack.i.bf16 %v7015_v39, %v6915_v34  ;;  %v7043_v54 = vld [vmem:[#allocation2 + $0x240] sm:$0xff] }
 0x2f1   :  { %v2932_v32 = vsel %vm2816_vm6, %v2916_v3, %v3992_v21  ;;  %v2933_v62 = vsel %vm2816_vm6, %v2917_v42, %v3993_v33  ;;  %v4018_v8 = vunpack.i.h.bf16 %v6982_v55  ;;  %v4017_v7 = vunpack.i.l.bf16 %v6982_v55 }
 0x2f2   :  { %v4001_v59 = vpop.permute.xlu0 %4000  ;;  %4305 = vrot.lane.b32.xlu1 %v4304_v35, %s4485_s3  ;;  %v1784_v35 = vld [vmem:[#allocation2 + $0x380] sm:$0xff]  ;;  %v4364_v48 = vpack.i.bf16 %v7020_v30, %v6930_v11  ;;  %v4359_v34 = vpack.i.bf16 %v7032_v29, %v7020_v30  ;;  %v4374_v11 = vpack.i.bf16 %v7034_v50, %v6984_v51 }
 0x2f3   :  { %v4003_v14 = vunpack.i.h.bf16 %v4001_v59  ;;  %v4002_v27 = vunpack.i.l.bf16 %v4001_v59  ;;  %v4324_v9 = vpack.i.bf16 %v1784_v35, %v6900_v60  ;;  %v4319_v36 = vpack.i.bf16 %v7002_v26, %v1784_v35  ;;  %v7017_v60 = vld [vmem:[#allocation2 + $0x2f2] sm:$0xff] }
 0x2f4   :  { %4290 = vrot.lane.b32.xlu0 %v4289_v19, %s4486_s4  ;;  %v6994_v46 = vpop.permute.xlu1 %4025  ;;  %v6996_v19 = vld [vmem:[#allocation2 + $0x422] sm:$0xff]  ;;  %v4349_v41 = vpack.i.bf16 %v7017_v60, %v7015_v39  ;;  %v2738_v40 = vsel %vm676_vm1, %v1711_v43, %v4018_v8  ;;  %v2737_v59 = vsel %vm676_vm1, %v6941_v28, %v4017_v7 }
 0x2f5   :  { %v2948_v58 = vsel %vm2833_vm7, %v2932_v32, %v4002_v27  ;;  %v2949_v5 = vsel %vm2833_vm7, %v2933_v62, %v4003_v14  ;;  %v4309_v16 = vpack.i.bf16 %v6996_v19, %v1767_v52  ;;  %v4028_v10 = vunpack.i.h.bf16 %v6994_v46 }
 0x2f6   :  { %v4011_v47 = vpop.permute.xlu0 %4010  ;;  %v2965_v2 = vpack.c.bf16 %v2949_v5, %v2948_v58  ;;  %4315 = vrot.lane.b32.xlu1 %v4314_v0, %s4487_s28  ;;  %v4027_v33 = vunpack.i.l.bf16 %v6994_v46 }
 0x2f7   :  { %v4013_v44 = vunpack.i.h.bf16 %v4011_v47  ;;  %v4012_v24 = vunpack.i.l.bf16 %v4011_v47  ;;  %v2755_v28 = vsel %vm2749_vm3, %v2738_v40, %v4028_v10 }
 0x2f8   :  { %4300 = vrot.lane.b32.xlu0 %v4299_v13, %s4485_s3  ;;  %3153 = vmatprep.mubr.bf16.mxu1 %v2965_v2  ;;  %v4036_v38 = vpop.permute.xlu1 %4035  ;;  %v2754_v27 = vsel %vm2749_vm3, %v2737_v59, %v4027_v33 }
 0x2f9   :  { %3154 = vmatmul.mubr.bf16.gmra.mxu1 %v2964_v63  ;;  %v4038_v4 = vunpack.i.h.bf16 %v4036_v38  ;;  %v4037_v1 = vunpack.i.l.bf16 %v4036_v38  ;;  %v2855_v12 = vsel %vm676_vm1, %v7043_v54, %v4013_v44  ;;  %v2854_v57 = vsel %vm676_vm1, %v1711_v43, %v4012_v24 }
 0x2fa   :  { %v4021_v6 = vpop.permute.xlu0 %4020  ;;  %4325 = vrot.lane.b32.xlu1 %v4324_v9, %s4488_s29 }
 0x2fb   :  { %v4023_v20 = vunpack.i.h.bf16 %v4021_v6  ;;  %v4022_v45 = vunpack.i.l.bf16 %v4021_v6  ;;  %v2770_v51 = vsel %vm288_vm0, %v2754_v27, %v4037_v1  ;;  %v2771_v5 = vsel %vm288_vm0, %v2755_v28, %v4038_v4  ;;  %v1787_v28 = vld [vmem:[#allocation2 + $0x3b0] sm:$0xff] }
 0x2fc   :  { %4310 = vrot.lane.b32.xlu0 %v4309_v16, %s4487_s28  ;;  %v4046_v61 = vpop.permute.xlu1 %4045 }
 0x2fd   :  { %v4048_v3 = vunpack.i.h.bf16 %v4046_v61  ;;  %v4047_v42 = vunpack.i.l.bf16 %v4046_v61  ;;  %v2870_v52 = vsel %vm2749_vm3, %v2854_v57, %v4022_v45  ;;  %v2871_v58 = vsel %vm2749_vm3, %v2855_v12, %v4023_v20  ;;  %v1769_v20 = vld [vmem:[#allocation2 + $0x432] sm:$0xff] }
 0x2fe   :  { %v7007_v18 = vpop.permute.xlu0 %4030  ;;  %4335 = vrot.lane.b32.xlu1 %v4334_v56, %s4489_s30 }
 0x2ff   :  { %v4033_v63 = vunpack.i.h.bf16 %v7007_v18  ;;  %v4032_v47 = vunpack.i.l.bf16 %v7007_v18  ;;  %v2787_v35 = vsel %vm2782_vm4, %v2770_v51, %v4047_v42  ;;  %v2788_v6 = vsel %vm2782_vm4, %v2771_v5, %v4048_v3  ;;  %v1770_v3 = vld [vmem:[#allocation2 + $0x442] sm:$0xff]  ;;  %v1820_v5 = vld [vmem:[#allocation2 + $0x3b1] sm:$0xff] }
 0x300   :  { %4320 = vrot.lane.b32.xlu0 %v4319_v36, %s4488_s29  ;;  %v4056_v21 = vpop.permute.xlu1 %4055  ;;  %v4384_v42 = vpack.i.bf16 %v1769_v20, %v6996_v19  ;;  %v1819_v51 = vld [vmem:[#allocation2 + $0x3a1] sm:$0xff] }
 0x301   :  { %v4058_v55 = vunpack.i.h.bf16 %v4056_v21  ;;  %v4057_v32 = vunpack.i.l.bf16 %v4056_v21  ;;  %v2886_v30 = vsel %vm288_vm0, %v2870_v52, %v4032_v47  ;;  %v2887_v8 = vsel %vm288_vm0, %v2871_v58, %v4033_v63  ;;  %v1804_v52 = vld [vmem:[#allocation2 + $0x311] sm:$0xff] }
 0x302   :  { %v7027_v25 = vpop.permute.xlu0 %4040  ;;  %4345 = vrot.lane.b32.xlu1 %v4344_v17, %s4490_s10 }
 0x303   :  { %v4043_v46 = vunpack.i.h.bf16 %v7027_v25  ;;  %v4042_v0 = vunpack.i.l.bf16 %v7027_v25  ;;  %v2804_v31 = vsel %vm2799_vm5, %v2787_v35, %v4057_v32  ;;  %v2805_v36 = vsel %vm2799_vm5, %v2788_v6, %v4058_v55  ;;  %v1836_v35 = vld [vmem:[#allocation2 + $0x312] sm:$0xff] }
 0x304   :  { %4330 = vrot.lane.b32.xlu0 %v4329_v15, %s4489_s30  ;;  %v4066_v62 = vpop.permute.xlu1 %4065 }
 0x305   :  { %v4068_v13 = vunpack.i.h.bf16 %v4066_v62  ;;  %v4067_v2 = vunpack.i.l.bf16 %v4066_v62  ;;  %v2903_v44 = vsel %vm2782_vm4, %v2887_v8, %v4043_v46 }
 0x306   :  { %v4051_v14 = vpop.permute.xlu0 %4050  ;;  %4355 = vrot.lane.b32.xlu1 %v4354_v49, %s4491_s0  ;;  %v1754_v49 = vld [vmem:[#allocation2 + $0x4e1] sm:$0xff] }
 0x307   :  { %v4053_v38 = vunpack.i.h.bf16 %v4051_v14  ;;  %v4052_v9 = vunpack.i.l.bf16 %v4051_v14  ;;  %v2821_v7 = vsel %vm2816_vm6, %v2804_v31, %v4067_v2  ;;  %v2822_v15 = vsel %vm2816_vm6, %v2805_v36, %v4068_v13  ;;  %v1713_v31 = vld [vmem:[#allocation2 + $0x250] sm:$0xff] }
 0x308   :  { %4340 = vrot.lane.b32.xlu0 %v4339_v22, %s4490_s10  ;;  %v4076_v18 = vpop.permute.xlu1 %4075  ;;  %v2902_v22 = vsel %vm2782_vm4, %v2886_v30, %v4042_v0  ;;  %v4369_v59 = vpack.i.bf16 %v1754_v49, %v7034_v50  ;;  %v4379_v14 = vpack.i.bf16 %v1770_v3, %v1769_v20  ;;  %v1803_v50 = vld [vmem:[#allocation2 + $0x301] sm:$0xff] }
 0x309   :  { %v4078_v56 = vunpack.i.h.bf16 %v4076_v18  ;;  %v4077_v39 = vunpack.i.l.bf16 %v4076_v18  ;;  %v2919_v29 = vsel %vm2799_vm5, %v2903_v44, %v4053_v38  ;;  %v4404_v58 = vpack.i.bf16 %v1803_v50, %v7010_v53  ;;  %v1835_v0 = vld [vmem:[#allocation2 + $0x302] sm:$0xff] }
 0x30a   :  { %v4061_v16 = vpop.permute.xlu0 %4060  ;;  %4365 = vrot.lane.b32.xlu1 %v4364_v48, %s4486_s4  ;;  %v4399_v46 = vpack.i.bf16 %v1804_v52, %v1803_v50  ;;  %v4414_v53 = vpack.i.bf16 %v1819_v51, %v7012_v23  ;;  %v4419_v8 = vpack.i.bf16 %v1836_v35, %v1835_v0 }
 0x30b   :  { %v4063_v37 = vunpack.i.h.bf16 %v4061_v16  ;;  %v4062_v61 = vunpack.i.l.bf16 %v4061_v16  ;;  %v2838_v25 = vsel %vm2833_vm7, %v2821_v7, %v4077_v39  ;;  %v2839_v17 = vsel %vm2833_vm7, %v2822_v15, %v4078_v56  ;;  %v1714_v56 = vld [vmem:[#allocation2 + $0x260] sm:$0xff] }
 0x30c   :  { %4350 = vrot.lane.b32.xlu0 %v4349_v41, %s4491_s0  ;;  %v2918_v41 = vsel %vm2799_vm5, %v2902_v22, %v4052_v9  ;;  %v4086_v21 = vpop.permute.xlu1 %4085  ;;  %v2966_v1 = vpack.c.bf16 %v2839_v17, %v2838_v25  ;;  %v4409_v9 = vpack.i.bf16 %v1820_v5, %v1819_v51  ;;  %v4424_v7 = vpack.i.bf16 %v1835_v0, %v7017_v60 }
 0x30d   :  { %v2934_v43 = vsel %vm2816_vm6, %v2918_v41, %v4062_v61  ;;  %v2935_v48 = vsel %vm2816_vm6, %v2919_v29, %v4063_v37  ;;  %v4088_v63 = vunpack.i.h.bf16 %v4086_v21  ;;  %v4087_v47 = vunpack.i.l.bf16 %v4086_v21 }
 0x30e   :  { %v4071_v24 = vpop.permute.xlu0 %4070  ;;  %4375 = vrot.lane.b32.xlu1 %v4374_v11, %s4485_s3 }
 0x30f   :  { %v4073_v10 = vunpack.i.h.bf16 %v4071_v24  ;;  %v4072_v33 = vunpack.i.l.bf16 %v4071_v24  ;;  %v2740_v39 = vsel %vm676_vm1, %v1713_v31, %v4088_v63  ;;  %v2739_v30 = vsel %vm676_vm1, %v7043_v54, %v4087_v47 }
 0x310   :  { %4360 = vrot.lane.b32.xlu0 %v4359_v34, %s4486_s4  ;;  %v4096_v57 = vpop.permute.xlu1 %4095  ;;  %v1786_v34 = vld [vmem:[#allocation2 + $0x3a0] sm:$0xff] }
 0x311   :  { %v2950_v45 = vsel %vm2833_vm7, %v2934_v43, %v4072_v33  ;;  %v2951_v4 = vsel %vm2833_vm7, %v2935_v48, %v4073_v10  ;;  %v4394_v55 = vpack.i.bf16 %v1786_v34, %v7002_v26  ;;  %v4389_v19 = vpack.i.bf16 %v1787_v28, %v1786_v34 }
 0x312   :  { %v4081_v40 = vpop.permute.xlu0 %4080  ;;  %v2967_v12 = vpack.c.bf16 %v2951_v4, %v2950_v45  ;;  %4385 = vrot.lane.b32.xlu1 %v4384_v42, %s4487_s28  ;;  %v4098_v6 = vunpack.i.h.bf16 %v4096_v57  ;;  %v4097_v16 = vunpack.i.l.bf16 %v4096_v57 }
 0x313   :  { %v4083_v26 = vunpack.i.h.bf16 %v4081_v40  ;;  %v4082_v13 = vunpack.i.l.bf16 %v4081_v40 }
 0x314   :  { %4370 = vrot.lane.b32.xlu0 %v4369_v59, %s4485_s3  ;;  %3161 = vmatprep.mubr.bf16.mxu1 %v2967_v12  ;;  %v4106_v27 = vpop.permute.xlu1 %4105  ;;  %v2756_v25 = vsel %vm2749_vm3, %v2739_v30, %v4097_v16  ;;  %v2757_v17 = vsel %vm2749_vm3, %v2740_v39, %v4098_v6 }
 0x315   :  { %3162 = vmatmul.mubr.bf16.gmra.mxu1 %v2966_v1  ;;  %v4108_v37 = vunpack.i.h.bf16 %v4106_v27  ;;  %v4107_v61 = vunpack.i.l.bf16 %v4106_v27  ;;  %v2857_v23 = vsel %vm676_vm1, %v1714_v56, %v4083_v26  ;;  %v2856_v15 = vsel %vm676_vm1, %v1713_v31, %v4082_v13 }
 0x316   :  { %v4091_v11 = vpop.permute.xlu0 %4090  ;;  %4395 = vrot.lane.b32.xlu1 %v4394_v55, %s4488_s29 }
 0x317   :  { %v4093_v36 = vunpack.i.h.bf16 %v4091_v11  ;;  %v4092_v18 = vunpack.i.l.bf16 %v4091_v11  ;;  %v2772_v60 = vsel %vm288_vm0, %v2756_v25, %v4107_v61  ;;  %v2773_v21 = vsel %vm288_vm0, %v2757_v17, %v4108_v37 }
 0x318   :  { %4380 = vrot.lane.b32.xlu0 %v4379_v14, %s4487_s28  ;;  %v4116_v62 = vpop.permute.xlu1 %4115 }
 0x319   :  { %v4118_v22 = vunpack.i.h.bf16 %v4116_v62  ;;  %v4117_v44 = vunpack.i.l.bf16 %v4116_v62  ;;  %v2872_v54 = vsel %vm2749_vm3, %v2856_v15, %v4092_v18  ;;  %v2873_v33 = vsel %vm2749_vm3, %v2857_v23, %v4093_v36 }
 0x31a   :  { %v7097_v32 = vpop.permute.xlu0 %4100  ;;  %4405 = vrot.lane.b32.xlu1 %v4404_v58, %s4489_s30 }
 0x31b   :  { %v4103_v49 = vunpack.i.h.bf16 %v7097_v32  ;;  %v4102_v43 = vunpack.i.l.bf16 %v7097_v32  ;;  %v2789_v1 = vsel %vm2782_vm4, %v2772_v60, %v4117_v44  ;;  %v2790_v40 = vsel %vm2782_vm4, %v2773_v21, %v4118_v22  ;;  %v1715_v44 = vld [vmem:[#allocation2 + $0x470] sm:$0xff] }
 0x31c   :  { %4390 = vrot.lane.b32.xlu0 %v4389_v19, %s4488_s29  ;;  %v4126_v38 = vpop.permute.xlu1 %4125 }
 0x31d   :  { %v4128_v41 = vunpack.i.h.bf16 %v4126_v38  ;;  %v4127_v29 = vunpack.i.l.bf16 %v4126_v38  ;;  %v2888_v55 = vsel %vm288_vm0, %v2872_v54, %v4102_v43  ;;  %v2889_v50 = vsel %vm288_vm0, %v2873_v33, %v4103_v49 }
 0x31e   :  { %v7102_v2 = vpop.permute.xlu0 %4110  ;;  %4415 = vrot.lane.b32.xlu1 %v4414_v53, %s4490_s10 }
 0x31f   :  { %v4113_v45 = vunpack.i.h.bf16 %v7102_v2  ;;  %v4112_v4 = vunpack.i.l.bf16 %v7102_v2  ;;  %v2806_v3 = vsel %vm2799_vm5, %v2789_v1, %v4127_v29  ;;  %v2807_v42 = vsel %vm2799_vm5, %v2790_v40, %v4128_v41  ;;  %v7144_v29 = vld [vmem:[#allocation2 + $0x480] sm:$0xff] }
 0x320   :  { %4400 = vrot.lane.b32.xlu0 %v4399_v46, %s4489_s30  ;;  %v4136_v10 = vpop.permute.xlu1 %4135 }
 0x321   :  { %v4138_v48 = vunpack.i.h.bf16 %v4136_v10  ;;  %v4137_v20 = vunpack.i.l.bf16 %v4136_v10  ;;  %v2904_v62 = vsel %vm2782_vm4, %v2888_v55, %v4112_v4  ;;  %v2905_v52 = vsel %vm2782_vm4, %v2889_v50, %v4113_v45 }
 0x322   :  { %v4121_v24 = vpop.permute.xlu0 %4120  ;;  %4425 = vrot.lane.b32.xlu1 %v4424_v7, %s4491_s0 }
 0x323   :  { %v4123_v12 = vunpack.i.h.bf16 %v4121_v24  ;;  %v4122_v57 = vunpack.i.l.bf16 %v4121_v24  ;;  %v2823_v32 = vsel %vm2816_vm6, %v2806_v3, %v4137_v20  ;;  %v2824_v19 = vsel %vm2816_vm6, %v2807_v42, %v4138_v48 }
 0x324   :  { %4410 = vrot.lane.b32.xlu0 %v4409_v9, %s4490_s10  ;;  %v4146_v34 = vpop.permute.xlu1 %4145 }
 0x325   :  { %v4148_v27 = vunpack.i.h.bf16 %v4146_v34  ;;  %v4147_v28 = vunpack.i.l.bf16 %v4146_v34  ;;  %v2920_v63 = vsel %vm2799_vm5, %v2904_v62, %v4122_v57  ;;  %v2921_v47 = vsel %vm2799_vm5, %v2905_v52, %v4123_v12 }
 0x326   :  { %v4131_v59 = vpop.permute.xlu0 %4130 }
 0x327   :  { %v4133_v11 = vunpack.i.h.bf16 %v4131_v59  ;;  %v4132_v14 = vunpack.i.l.bf16 %v4131_v59  ;;  %v2840_v51 = vsel %vm2833_vm7, %v2823_v32, %v4147_v28  ;;  %v2841_v5 = vsel %vm2833_vm7, %v2824_v19, %v4148_v27 }
 0x328   :  { %4420 = vrot.lane.b32.xlu0 %v4419_v8, %s4491_s0  ;;  %v4156_v2 = vpop.permute.xlu1 %4155  ;;  %v2968_v16 = vpack.c.bf16 %v2841_v5, %v2840_v51  ;;  %v1586_v8 = vld [vmem:[#allocation2 + $0x460] sm:$0xff] }
 0x329   :  { %v2936_v46 = vsel %vm2816_vm6, %v2920_v63, %v4132_v14  ;;  %v2937_v0 = vsel %vm2816_vm6, %v2921_v47, %v4133_v11  ;;  %v4158_v61 = vunpack.i.h.bf16 %v4156_v2  ;;  %v4157_v56 = vunpack.i.l.bf16 %v4156_v2 }
 0x32a   :  { %v4141_v58 = vpop.permute.xlu0 %4140 }
 0x32b   :  { %v4143_v26 = vunpack.i.h.bf16 %v4141_v58  ;;  %v4142_v13 = vunpack.i.l.bf16 %v4141_v58  ;;  %v2742_v10 = vsel %vm676_vm1, %v1715_v44, %v4158_v61  ;;  %v2741_v54 = vsel %vm676_vm1, %v1586_v8, %v4157_v56 }
 0x32c   :  { %v4166_v53 = vpop.permute.xlu1 %4165 }
 0x32d   :  { %v2952_v35 = vsel %vm2833_vm7, %v2936_v46, %v4142_v13  ;;  %v2953_v6 = vsel %vm2833_vm7, %v2937_v0, %v4143_v26  ;;  %v4168_v23 = vunpack.i.h.bf16 %v4166_v53  ;;  %v4167_v15 = vunpack.i.l.bf16 %v4166_v53 }
 0x32e   :  { %v4151_v38 = vpop.permute.xlu0 %4150  ;;  %v2969_v9 = vpack.c.bf16 %v2953_v6, %v2952_v35 }
 0x32f   :  { %v4153_v39 = vunpack.i.h.bf16 %v4151_v38  ;;  %v4152_v30 = vunpack.i.l.bf16 %v4151_v38  ;;  %v2758_v48 = vsel %vm2749_vm3, %v2741_v54, %v4167_v15  ;;  %v2759_v20 = vsel %vm2749_vm3, %v2742_v10, %v4168_v23 }
 0x330   :  { %3169 = vmatprep.mubr.bf16.mxu1 %v2969_v9  ;;  %v4176_v36 = vpop.permute.xlu1 %4175 }
 0x331   :  { %3170 = vmatmul.mubr.bf16.gmra.mxu1 %v2968_v16  ;;  %v4178_v17 = vunpack.i.h.bf16 %v4176_v36  ;;  %v4177_v41 = vunpack.i.l.bf16 %v4176_v36  ;;  %v2859_v33 = vsel %vm676_vm1, %v7144_v29, %v4153_v39  ;;  %v2858_v60 = vsel %vm676_vm1, %v1715_v44, %v4152_v30 }
 0x332   :  { %v4161_v31 = vpop.permute.xlu0 %4160 }
 0x333   :  { %v4163_v24 = vunpack.i.h.bf16 %v4161_v31  ;;  %v4162_v25 = vunpack.i.l.bf16 %v4161_v31  ;;  %v2774_v12 = vsel %vm288_vm0, %v2758_v48, %v4177_v41  ;;  %v2775_v57 = vsel %vm288_vm0, %v2759_v20, %v4178_v17 }
 0x334   :  { %v4186_v37 = vpop.permute.xlu1 %4185 }
 0x335   :  { %v4188_v21 = vunpack.i.h.bf16 %v4186_v37  ;;  %v4187_v49 = vunpack.i.l.bf16 %v4186_v37  ;;  %v2874_v40 = vsel %vm2749_vm3, %v2858_v60, %v4162_v25  ;;  %v2875_v59 = vsel %vm2749_vm3, %v2859_v33, %v4163_v24 }
 0x336   :  { %v4171_v18 = vpop.permute.xlu0 %4170 }
 0x337   :  { %v4173_v3 = vunpack.i.h.bf16 %v4171_v18  ;;  %v4172_v42 = vunpack.i.l.bf16 %v4171_v18  ;;  %v2791_v28 = vsel %vm2782_vm4, %v2774_v12, %v4187_v49  ;;  %v2792_v55 = vsel %vm2782_vm4, %v2775_v57, %v4188_v21  ;;  %v1717_v49 = vld [vmem:[#allocation2 + $0x490] sm:$0xff] }
 0x338   :  { %v4196_v22 = vpop.permute.xlu1 %4195 }
 0x339   :  { %v4198_v45 = vunpack.i.h.bf16 %v4196_v22  ;;  %v4197_v4 = vunpack.i.l.bf16 %v4196_v22  ;;  %v2890_v26 = vsel %vm288_vm0, %v2874_v40, %v4172_v42  ;;  %v2891_v13 = vsel %vm288_vm0, %v2875_v59, %v4173_v3 }
 0x33a   :  { %v4181_v7 = vpop.permute.xlu0 %4180 }
 0x33b   :  { %v4183_v14 = vunpack.i.h.bf16 %v4181_v7  ;;  %v4182_v27 = vunpack.i.l.bf16 %v4181_v7  ;;  %v2808_v62 = vsel %vm2799_vm5, %v2791_v28, %v4197_v4  ;;  %v2809_v52 = vsel %vm2799_vm5, %v2792_v55, %v4198_v45  ;;  %v7175_v4 = vld [vmem:[#allocation2 + $0x4a0] sm:$0xff] }
 0x33c   :  { %v4206_v1 = vpop.permute.xlu1 %4205 }
 0x33d   :  { %v4208_v34 = vunpack.i.h.bf16 %v4206_v1  ;;  %v4207_v11 = vunpack.i.l.bf16 %v4206_v1  ;;  %v2906_v0 = vsel %vm2782_vm4, %v2890_v26, %v4182_v27  ;;  %v2907_v35 = vsel %vm2782_vm4, %v2891_v13, %v4183_v14 }
 0x33e   :  { %v4191_v43 = vpop.permute.xlu0 %4190 }
 0x33f   :  { %v4193_v32 = vunpack.i.h.bf16 %v4191_v43  ;;  %v4192_v19 = vunpack.i.l.bf16 %v4191_v43  ;;  %v2825_v2 = vsel %vm2816_vm6, %v2808_v62, %v4207_v11  ;;  %v2826_v46 = vsel %vm2816_vm6, %v2809_v52, %v4208_v34 }
 0x340   :  { %v4216_v58 = vpop.permute.xlu1 %4215 }
 0x341   :  { %v4218_v63 = vunpack.i.h.bf16 %v4216_v58  ;;  %v4217_v47 = vunpack.i.l.bf16 %v4216_v58  ;;  %v2922_v9 = vsel %vm2799_vm5, %v2906_v0, %v4192_v19  ;;  %v2923_v53 = vsel %vm2799_vm5, %v2907_v35, %v4193_v32 }
 0x342   :  { %v4201_v50 = vpop.permute.xlu0 %4200 }
 0x343   :  { %v4203_v51 = vunpack.i.h.bf16 %v4201_v50  ;;  %v4202_v5 = vunpack.i.l.bf16 %v4201_v50  ;;  %v2842_v16 = vsel %vm2833_vm7, %v2825_v2, %v4217_v47  ;;  %v2843_v38 = vsel %vm2833_vm7, %v2826_v46, %v4218_v63 }
 0x344   :  { %v4226_v18 = vpop.permute.xlu1 %4225  ;;  %v2970_v30 = vpack.c.bf16 %v2843_v38, %v2842_v16 }
 0x345   :  { %v2938_v37 = vsel %vm2816_vm6, %v2922_v9, %v4202_v5  ;;  %v2939_v61 = vsel %vm2816_vm6, %v2923_v53, %v4203_v51  ;;  %v4228_v25 = vunpack.i.h.bf16 %v4226_v18  ;;  %v4227_v17 = vunpack.i.l.bf16 %v4226_v18 }
 0x346   :  { %v4211_v6 = vpop.permute.xlu0 %4210 }
 0x347   :  { %v4213_v31 = vunpack.i.h.bf16 %v4211_v6  ;;  %v4212_v36 = vunpack.i.l.bf16 %v4211_v6  ;;  %v2744_v1 = vsel %vm676_vm1, %v1717_v49, %v4228_v25  ;;  %v2743_v40 = vsel %vm676_vm1, %v7144_v29, %v4227_v17 }
 0x348   :  { %v4236_v23 = vpop.permute.xlu1 %4235 }
 0x349   :  { %v2954_v56 = vsel %vm2833_vm7, %v2938_v37, %v4212_v36  ;;  %v2955_v39 = vsel %vm2833_vm7, %v2939_v61, %v4213_v31  ;;  %v4238_v33 = vunpack.i.h.bf16 %v4236_v23  ;;  %v4237_v60 = vunpack.i.l.bf16 %v4236_v23 }
 0x34a   :  { %v4221_v8 = vpop.permute.xlu0 %4220  ;;  %v2971_v7 = vpack.c.bf16 %v2955_v39, %v2954_v56 }
 0x34b   :  { %v4223_v41 = vunpack.i.h.bf16 %v4221_v8  ;;  %v4222_v10 = vunpack.i.l.bf16 %v4221_v8  ;;  %v2760_v34 = vsel %vm2749_vm3, %v2743_v40, %v4237_v60  ;;  %v2761_v11 = vsel %vm2749_vm3, %v2744_v1, %v4238_v33 }
 0x34c   :  { %3177 = vmatprep.mubr.bf16.mxu1 %v2971_v7  ;;  %v4246_v22 = vpop.permute.xlu1 %4245 }
 0x34d   :  { %3178 = vmatmul.mubr.bf16.gmra.mxu1 %v2970_v30  ;;  %v4248_v20 = vunpack.i.h.bf16 %v4246_v22  ;;  %v4247_v45 = vunpack.i.l.bf16 %v4246_v22  ;;  %v2861_v59 = vsel %vm676_vm1, %v7175_v4, %v4223_v41  ;;  %v2860_v12 = vsel %vm676_vm1, %v1717_v49, %v4222_v10 }
 0x34e   :  { %v4231_v15 = vpop.permute.xlu0 %4230 }
 0x34f   :  { %v4233_v43 = vunpack.i.h.bf16 %v4231_v15  ;;  %v4232_v48 = vunpack.i.l.bf16 %v4231_v15  ;;  %v2776_v29 = vsel %vm288_vm0, %v2760_v34, %v4247_v45  ;;  %v2777_v32 = vsel %vm288_vm0, %v2761_v11, %v4248_v20 }
 0x350   :  { %v4256_v24 = vpop.permute.xlu1 %4255 }
 0x351   :  { %v4258_v57 = vunpack.i.h.bf16 %v4256_v24  ;;  %v4257_v3 = vunpack.i.l.bf16 %v4256_v24  ;;  %v2876_v55 = vsel %vm2749_vm3, %v2860_v12, %v4232_v48  ;;  %v2877_v50 = vsel %vm2749_vm3, %v2861_v59, %v4233_v43 }
 0x352   :  { %v4241_v44 = vpop.permute.xlu0 %4240 }
 0x353   :  { %v4243_v19 = vunpack.i.h.bf16 %v4241_v44  ;;  %v4242_v62 = vunpack.i.l.bf16 %v4241_v44  ;;  %v2793_v63 = vsel %vm2782_vm4, %v2776_v29, %v4257_v3  ;;  %v2794_v47 = vsel %vm2782_vm4, %v2777_v32, %v4258_v57  ;;  %v1719_v3 = vld [vmem:[#allocation2 + $0x4b0] sm:$0xff] }
 0x354   :  { %v4266_v21 = vpop.permute.xlu1 %4265 }
 0x355   :  { %v4268_v14 = vunpack.i.h.bf16 %v4266_v21  ;;  %v4267_v27 = vunpack.i.l.bf16 %v4266_v21  ;;  %v2892_v53 = vsel %vm288_vm0, %v2876_v55, %v4242_v62  ;;  %v2893_v31 = vsel %vm288_vm0, %v2877_v50, %v4243_v19 }
 0x356   :  { %v4251_v54 = vpop.permute.xlu0 %4250 }
 0x357   :  { %v4253_v51 = vunpack.i.h.bf16 %v4251_v54  ;;  %v4252_v5 = vunpack.i.l.bf16 %v4251_v54  ;;  %v2810_v46 = vsel %vm2799_vm5, %v2793_v63, %v4267_v27  ;;  %v2811_v0 = vsel %vm2799_vm5, %v2794_v47, %v4268_v14  ;;  %v7207_v27 = vld [vmem:[#allocation2 + $0x4c0] sm:$0xff] }
 0x358   :  { %v4276_v28 = vpop.permute.xlu1 %4275 }
 0x359   :  { %v4278_v52 = vunpack.i.h.bf16 %v4276_v28  ;;  %v4277_v58 = vunpack.i.l.bf16 %v4276_v28  ;;  %v2908_v37 = vsel %vm2782_vm4, %v2892_v53, %v4252_v5  ;;  %v2909_v61 = vsel %vm2782_vm4, %v2893_v31, %v4253_v51 }
 0x35a   :  { %v4261_v42 = vpop.permute.xlu0 %4260 }
 0x35b   :  { %v4263_v13 = vunpack.i.h.bf16 %v4261_v42  ;;  %v4262_v2 = vunpack.i.l.bf16 %v4261_v42  ;;  %v2827_v36 = vsel %vm2816_vm6, %v2810_v46, %v4277_v58  ;;  %v2828_v18 = vsel %vm2816_vm6, %v2811_v0, %v4278_v52 }
 0x35c   :  { %v4286_v35 = vpop.permute.xlu1 %4285 }
 0x35d   :  { %v4288_v38 = vunpack.i.h.bf16 %v4286_v35  ;;  %v4287_v9 = vunpack.i.l.bf16 %v4286_v35  ;;  %v2924_v8 = vsel %vm2799_vm5, %v2908_v37, %v4262_v2  ;;  %v2925_v7 = vsel %vm2799_vm5, %v2909_v61, %v4263_v13 }
 0x35e   :  { %v4271_v26 = vpop.permute.xlu0 %4270 }
 0x35f   :  { %v4273_v6 = vunpack.i.h.bf16 %v4271_v26  ;;  %v4272_v16 = vunpack.i.l.bf16 %v4271_v26  ;;  %v2844_v39 = vsel %vm2833_vm7, %v2827_v36, %v4287_v9  ;;  %v2845_v30 = vsel %vm2833_vm7, %v2828_v18, %v4288_v38 }
 0x360   :  { %v4296_v22 = vpop.permute.xlu1 %4295  ;;  %v2972_v41 = vpack.c.bf16 %v2845_v30, %v2844_v39 }
 0x361   :  { %v2940_v44 = vsel %vm2816_vm6, %v2924_v8, %v4272_v16  ;;  %v2941_v24 = vsel %vm2816_vm6, %v2925_v7, %v4273_v6  ;;  %v4298_v48 = vunpack.i.h.bf16 %v4296_v22  ;;  %v4297_v20 = vunpack.i.l.bf16 %v4296_v22 }
 0x362   :  { %v4281_v56 = vpop.permute.xlu0 %4280 }
 0x363   :  { %v4283_v23 = vunpack.i.h.bf16 %v4281_v56  ;;  %v4282_v15 = vunpack.i.l.bf16 %v4281_v56  ;;  %v2746_v28 = vsel %vm676_vm1, %v1719_v3, %v4298_v48  ;;  %v2745_v55 = vsel %vm676_vm1, %v7175_v4, %v4297_v20 }
 0x364   :  { %v4306_v33 = vpop.permute.xlu1 %4305 }
 0x365   :  { %v2956_v25 = vsel %vm2833_vm7, %v2940_v44, %v4282_v15  ;;  %v2957_v17 = vsel %vm2833_vm7, %v2941_v24, %v4283_v23  ;;  %v4308_v59 = vunpack.i.h.bf16 %v4306_v33  ;;  %v4307_v12 = vunpack.i.l.bf16 %v4306_v33 }
 0x366   :  { %v4291_v10 = vpop.permute.xlu0 %4290  ;;  %v2973_v54 = vpack.c.bf16 %v2957_v17, %v2956_v25 }
 0x367   :  { %v4293_v45 = vunpack.i.h.bf16 %v4291_v10  ;;  %v4292_v1 = vunpack.i.l.bf16 %v4291_v10  ;;  %v2762_v52 = vsel %vm2749_vm3, %v2745_v55, %v4307_v12  ;;  %v2763_v58 = vsel %vm2749_vm3, %v2746_v28, %v4308_v59 }
 0x368   :  { %3185 = vmatprep.mubr.bf16.mxu1 %v2973_v54  ;;  %v4316_v21 = vpop.permute.xlu1 %4315 }
 0x369   :  { %3186 = vmatmul.mubr.bf16.gmra.mxu1 %v2972_v41  ;;  %v4318_v11 = vunpack.i.h.bf16 %v4316_v21  ;;  %v4317_v14 = vunpack.i.l.bf16 %v4316_v21  ;;  %v2863_v50 = vsel %vm676_vm1, %v7207_v27, %v4293_v45  ;;  %v2862_v29 = vsel %vm676_vm1, %v1719_v3, %v4292_v1 }
 0x36a   :  { %v4301_v60 = vpop.permute.xlu0 %4300 }
 0x36b   :  { %v4303_v42 = vunpack.i.h.bf16 %v4301_v60  ;;  %v4302_v34 = vunpack.i.l.bf16 %v4301_v60  ;;  %v2778_v4 = vsel %vm288_vm0, %v2762_v52, %v4317_v14  ;;  %v2779_v13 = vsel %vm288_vm0, %v2763_v58, %v4318_v11 }
 0x36c   :  { %v4326_v43 = vpop.permute.xlu1 %4325 }
 0x36d   :  { %v4328_v32 = vunpack.i.h.bf16 %v4326_v43  ;;  %v4327_v19 = vunpack.i.l.bf16 %v4326_v43  ;;  %v2878_v47 = vsel %vm2749_vm3, %v2862_v29, %v4302_v34  ;;  %v2879_v26 = vsel %vm2749_vm3, %v2863_v50, %v4303_v42 }
 0x36e   :  { %v4311_v49 = vpop.permute.xlu0 %4310 }
 0x36f   :  { %v4313_v2 = vunpack.i.h.bf16 %v4311_v49  ;;  %v4312_v46 = vunpack.i.l.bf16 %v4311_v49  ;;  %v2795_v38 = vsel %vm2782_vm4, %v2778_v4, %v4327_v19  ;;  %v2796_v9 = vsel %vm2782_vm4, %v2779_v13, %v4328_v32  ;;  %v1721_v19 = vld [vmem:[#allocation2 + $0x4d0] sm:$0xff] }
 0x370   :  { %v4336_v57 = vpop.permute.xlu1 %4335 }
 0x371   :  { %v4338_v51 = vunpack.i.h.bf16 %v4336_v57  ;;  %v4337_v5 = vunpack.i.l.bf16 %v4336_v57  ;;  %v2894_v7 = vsel %vm288_vm0, %v2878_v47, %v4312_v46  ;;  %v2895_v23 = vsel %vm288_vm0, %v2879_v26, %v4313_v2 }
 0x372   :  { %v4321_v40 = vpop.permute.xlu0 %4320 }
 0x373   :  { %v4323_v6 = vunpack.i.h.bf16 %v4321_v40  ;;  %v4322_v16 = vunpack.i.l.bf16 %v4321_v40  ;;  %v2812_v18 = vsel %vm2799_vm5, %v2795_v38, %v4337_v5  ;;  %v2813_v37 = vsel %vm2799_vm5, %v2796_v9, %v4338_v51  ;;  %v1722_v5 = vld [vmem:[#allocation2 + $0x4e0] sm:$0xff] }
 0x374   :  { %v4346_v63 = vpop.permute.xlu1 %4345 }
 0x375   :  { %v4348_v0 = vunpack.i.h.bf16 %v4346_v63  ;;  %v4347_v35 = vunpack.i.l.bf16 %v4346_v63  ;;  %v2910_v44 = vsel %vm2782_vm4, %v2894_v7, %v4322_v16  ;;  %v2911_v24 = vsel %vm2782_vm4, %v2895_v23, %v4323_v6 }
 0x376   :  { %v4331_v62 = vpop.permute.xlu0 %4330 }
 0x377   :  { %v4333_v31 = vunpack.i.h.bf16 %v4331_v62  ;;  %v4332_v36 = vunpack.i.l.bf16 %v4331_v62  ;;  %v2829_v15 = vsel %vm2816_vm6, %v2812_v18, %v4347_v35  ;;  %v2830_v22 = vsel %vm2816_vm6, %v2813_v37, %v4348_v0 }
 0x378   :  { %v4356_v61 = vpop.permute.xlu1 %4355 }
 0x379   :  { %v4358_v30 = vunpack.i.h.bf16 %v4356_v61  ;;  %v4357_v8 = vunpack.i.l.bf16 %v4356_v61  ;;  %v2926_v10 = vsel %vm2799_vm5, %v2910_v44, %v4332_v36  ;;  %v2927_v54 = vsel %vm2799_vm5, %v2911_v24, %v4333_v31 }
 0x37a   :  { %v4341_v53 = vpop.permute.xlu0 %4340 }
 0x37b   :  { %v4343_v56 = vunpack.i.h.bf16 %v4341_v53  ;;  %v4342_v39 = vunpack.i.l.bf16 %v4341_v53  ;;  %v2846_v17 = vsel %vm2833_vm7, %v2829_v15, %v4357_v8  ;;  %v2847_v41 = vsel %vm2833_vm7, %v2830_v22, %v4358_v30 }
 0x37c   :  { %v4366_v21 = vpop.permute.xlu1 %4365  ;;  %v2974_v45 = vpack.c.bf16 %v2847_v41, %v2846_v17 }
 0x37d   :  { %v2942_v49 = vsel %vm2816_vm6, %v2926_v10, %v4342_v39  ;;  %v2943_v43 = vsel %vm2816_vm6, %v2927_v54, %v4343_v56  ;;  %v4368_v34 = vunpack.i.h.bf16 %v4366_v21  ;;  %v4367_v11 = vunpack.i.l.bf16 %v4366_v21 }
 0x37e   :  { %v4351_v25 = vpop.permute.xlu0 %4350 }
 0x37f   :  { %v4353_v33 = vunpack.i.h.bf16 %v4351_v25  ;;  %v4352_v60 = vunpack.i.l.bf16 %v4351_v25  ;;  %v2748_v63 = vsel %vm676_vm1, %v1721_v19, %v4368_v34  ;;  %v2747_v47 = vsel %vm676_vm1, %v7207_v27, %v4367_v11 }
 0x380   :  { %v4376_v59 = vpop.permute.xlu1 %4375 }
 0x381   :  { %v2958_v48 = vsel %vm2833_vm7, %v2942_v49, %v4352_v60  ;;  %v2959_v20 = vsel %vm2833_vm7, %v2943_v43, %v4353_v33  ;;  %v4378_v50 = vunpack.i.h.bf16 %v4376_v59  ;;  %v4377_v29 = vunpack.i.l.bf16 %v4376_v59 }
 0x382   :  { %v4361_v1 = vpop.permute.xlu0 %4360  ;;  %v2975_v40 = vpack.c.bf16 %v2959_v20, %v2958_v48 }
 0x383   :  { %v4363_v14 = vunpack.i.h.bf16 %v4361_v1  ;;  %v4362_v28 = vunpack.i.l.bf16 %v4361_v1  ;;  %v2764_v0 = vsel %vm2749_vm3, %v2747_v47, %v4377_v29  ;;  %v2765_v35 = vsel %vm2749_vm3, %v2748_v63, %v4378_v50 }
 0x384   :  { %3193 = vmatprep.mubr.bf16.mxu1 %v2975_v40  ;;  %v4386_v57 = vpop.permute.xlu1 %4385 }
 0x385   :  { %3194 = vmatmul.mubr.bf16.gmra.mxu1 %v2974_v45  ;;  %v4388_v58 = vunpack.i.h.bf16 %v4386_v57  ;;  %v4387_v51 = vunpack.i.l.bf16 %v4386_v57  ;;  %v2865_v26 = vsel %vm676_vm1, %v1722_v5, %v4363_v14  ;;  %v2864_v4 = vsel %vm676_vm1, %v1721_v19, %v4362_v28 }
 0x386   :  { %v4371_v12 = vpop.permute.xlu0 %4370 }
 0x387   :  { %v4373_v62 = vunpack.i.h.bf16 %v4371_v12  ;;  %v4372_v52 = vunpack.i.l.bf16 %v4371_v12  ;;  %v2780_v27 = vsel %vm288_vm0, %v2764_v0, %v4387_v51  ;;  %v2781_v31 = vsel %vm288_vm0, %v2765_v35, %v4388_v58 }
 0x388   :  { %v4396_v42 = vpop.permute.xlu1 %4395 }
 0x389   :  { %v4398_v13 = vunpack.i.h.bf16 %v4396_v42  ;;  %v4397_v2 = vunpack.i.l.bf16 %v4396_v42  ;;  %v2880_v9 = vsel %vm2749_vm3, %v2864_v4, %v4372_v52  ;;  %v2881_v53 = vsel %vm2749_vm3, %v2865_v26, %v4373_v62 }
 0x38a   :  { %v4381_v3 = vpop.permute.xlu0 %4380 }
 0x38b   :  { %v4383_v36 = vunpack.i.h.bf16 %v4381_v3  ;;  %v4382_v18 = vunpack.i.l.bf16 %v4381_v3  ;;  %v2797_v30 = vsel %vm2782_vm4, %v2780_v27, %v4397_v2  ;;  %v2798_v8 = vsel %vm2782_vm4, %v2781_v31, %v4398_v13  ;;  %v7271_v27 = vld [vmem:[%s7662_s6] ss:$0 sm:$0xff] }
 0x38c   :  { %v4406_v32 = vpop.permute.xlu1 %4405 }
 0x38d   :  { %v4408_v6 = vunpack.i.h.bf16 %v4406_v32  ;;  %v4407_v16 = vunpack.i.l.bf16 %v4406_v32  ;;  %v2896_v54 = vsel %vm288_vm0, %v2880_v9, %v4382_v18  ;;  %v2897_v33 = vsel %vm288_vm0, %v2881_v53, %v4383_v36 }
 0x38e   :  { %v4391_v55 = vpop.permute.xlu0 %4390 }
 0x38f   :  { %v4393_v56 = vunpack.i.h.bf16 %v4391_v55  ;;  %v4392_v39 = vunpack.i.l.bf16 %v4391_v55  ;;  %v2814_v22 = vsel %vm2799_vm5, %v2797_v30, %v4407_v16  ;;  %v2815_v44 = vsel %vm2799_vm5, %v2798_v8, %v4408_v6 }
 0x390   :  { %v4416_v38 = vpop.permute.xlu1 %4415 }
 0x391   :  { %v4418_v37 = vunpack.i.h.bf16 %v4416_v38  ;;  %v4417_v61 = vunpack.i.l.bf16 %v4416_v38  ;;  %v2912_v49 = vsel %vm2782_vm4, %v2896_v54, %v4392_v39  ;;  %v2913_v43 = vsel %vm2782_vm4, %v2897_v33, %v4393_v56 }
 0x392   :  { %v4401_v46 = vpop.permute.xlu0 %4400 }
 0x393   :  { %v4403_v23 = vunpack.i.h.bf16 %v4401_v46  ;;  %v4402_v15 = vunpack.i.l.bf16 %v4401_v46  ;;  %v2831_v60 = vsel %vm2816_vm6, %v2814_v22, %v4417_v61  ;;  %v2832_v21 = vsel %vm2816_vm6, %v2815_v44, %v4418_v37 }
 0x394   :  { %v4426_v24 = vpop.permute.xlu1 %4425 }
 0x395   :  { %v4428_v41 = vunpack.i.h.bf16 %v4426_v24  ;;  %v4427_v10 = vunpack.i.l.bf16 %v4426_v24  ;;  %v2928_v1 = vsel %vm2799_vm5, %v2912_v49, %v4402_v15  ;;  %v2929_v40 = vsel %vm2799_vm5, %v2913_v43, %v4403_v23 }
 0x396   :  { %v4411_v7 = vpop.permute.xlu0 %4410 }
 0x397   :  { %v4413_v25 = vunpack.i.h.bf16 %v4411_v7  ;;  %v4412_v17 = vunpack.i.l.bf16 %v4411_v7  ;;  %v2848_v20 = vsel %vm2833_vm7, %v2831_v60, %v4427_v10  ;;  %v2849_v45 = vsel %vm2833_vm7, %v2832_v21, %v4428_v41 }
 0x398   :  { %v2976_v11 = vpack.c.bf16 %v2849_v45, %v2848_v20 }
 0x399   :  { %v2944_v57 = vsel %vm2816_vm6, %v2928_v1, %v4412_v17  ;;  %v2945_v3 = vsel %vm2816_vm6, %v2929_v40, %v4413_v25 }
 0x39a   :  { %v4421_v48 = vpop.permute.xlu0 %4420 }
 0x39b   :  { %v4423_v59 = vunpack.i.h.bf16 %v4421_v48  ;;  %v4422_v12 = vunpack.i.l.bf16 %v4421_v48 }
 0x39d   :  { %v2960_v42 = vsel %vm2833_vm7, %v2944_v57, %v4422_v12  ;;  %v2961_v34 = vsel %vm2833_vm7, %v2945_v3, %v4423_v59  ;;  %v3737_v28 = vpop.f32.mrf.mxu1 }
 0x39e   :  { %v2977_v14 = vpack.c.bf16 %v2961_v34, %v2960_v42 }
 0x39f   :  { %v3738_v55 = vpop.f32.mrf.mxu1 }
 0x3a0   :  { %3201 = vmatprep.mubr.bf16.mxu1 %v2977_v14  ;;  %v3739_v9 = vadd.f32 %v3738_v55, %v3737_v28 }
 0x3a1   :  { %3202 = vmatmul.mubr.bf16.gmra.mxu1 %v2976_v11  ;;  %v3740_v50 = vpop.f32.mrf.mxu1 }
 0x3a2   :  { %v7277_v37 = vadd.f32 %v3739_v9, %v7271_v27 }
 0x3a3   :  { %v3741_v29 = vpop.f32.mrf.mxu1 }
 0x3a4   :  { %v3742_v38 = vadd.f32 %v3741_v29, %v3740_v50  ;;  %v3212_v15 = vsel %vm2749_vm3, %v7277_v37, 0.0 }
 0x3a6   :  { %v7274_v36 = vadd.f32 %v3742_v38, %v7271_v27 }
 0x3a8   :  { %v3213_v30 = vsel %vm2749_vm3, %v7274_v36, 0.0 }
 0x3a9   :  { %v3214_v25 = vadd.f32 %v3213_v30, %v3212_v15 }
 0x3b9   :  { %v3743_v32 = vpop.f32.mrf.mxu1 }
 0x3bb   :  { %v3744_v19 = vpop.f32.mrf.mxu1 }
 0x3bc   :  { %v3745_v53 = vadd.f32 %v3744_v19, %v3743_v32 }
 0x3bd   :  { %v3746_v62 = vpop.f32.mrf.mxu1 }
 0x3be   :  { %v7280_v61 = vadd.f32 %v3745_v53, %v7271_v27 }
 0x3bf   :  { %v3747_v52 = vpop.f32.mrf.mxu1 }
 0x3c0   :  { %v3748_v18 = vadd.f32 %v3747_v52, %v3746_v62  ;;  %v3215_v22 = vsel %vm2749_vm3, %v7280_v61, 0.0 }
 0x3c1   :  { %v3216_v54 = vadd.f32 %v3215_v22, %v3214_v25 }
 0x3c2   :  { %v7285_v8 = vadd.f32 %v3748_v18, %v7271_v27 }
 0x3c4   :  { %v3217_v17 = vsel %vm2749_vm3, %v7285_v8, 0.0 }
 0x3c5   :  { %v3218_v43 = vadd.f32 %v3217_v17, %v3216_v54 }
 0x3d5   :  { %v3749_v58 = vpop.f32.mrf.mxu1 }
 0x3d7   :  { %v3750_v51 = vpop.f32.mrf.mxu1 }
 0x3d8   :  { %v3751_v56 = vadd.f32 %v3750_v51, %v3749_v58 }
 0x3d9   :  { %v3752_v5 = vpop.f32.mrf.mxu1 }
 0x3da   :  { %v7292_v44 = vadd.f32 %v3751_v56, %v7271_v27 }
 0x3db   :  { %v3753_v63 = vpop.f32.mrf.mxu1 }
 0x3dc   :  { %v3754_v7 = vadd.f32 %v3753_v63, %v3752_v5  ;;  %v3219_v60 = vsel %vm2749_vm3, %v7292_v44, 0.0 }
 0x3dd   :  { %v3220_v1 = vadd.f32 %v3219_v60, %v3218_v43 }
 0x3de   :  { %v7297_v41 = vadd.f32 %v3754_v7, %v7271_v27 }
 0x3e0   :  { %v3221_v48 = vsel %vm2749_vm3, %v7297_v41, 0.0 }
 0x3e1   :  { %v3222_v3 = vadd.f32 %v3221_v48, %v3220_v1 }
 0x3f1   :  { %v3755_v47 = vpop.f32.mrf.mxu1 }
 0x3f3   :  { %v3756_v26 = vpop.f32.mrf.mxu1 }
 0x3f4   :  { %v3757_v24 = vadd.f32 %v3756_v26, %v3755_v47 }
 0x3f5   :  { %v3758_v4 = vpop.f32.mrf.mxu1 }
 0x3f6   :  { %v7302_v21 = vadd.f32 %v3757_v24, %v7271_v27 }
 0x3f7   :  { %v3759_v13 = vpop.f32.mrf.mxu1 }
 0x3f8   :  { %v3760_v10 = vadd.f32 %v3759_v13, %v3758_v4  ;;  %v3223_v59 = vsel %vm2749_vm3, %v7302_v21, 0.0 }
 0x3f9   :  { %v3224_v14 = vadd.f32 %v3223_v59, %v3222_v3 }
 0x3fa   :  { %v7307_v20 = vadd.f32 %v3760_v10, %v7271_v27 }
 0x3fc   :  { %v3225_v42 = vsel %vm2749_vm3, %v7307_v20, 0.0 }
 0x3fd   :  { %v3226_v32 = vadd.f32 %v3225_v42, %v3224_v14 }
 0x40d   :  { %v3761_v2 = vpop.f32.mrf.mxu1 }
 0x40f   :  { %v3762_v46 = vpop.f32.mrf.mxu1 }
 0x410   :  { %v3763_v49 = vadd.f32 %v3762_v46, %v3761_v2 }
 0x411   :  { %v3764_v0 = vpop.f32.mrf.mxu1 }
 0x412   :  { %v7312_v12 = vadd.f32 %v3763_v49, %v7271_v27 }
 0x413   :  { %v3765_v35 = vpop.f32.mrf.mxu1 }
 0x414   :  { %v3766_v45 = vadd.f32 %v3765_v35, %v3764_v0  ;;  %v3227_v55 = vsel %vm2749_vm3, %v7312_v12, 0.0 }
 0x415   :  { %v3228_v58 = vadd.f32 %v3227_v55, %v3226_v32 }
 0x416   :  { %v7317_v34 = vadd.f32 %v3766_v45, %v7271_v27 }
 0x418   :  { %v3229_v19 = vsel %vm2749_vm3, %v7317_v34, 0.0 }
 0x419   :  { %v3230_v63 = vadd.f32 %v3229_v19, %v3228_v58 }
 0x429   :  { %v3767_v6 = vpop.f32.mrf.mxu1 }
 0x42b   :  { %v3768_v16 = vpop.f32.mrf.mxu1 }
 0x42c   :  { %v3769_v57 = vadd.f32 %v3768_v16, %v3767_v6 }
 0x42d   :  { %v3770_v31 = vpop.f32.mrf.mxu1 }
 0x42e   :  { %v7322_v50 = vadd.f32 %v3769_v57, %v7271_v27 }
 0x42f   :  { %v3771_v39 = vpop.f32.mrf.mxu1 }
 0x430   :  { %v3772_v11 = vadd.f32 %v3771_v39, %v3770_v31  ;;  %v3231_v51 = vsel %vm2749_vm3, %v7322_v50, 0.0 }
 0x431   :  { %v3232_v13 = vadd.f32 %v3231_v51, %v3230_v63 }
 0x432   :  { %v7327_v62 = vadd.f32 %v3772_v11, %v7271_v27 }
 0x434   :  { %v3233_v26 = vsel %vm2749_vm3, %v7327_v62, 0.0 }
 0x435   :  { %v3234_v35 = vadd.f32 %v3233_v26, %v3232_v13 }
 0x445   :  { %v3773_v23 = vpop.f32.mrf.mxu1 }
 0x447   :  { %v3774_v33 = vpop.f32.mrf.mxu1 }
 0x448   :  { %v3775_v29 = vadd.f32 %v3774_v33, %v3773_v23 }
 0x449   :  { %v3776_v40 = vpop.f32.mrf.mxu1 }
 0x44a   :  { %v7332_v5 = vadd.f32 %v3775_v29, %v7271_v27 }
 0x44b   :  { %v3777_v28 = vpop.f32.mrf.mxu1 }
 0x44c   :  { %v3778_v52 = vadd.f32 %v3777_v28, %v3776_v40  ;;  %v3235_v46 = vsel %vm2749_vm3, %v7332_v5, 0.0 }
 0x44d   :  { %v3236_v9 = vadd.f32 %v3235_v46, %v3234_v35 }
 0x44e   :  { %v7337_v4 = vadd.f32 %v3778_v52, %v7271_v27 }
 0x450   :  { %v3237_v16 = vsel %vm2749_vm3, %v7337_v4, 0.0 }
 0x451   :  { %v3238_v56 = vadd.f32 %v3237_v16, %v3236_v9 }
 0x461   :  { %v3779_v47 = vpop.f32.mrf.mxu1 }
 0x463   :  { %v3780_v2 = vpop.f32.mrf.mxu1 }
 0x464   :  { %v3781_v0 = vadd.f32 %v3780_v2, %v3779_v47 }
 0x465   :  { %v3782_v6 = vpop.f32.mrf.mxu1 }
 0x466   :  { %v3204_v38 = vadd.f32 %v3781_v0, %v7271_v27 }
 0x467   :  { %v3783_v53 = vpop.f32.mrf.mxu1 }
 0x468   :  { %v3239_v31 = vsel %vm2749_vm3, %v3204_v38, 0.0  ;;  %v3784_v18 = vadd.f32 %v3783_v53, %v3782_v6 }
 0x469   :  { %v3240_v30 = vadd.f32 %v3239_v31, %v3238_v56 }
 0x46a   :  { %v3207_v39 = vadd.f32 %v3784_v18, %v7271_v27 }
 0x46c   :  { %v3241_v7 = vsel %vm2749_vm3, %v3207_v39, 0.0 }
 0x46d   :  { %v3242_v23 = vadd.f32 %v3241_v7, %v3240_v30 }
 0x46f   :  { %v3243_v15 = vrot.slane %v3242_v23, 4 }
 0x471   :  { %v3244_v22 = vadd.f32 %v3243_v15, %v3242_v23 }
 0x473   :  { %v3245_v24 = vrot.slane %v3244_v22, 2 }
 0x475   :  { %v3246_v25 = vadd.f32 %v3245_v24, %v3244_v22 }
 0x477   :  { %v3247_v17 = vrot.slane %v3246_v25, 1 }
 0x479   :  { %v3248_v10 = vadd.f32 %v3247_v17, %v3246_v25 }
 0x47b   :  { %v3250_v54 = vmul.f32 0.0078125, %v3248_v10 }
 0x47d   :  { %v7348_v33 = vsub.f32 %v7277_v37, %v3250_v54  ;;  %v7351_v60 = vsub.f32 %v7274_v36, %v3250_v54  ;;  %v7354_v49 = vsub.f32 %v7280_v61, %v3250_v54  ;;  %v7357_v27 = vsub.f32 %v7285_v8, %v3250_v54 }
 0x47e   :  { %v7364_v45 = vsub.f32 %v7292_v44, %v3250_v54  ;;  %v7369_v36 = vsub.f32 %v7297_v41, %v3250_v54  ;;  %v7376_v59 = vsub.f32 %v7302_v21, %v3250_v54  ;;  %v7382_v41 = vsub.f32 %v7307_v20, %v3250_v54 }
 0x47f   :  { %v3267_v43 = vmul.f32 %v7348_v33, %v7348_v33  ;;  %v3268_v48 = vmul.f32 %v7351_v60, %v7351_v60  ;;  %v3269_v37 = vmul.f32 %v7354_v49, %v7354_v49  ;;  %v3270_v61 = vmul.f32 %v7357_v27, %v7357_v27 }
 0x480   :  { %v3271_v44 = vmul.f32 %v7364_v45, %v7364_v45  ;;  %v3272_v42 = vmul.f32 %v7369_v36, %v7369_v36  ;;  %v7388_v28 = vsub.f32 %v7312_v12, %v3250_v54  ;;  %v3273_v21 = vmul.f32 %v7376_v59, %v7376_v59 }
 0x481   :  { %v3283_v8 = vsel %vm2749_vm3, %v3267_v43, 0.0  ;;  %v3284_v1 = vsel %vm2749_vm3, %v3268_v48, 0.0  ;;  %v3286_v57 = vsel %vm2749_vm3, %v3269_v37, 0.0  ;;  %v3288_v11 = vsel %vm2749_vm3, %v3270_v61, 0.0 }
 0x482   :  { %v3285_v40 = vadd.f32 %v3284_v1, %v3283_v8  ;;  %v3290_v55 = vsel %vm2749_vm3, %v3271_v44, 0.0  ;;  %v7394_v32 = vsub.f32 %v7317_v34, %v3250_v54  ;;  %v3274_v20 = vmul.f32 %v7382_v41, %v7382_v41 }
 0x483   :  { %v3292_v19 = vsel %vm2749_vm3, %v3272_v42, 0.0  ;;  %v7400_v58 = vsub.f32 %v7322_v50, %v3250_v54  ;;  %v3275_v12 = vmul.f32 %v7388_v28, %v7388_v28  ;;  %v3294_v51 = vsel %vm2749_vm3, %v3273_v21, 0.0  ;;  %v7454_v21 = vld [vmem:[%s7664_s8] ss:$0 sm:$0xff] }
 0x484   :  { %v3287_v3 = vadd.f32 %v3286_v57, %v3285_v40  ;;  %v7406_v47 = vsub.f32 %v7327_v62, %v3250_v54  ;;  %v3276_v34 = vmul.f32 %v7394_v32, %v7394_v32  ;;  %v3296_v26 = vsel %vm2749_vm3, %v3274_v20, 0.0  ;;  %v7442_v57 = vld [vmem:[%s7663_s7] ss:$0 sm:$0xff] }
 0x485   :  { %v7412_v2 = vsub.f32 %v7332_v5, %v3250_v54  ;;  %v3277_v50 = vmul.f32 %v7400_v58, %v7400_v58  ;;  %v3298_v46 = vsel %vm2749_vm3, %v3275_v12, 0.0  ;;  %v7418_v35 = vsub.f32 %v7337_v4, %v3250_v54 }
 0x486   :  { %v3289_v14 = vadd.f32 %v3288_v11, %v3287_v3  ;;  %v3278_v62 = vmul.f32 %v7406_v47, %v7406_v47  ;;  %v3300_v6 = vsel %vm2749_vm3, %v3276_v34, 0.0  ;;  %v7423_v9 = vsub.f32 %v3204_v38, %v3250_v54 }
 0x487   :  { %v3279_v5 = vmul.f32 %v7412_v2, %v7412_v2  ;;  %v3302_v53 = vsel %vm2749_vm3, %v3277_v50, 0.0  ;;  %v3266_v18 = vsub.f32 %v3207_v39, %v3250_v54  ;;  %v3280_v56 = vmul.f32 %v7418_v35, %v7418_v35 }
 0x488   :  { %v3291_v29 = vadd.f32 %v3290_v55, %v3289_v14  ;;  %v3304_v4 = vsel %vm2749_vm3, %v3278_v62, 0.0  ;;  %v3281_v7 = vmul.f32 %v7423_v9, %v7423_v9 }
 0x489   :  { %v3306_v23 = vsel %vm2749_vm3, %v3279_v5, 0.0  ;;  %v3282_v15 = vmul.f32 %v3266_v18, %v3266_v18  ;;  %v3308_v22 = vsel %vm2749_vm3, %v3280_v56, 0.0 }
 0x48a   :  { %v3293_v52 = vadd.f32 %v3292_v19, %v3291_v29  ;;  %v3310_v25 = vsel %vm2749_vm3, %v3281_v7, 0.0 }
 0x48b   :  { %v3312_v39 = vsel %vm2749_vm3, %v3282_v15, 0.0 }
 0x48c   :  { %v3295_v63 = vadd.f32 %v3294_v51, %v3293_v52 }
 0x48e   :  { %v3297_v13 = vadd.f32 %v3296_v26, %v3295_v63 }
 0x490   :  { %v3299_v0 = vadd.f32 %v3298_v46, %v3297_v13 }
 0x492   :  { %v3301_v16 = vadd.f32 %v3300_v6, %v3299_v0 }
 0x494   :  { %v3303_v31 = vadd.f32 %v3302_v53, %v3301_v16 }
 0x496   :  { %v3305_v30 = vadd.f32 %v3304_v4, %v3303_v31 }
 0x498   :  { %v3307_v38 = vadd.f32 %v3306_v23, %v3305_v30 }
 0x49a   :  { %v3309_v24 = vadd.f32 %v3308_v22, %v3307_v38 }
 0x49c   :  { %v3311_v17 = vadd.f32 %v3310_v25, %v3309_v24 }
 0x49e   :  { %v3313_v10 = vadd.f32 %v3312_v39, %v3311_v17 }
 0x4a0   :  { %v3314_v54 = vrot.slane %v3313_v10, 4 }
 0x4a2   :  { %v3315_v43 = vadd.f32 %v3314_v54, %v3313_v10 }
 0x4a4   :  { %v3316_v48 = vrot.slane %v3315_v43, 2 }
 0x4a6   :  { %v3317_v37 = vadd.f32 %v3316_v48, %v3315_v43 }
 0x4a8   :  { %v3318_v61 = vrot.slane %v3317_v37, 1 }
 0x4aa   :  { %v3319_v8 = vadd.f32 %v3318_v61, %v3317_v37 }
 0x4ac   :  { %v3320_v1 = vmul.f32 0.0078125, %v3319_v8 }
 0x4ae   :  { %v3321_v40 = vadd.f32 0.001, %v3320_v1 }
 0x4b0   :  { %4482 = vrsqrt.f32 %v3321_v40 }
 0x4bd   :  { %v7437_v44 = vpop.eup %4482 }
 0x4be   :  { %v3338_v3 = vmul.f32 %v7437_v44, %v3266_v18  ;;  %v3324_v42 = vmul.f32 %v7437_v44, %v7351_v60  ;;  %v3323_v11 = vmul.f32 %v7437_v44, %v7348_v33  ;;  %v3326_v14 = vmul.f32 %v7437_v44, %v7357_v27 }
 0x4bf   :  { %v3325_v55 = vmul.f32 %v7437_v44, %v7354_v49  ;;  %v3328_v29 = vmul.f32 %v7437_v44, %v7369_v36  ;;  %v3327_v60 = vmul.f32 %v7437_v44, %v7364_v45  ;;  %v3330_v33 = vmul.f32 %v7437_v44, %v7382_v41 }
 0x4c0   :  { %v3360_v20 = vmul.f32 %v7442_v57, %v3338_v3  ;;  %v3346_v27 = vmul.f32 %v7442_v57, %v3324_v42  ;;  %v3345_v19 = vmul.f32 %v7442_v57, %v3323_v11  ;;  %v3348_v52 = vmul.f32 %v7442_v57, %v3326_v14 }
 0x4c1   :  { %v3347_v12 = vmul.f32 %v7442_v57, %v3325_v55  ;;  %v3350_v49 = vmul.f32 %v7442_v57, %v3328_v29  ;;  %v3349_v36 = vmul.f32 %v7442_v57, %v3327_v60  ;;  %v3352_v51 = vmul.f32 %v7442_v57, %v3330_v33 }
 0x4c2   :  { %v3368_v45 = vadd.f32 %v7454_v21, %v3346_v27  ;;  %v3367_v41 = vadd.f32 %v7454_v21, %v3345_v19  ;;  %v3370_v63 = vadd.f32 %v7454_v21, %v3348_v52  ;;  %v3329_v34 = vmul.f32 %v7437_v44, %v7376_v59 }
 0x4c3   :  { %v3369_v26 = vadd.f32 %v7454_v21, %v3347_v12  ;;  %v3372_v13 = vadd.f32 %v7454_v21, %v3350_v49  ;;  %v3371_v50 = vadd.f32 %v7454_v21, %v3349_v36  ;;  %v3374_v46 = vadd.f32 %v7454_v21, %v3352_v51 }
 0x4c4   :  { %v3384_v0 = vmax.f32 %v3368_v45, 0.0  ;;  %v3383_v62 = vmax.f32 %v3367_v41, 0.0  ;;  %v3386_v6 = vmax.f32 %v3370_v63, 0.0  ;;  %v3351_v16 = vmul.f32 %v7442_v57, %v3329_v34 }
 0x4c5   :  { %v3385_v5 = vmax.f32 %v3369_v26, 0.0  ;;  %v3388_v53 = vmax.f32 %v3372_v13, 0.0  ;;  %v3387_v31 = vmax.f32 %v3371_v50, 0.0  ;;  %v3390_v18 = vmax.f32 %v3374_v46, 0.0 }
 0x4c6   :  { %v3671_v56 = vpack.c.bf16 %v3384_v0, %v3384_v0  ;;  %v3670_v4 = vpack.c.bf16 %v3383_v62, %v3383_v62  ;;  %v3673_v59 = vpack.c.bf16 %v3386_v6, %v3386_v6  ;;  %v3373_v30 = vadd.f32 %v7454_v21, %v3351_v16 }
 0x4c7   :  { %v3672_v7 = vpack.c.bf16 %v3385_v5, %v3385_v5  ;;  %v3675_v23 = vpack.c.bf16 %v3388_v53, %v3388_v53  ;;  %v3674_v38 = vpack.c.bf16 %v3387_v31, %v3387_v31  ;;  %v3677_v15 = vpack.c.bf16 %v3390_v18, %v3390_v18 }
 0x4c8   :  { %3482 = vrot.lane.b32.xlu1 %v3671_v56, %s4491_s0  ;;  %3465 = vst.msk [vmem:[%s7665_s9 + $0x4] sm:$0xf] %vm3463_vm8, %v3671_v56  ;;  %3480 = vrot.lane.b32.xlu0 %v3670_v4, %s4491_s0  ;;  %3464 = vst.msk [vmem:[%s7665_s9] sm:$0xf] %vm3463_vm8, %v3670_v4  ;;  %v3389_v22 = vmax.f32 %v3373_v30, 0.0  ;;  %v3332_v24 = vmul.f32 %v7437_v44, %v7394_v32  ;;  %v3331_v25 = vmul.f32 %v7437_v44, %v7388_v28 }
 0x4c9   :  { %3467 = vst.msk [vmem:[%s7665_s9 + $0xc] sm:$0xf] %vm3463_vm8, %v3673_v59  ;;  %v3334_v17 = vmul.f32 %v7437_v44, %v7406_v47  ;;  %3466 = vst.msk [vmem:[%s7665_s9 + $0x8] sm:$0xf] %vm3463_vm8, %v3672_v7  ;;  %v3333_v28 = vmul.f32 %v7437_v44, %v7400_v58  ;;  %v3336_v32 = vmul.f32 %v7437_v44, %v7418_v35 }
 0x4ca   :  { %3469 = vst.msk [vmem:[%s7665_s9 + $0x14] sm:$0xf] %vm3463_vm8, %v3675_v23  ;;  %3468 = vst.msk [vmem:[%s7665_s9 + $0x10] sm:$0xf] %vm3463_vm8, %v3674_v38  ;;  %v3335_v47 = vmul.f32 %v7437_v44, %v7412_v2  ;;  %v3382_v39 = vadd.f32 %v7454_v21, %v3360_v20  ;;  %v3676_v10 = vpack.c.bf16 %v3389_v22, %v3389_v22 }
 0x4cb   :  { %3471 = vst.msk [vmem:[%s7665_s9 + $0x1c] sm:$0xf] %vm3463_vm8, %v3677_v15  ;;  %v3354_v54 = vmul.f32 %v7442_v57, %v3332_v24  ;;  %v3353_v43 = vmul.f32 %v7442_v57, %v3331_v25  ;;  %v3356_v48 = vmul.f32 %v7442_v57, %v3334_v17  ;;  %v3355_v37 = vmul.f32 %v7442_v57, %v3333_v28 }
 0x4cc   :  { %v3358_v61 = vmul.f32 %v7442_v57, %v3336_v32  ;;  %v3357_v58 = vmul.f32 %v7442_v57, %v3335_v47  ;;  %v3398_v8 = vmax.f32 %v3382_v39, 0.0  ;;  %3486 = vrot.lane.b32.xlu1 %v3673_v59, %s4491_s0  ;;  %3484 = vrot.lane.b32.xlu0 %v3672_v7, %s4491_s0  ;;  %3470 = vst.msk [vmem:[%s7665_s9 + $0x18] sm:$0xf] %vm3463_vm8, %v3676_v10 }
 0x4cd   :  { %v3376_v2 = vadd.f32 %v7454_v21, %v3354_v54  ;;  %v3375_v35 = vadd.f32 %v7454_v21, %v3353_v43  ;;  %v3378_v1 = vadd.f32 %v7454_v21, %v3356_v48  ;;  %v3377_v40 = vadd.f32 %v7454_v21, %v3355_v37 }
 0x4ce   :  { %v3380_v3 = vadd.f32 %v7454_v21, %v3358_v61  ;;  %v3379_v42 = vadd.f32 %v7454_v21, %v3357_v58  ;;  %v3685_v11 = vpack.c.bf16 %v3398_v8, %v3398_v8  ;;  %v3337_v60 = vmul.f32 %v7437_v44, %v7423_v9 }
 0x4cf   :  { %v3392_v14 = vmax.f32 %v3376_v2, 0.0  ;;  %v3391_v55 = vmax.f32 %v3375_v35, 0.0  ;;  %v3394_v29 = vmax.f32 %v3378_v1, 0.0  ;;  %v3393_v33 = vmax.f32 %v3377_v40, 0.0 }
 0x4d0   :  { %v3396_v20 = vmax.f32 %v3380_v3, 0.0  ;;  %v3395_v27 = vmax.f32 %v3379_v42, 0.0  ;;  %3479 = vst.msk [vmem:[%s7665_s9 + $0x5c] sm:$0xf] %vm3463_vm8, %v3685_v11  ;;  %3490 = vrot.lane.b32.xlu1 %v3675_v23, %s4491_s0  ;;  %3488 = vrot.lane.b32.xlu0 %v3674_v38, %s4491_s0  ;;  %v3359_v9 = vmul.f32 %v7442_v57, %v3337_v60 }
 0x4d1   :  { %v3679_v19 = vpack.c.bf16 %v3392_v14, %v3392_v14  ;;  %v3678_v52 = vpack.c.bf16 %v3391_v55, %v3391_v55  ;;  %v3681_v12 = vpack.c.bf16 %v3394_v29, %v3394_v29  ;;  %v3680_v49 = vpack.c.bf16 %v3393_v33, %v3393_v33 }
 0x4d2   :  { %v3683_v36 = vpack.c.bf16 %v3396_v20, %v3396_v20  ;;  %v3682_v51 = vpack.c.bf16 %v3395_v27, %v3395_v27  ;;  %v3381_v44 = vadd.f32 %v7454_v21, %v3359_v9 }
 0x4d3   :  { %3473 = vst.msk [vmem:[%s7665_s9 + $0x44] sm:$0xf] %vm3463_vm8, %v3679_v19  ;;  %3472 = vst.msk [vmem:[%s7665_s9 + $0x40] sm:$0xf] %vm3463_vm8, %v3678_v52 }
 0x4d4   :  { %3475 = vst.msk [vmem:[%s7665_s9 + $0x4c] sm:$0xf] %vm3463_vm8, %v3681_v12  ;;  %3474 = vst.msk [vmem:[%s7665_s9 + $0x48] sm:$0xf] %vm3463_vm8, %v3680_v49  ;;  %3494 = vrot.lane.b32.xlu1 %v3677_v15, %s4491_s0  ;;  %3492 = vrot.lane.b32.xlu0 %v3676_v10, %s4491_s0  ;;  %v3397_v57 = vmax.f32 %v3381_v44, 0.0 }
 0x4d5   :  { %3477 = vst.msk [vmem:[%s7665_s9 + $0x54] sm:$0xf] %vm3463_vm8, %v3683_v36  ;;  %3476 = vst.msk [vmem:[%s7665_s9 + $0x50] sm:$0xf] %vm3463_vm8, %v3682_v51 }
 0x4d6   :  { %v3684_v45 = vpack.c.bf16 %v3397_v57, %v3397_v57 }
 0x4d8   :  { %3498 = vrot.lane.b32.xlu1 %v3679_v19, %s4491_s0  ;;  %3496 = vrot.lane.b32.xlu0 %v3678_v52, %s4491_s0  ;;  %3478 = vst.msk [vmem:[%s7665_s9 + $0x58] sm:$0xf] %vm3463_vm8, %v3684_v45 }
 0x4dc   :  { %3502 = vrot.lane.b32.xlu1 %v3681_v12, %s4491_s0  ;;  %3500 = vrot.lane.b32.xlu0 %v3680_v49, %s4491_s0 }
 0x4e0   :  { %3506 = vrot.lane.b32.xlu1 %v3683_v36, %s4491_s0  ;;  %3504 = vrot.lane.b32.xlu0 %v3682_v51, %s4491_s0 }
 0x4e4   :  { %3510 = vrot.lane.b32.xlu1 %v3685_v11, %s4491_s0  ;;  %3508 = vrot.lane.b32.xlu0 %v3684_v45, %s4491_s0 }
 0x53a   :  { %v3483_v21 = vpop.permute.xlu1 %3482  ;;  %v3481_v41 = vpop.permute.xlu0 %3480 }
 0x53b   :  { %3655 = vst.msk [vmem:[%s7665_s9 + $0x24] sm:$0xf] %vm3463_vm8, %v3483_v21  ;;  %3654 = vst.msk [vmem:[%s7665_s9 + $0x20] sm:$0xf] %vm3463_vm8, %v3481_v41 }
 0x53e   :  { %v3487_v63 = vpop.permute.xlu1 %3486  ;;  %v3485_v34 = vpop.permute.xlu0 %3484 }
 0x53f   :  { %3657 = vst.msk [vmem:[%s7665_s9 + $0x2c] sm:$0xf] %vm3463_vm8, %v3487_v63  ;;  %3656 = vst.msk [vmem:[%s7665_s9 + $0x28] sm:$0xf] %vm3463_vm8, %v3485_v34 }
 0x542   :  { %v3491_v26 = vpop.permute.xlu1 %3490  ;;  %v3489_v13 = vpop.permute.xlu0 %3488 }
 0x543   :  { %3659 = vst.msk [vmem:[%s7665_s9 + $0x34] sm:$0xf] %vm3463_vm8, %v3491_v26  ;;  %3658 = vst.msk [vmem:[%s7665_s9 + $0x30] sm:$0xf] %vm3463_vm8, %v3489_v13 }
 0x546   :  { %v3495_v50 = vpop.permute.xlu1 %3494  ;;  %v3493_v46 = vpop.permute.xlu0 %3492 }
 0x547   :  { %3661 = vst.msk [vmem:[%s7665_s9 + $0x3c] sm:$0xf] %vm3463_vm8, %v3495_v50  ;;  %3660 = vst.msk [vmem:[%s7665_s9 + $0x38] sm:$0xf] %vm3463_vm8, %v3493_v46 }
 0x54a   :  { %v3499_v0 = vpop.permute.xlu1 %3498  ;;  %v3497_v62 = vpop.permute.xlu0 %3496 }
 0x54b   :  { %3663 = vst.msk [vmem:[%s7665_s9 + $0x64] sm:$0xf] %vm3463_vm8, %v3499_v0  ;;  %3662 = vst.msk [vmem:[%s7665_s9 + $0x60] sm:$0xf] %vm3463_vm8, %v3497_v62 }
 0x54e   :  { %v3503_v6 = vpop.permute.xlu1 %3502  ;;  %v3501_v16 = vpop.permute.xlu0 %3500 }
 0x54f   :  { %3665 = vst.msk [vmem:[%s7665_s9 + $0x6c] sm:$0xf] %vm3463_vm8, %v3503_v6  ;;  %3664 = vst.msk [vmem:[%s7665_s9 + $0x68] sm:$0xf] %vm3463_vm8, %v3501_v16 }
 0x552   :  { %v3507_v5 = vpop.permute.xlu1 %3506  ;;  %v3505_v53 = vpop.permute.xlu0 %3504 }
 0x553   :  { %3667 = vst.msk [vmem:[%s7665_s9 + $0x74] sm:$0xf] %vm3463_vm8, %v3507_v5  ;;  %3666 = vst.msk [vmem:[%s7665_s9 + $0x70] sm:$0xf] %vm3463_vm8, %v3505_v53 }
 0x556   :  { %v3511_v31 = vpop.permute.xlu1 %3510  ;;  %v3509_v18 = vpop.permute.xlu0 %3508 }
 0x557   :  { %3669 = vst.msk [vmem:[%s7665_s9 + $0x7c] sm:$0xf] %vm3463_vm8, %v3511_v31  ;;  %3668 = vst.msk [vmem:[%s7665_s9 + $0x78] sm:$0xf] %vm3463_vm8, %v3509_v18 }

</bundles_post_ra>
